<compile_context>
chip_gen: v7x
topology: tpu7x:2x2x1
jax: 0.10.0
libtpu: 0.0.40
codegen_flags: <defaults>
</compile_context>

<pallas_src>
import functools

import jax
import jax.numpy as jnp
from jax.experimental import pallas as pl
from jax.experimental.pallas import tpu as pltpu

EPS = 1e-5          # nn.GroupNorm default eps
NEG_SLOPE = 0.2     # LeakyReLU slope
LANE = 128


# ----------------------------------------------------------------------------
# small helpers
# ----------------------------------------------------------------------------
def _round_up(n, m):
    return ((n + m - 1) // m) * m


def _pad_lanes(x, lp):
    """Zero-pad the last (lane) axis of (N, C, L) up to lp (no-op if equal)."""
    l = x.shape[-1]
    if l == lp:
        return x
    return jnp.pad(x, ((0, 0), (0, 0), (0, lp - l)))


@functools.lru_cache(maxsize=1)
def _vmem_limit_bytes():
    """Chip-aware scoped-VMEM limit: ~3/4 of physical, clamped to [32, 96] MiB."""
    cap = 128 * 1024 * 1024                      # v5e/v6e physical VMEM fallback
    try:
        cap = int(pltpu.get_tpu_info().vmem_capacity_bytes)
    except Exception:
        pass
    return max(32 * 1024 * 1024, min(96 * 1024 * 1024, (cap * 3) // 4))


def _compiler_params():
    return pltpu.CompilerParams(dimension_semantics=("parallel",),
                                vmem_limit_bytes=_vmem_limit_bytes())


def _cost(flops, nbytes, transcendentals):
    return pl.CostEstimate(flops=int(flops), transcendentals=int(transcendentals),
                           bytes_accessed=int(nbytes))


def _gn_lrelu(z, g, b, inv_count):
    """GroupNorm(groups=1) + LeakyReLU(0.2) on a (C, Lp) f32 tile.

    Single-pass stats in f32; padded lanes of z must already be zero and
    inv_count must be 1 / (C * true_L) so padding does not shift the stats.
    Keep this in f32 on all chips (v5e has no bf16 VPU/EUP).
    """
    s = jnp.sum(z)
    s2 = jnp.sum(z * z)
    mean = s * inv_count
    var = jnp.maximum(s2 * inv_count - mean * mean, 0.0)
    y = (z - mean) * jax.lax.rsqrt(var + EPS) * g + b
    return jnp.where(y >= 0, y, NEG_SLOPE * y)


# ----------------------------------------------------------------------------
# Pallas kernels (one grid step == one sample; weights stay VMEM-resident)
# ----------------------------------------------------------------------------
def _conv_gn_lrelu_kernel(x_ref, w_ref, g_ref, b_ref, o_ref, *, inv_count, true_l):
    # x_ref: (1, Cin, Lp) bf16   w_ref: (Cout, Cin) bf16   g/b: (Cout, 1) f32
    z = jnp.dot(w_ref[...], x_ref[0], preferred_element_type=jnp.float32)
    y = _gn_lrelu(z, g_ref[...], b_ref[...], inv_count)
    o_ref[0] = y.astype(o_ref.dtype)
    if true_l != o_ref.shape[-1]:
        # Downstream (conv2) GN stats require zero pad lanes; narrow static store
        # of the trailing columns only (no full-tile iota+where filler).
        o_ref[0, :, true_l:] = jnp.zeros(
            (o_ref.shape[1], o_ref.shape[-1] - true_l), o_ref.dtype)


def _fu_conv_gn_lrelu_kernel(x_ref, w_ref, g_ref, b_ref, o_ref, *, inv_count):
    # Single stacked spectral 1x1 conv: x rows are [real chans; imag chans],
    # w is the concatenated (2c, 2c) matrix -> one MXU matmul, fused GN+LeakyReLU.
    # Output rows: [real outs; imag outs].  Pad lanes are sliced off by the wrapper.
    z = jnp.dot(w_ref[...], x_ref[0], preferred_element_type=jnp.float32)
    y = _gn_lrelu(z, g_ref[...], b_ref[...], inv_count)
    o_ref[0] = y.astype(o_ref.dtype)


def _sum_conv_gn_lrelu_kernel(x1_ref, fu_ref, xs_ref, w_ref, g_ref, b_ref, o_ref,
                              *, inv_count):
    # Fused residual sum (x1 + fu + lfu) + conv2 + FFtBlock GroupNorm + LeakyReLU.
    # All three residual inputs arrive in bf16; sum and GN math stay in f32.
    s = (x1_ref[0].astype(jnp.float32) + fu_ref[0].astype(jnp.float32)
         + xs_ref[0].astype(jnp.float32))
    z = jnp.dot(w_ref[...], s.astype(jnp.bfloat16),
                preferred_element_type=jnp.float32)
    y = _gn_lrelu(z, g_ref[...], b_ref[...], inv_count)
    o_ref[0] = y.astype(o_ref.dtype)   # pad lanes (if any) sliced off by the wrapper


# ----------------------------------------------------------------------------
# Pallas wrappers
# ----------------------------------------------------------------------------
def conv1x1_gn_lrelu(x_nchw, w, gamma, beta, out_dtype=jnp.bfloat16):
    """1x1 conv (no bias) + GroupNorm(1, Cout) + LeakyReLU(0.2).

    NCHW input; output (N, Cout, Lp) with Lp = round_up(H*W, 128), padded lanes
    zeroed, stored in `out_dtype` (bf16 to halve downstream HBM traffic).
    """
    n, cin, h, wd = x_nchw.shape
    cout = w.shape[0]
    l = h * wd
    lp = _round_up(l, LANE)
    # bf16 cast in the wrapper halves the only large HBM read of this kernel.
    x2 = _pad_lanes(x_nchw.reshape(n, cin, l), lp).astype(jnp.bfloat16)
    wq = w.astype(jnp.bfloat16)
    g2 = gamma.reshape(cout, 1).astype(jnp.float32)
    b2 = beta.reshape(cout, 1).astype(jnp.float32)
    kernel = functools.partial(_conv_gn_lrelu_kernel,
                               inv_count=1.0 / (cout * l), true_l=l)
    io_bytes = (x2.size * 2 + wq.size * 2 + (g2.size + b2.size) * 4
                + n * cout * lp * jnp.dtype(out_dtype).itemsize)
    return pl.pallas_call(
        kernel,
        out_shape=jax.ShapeDtypeStruct((n, cout, lp), out_dtype),
        grid=(n,),
        in_specs=[
            pl.BlockSpec((1, cin, lp), lambda i: (i, 0, 0)),
            pl.BlockSpec((cout, cin), lambda i: (0, 0)),
            pl.BlockSpec((cout, 1), lambda i: (0, 0)),
            pl.BlockSpec((cout, 1), lambda i: (0, 0)),
        ],
        out_specs=pl.BlockSpec((1, cout, lp), lambda i: (i, 0, 0)),
        compiler_params=_compiler_params(),
        cost_estimate=_cost(2 * n * cout * cin * lp + 10 * n * cout * lp,
                            io_bytes, n),
    )(x2, wq, g2, b2)


def fourier_unit(x_img, w, gamma, beta):
    """FourierUnit: rfft2 -> fused spectral 1x1 conv + GN + LeakyReLU -> irfft2.

    x_img: (N, C, H, W) real (f32 or bf16).  Returns (N, C, H, W) float32.
    """
    n, c, h, wd = x_img.shape
    # TODO(synk): rfft2/irfft2 remain in XLA; no Pallas TPU FFT primitive.
    f = jnp.fft.rfft2(x_img.astype(jnp.float32), norm="ortho")   # (N, C, H, Wf) c64
    wf = f.shape[-1]
    l = h * wf
    lp = _round_up(l, LANE)

    # Single stacked operand [real chans; imag chans] -> one (2c,2c)x(2c,Lp) matmul.
    # Same HBM bytes as the old separate re/im planes; the .real/.imag extraction,
    # concat, pad and bf16 cast fuse into one XLA pass over the FFT output.
    x_spec = _pad_lanes(
        jnp.concatenate([f.real, f.imag], axis=1).reshape(n, 2 * c, l), lp
    ).astype(jnp.bfloat16)

    # De-interleave torch's (re, im)-interleaved channel layout of the conv
    # weight / GN affine once in the wrapper (tiny tensors), then concatenate
    # into a single weight consistent with the [real outs; imag outs] row split.
    wre = jnp.concatenate([w[0::2, 0::2], w[1::2, 0::2]], axis=0)        # (2c, c)
    wim = jnp.concatenate([w[0::2, 1::2], w[1::2, 1::2]], axis=0)        # (2c, c)
    wq = jnp.concatenate([wre, wim], axis=1).astype(jnp.bfloat16)        # (2c, 2c)
    g2 = jnp.concatenate([gamma[0::2], gamma[1::2]]).reshape(2 * c, 1).astype(jnp.float32)
    b2 = jnp.concatenate([beta[0::2], beta[1::2]]).reshape(2 * c, 1).astype(jnp.float32)

    kernel = functools.partial(_fu_conv_gn_lrelu_kernel, inv_count=1.0 / (2 * c * l))
    io_bytes = (x_spec.size * 2 + wq.size * 2 + (g2.size + b2.size) * 4
                + n * 2 * c * lp * 2)
    o = pl.pallas_call(
        kernel,
        out_shape=jax.ShapeDtypeStruct((n, 2 * c, lp), jnp.bfloat16),
        grid=(n,),
        in_specs=[
            pl.BlockSpec((1, 2 * c, lp), lambda i: (i, 0, 0)),
            pl.BlockSpec((2 * c, 2 * c), lambda i: (0, 0)),
            pl.BlockSpec((2 * c, 1), lambda i: (0, 0)),
            pl.BlockSpec((2 * c, 1), lambda i: (0, 0)),
        ],
        out_specs=pl.BlockSpec((1, 2 * c, lp), lambda i: (i, 0, 0)),
        compiler_params=_compiler_params(),
        cost_estimate=_cost(2 * n * (2 * c) * (2 * c) * lp + 10 * n * 2 * c * lp,
                            io_bytes, n),
    )(x_spec, wq, g2, b2)

    o_re = o[:, :c, :l].astype(jnp.float32).reshape(n, c, h, wf)
    o_im = o[:, c:, :l].astype(jnp.float32).reshape(n, c, h, wf)
    return jnp.fft.irfft2(jax.lax.complex(o_re, o_im), s=(h, wd), norm="ortho")


def residual_conv2_gn_lrelu(x1_flat, fu_img, xs_img, w, gamma, beta, h, wd):
    """conv2 of (x1 + fu + lfu) fused with the FFtBlock GroupNorm(1) + LeakyReLU.

    x1_flat: (N, C, Lp) bf16 (lane-padded, pads zero); fu_img/xs_img: (N, C, H, W).
    Returns (N, Cout, H, W) float32.
    """
    n, c, lp = x1_flat.shape
    cout = w.shape[0]
    l = h * wd
    # bf16 residual inputs: this kernel is DMA-bound (tiny K), so halving the two
    # largest reads cuts ~40% of its HBM traffic and VMEM footprint.
    fu2 = _pad_lanes(fu_img.reshape(n, c, l), lp).astype(jnp.bfloat16)
    xs2 = _pad_lanes(xs_img.reshape(n, c, l), lp).astype(jnp.bfloat16)
    wq = w.astype(jnp.bfloat16)
    g2 = gamma.reshape(cout, 1).astype(jnp.float32)
    b2 = beta.reshape(cout, 1).astype(jnp.float32)
    kernel = functools.partial(_sum_conv_gn_lrelu_kernel, inv_count=1.0 / (cout * l))
    io_bytes = ((x1_flat.size + fu2.size + xs2.size + wq.size) * 2
                + (g2.size + b2.size) * 4 + n * cout * lp * 4)
    out = pl.pallas_call(
        kernel,
        out_shape=jax.ShapeDtypeStruct((n, cout, lp), jnp.float32),
        grid=(n,),
        in_specs=[
            pl.BlockSpec((1, c, lp), lambda i: (i, 0, 0)),
            pl.BlockSpec((1, c, lp), lambda i: (i, 0, 0)),
            pl.BlockSpec((1, c, lp), lambda i: (i, 0, 0)),
            pl.BlockSpec((cout, c), lambda i: (0, 0)),
            pl.BlockSpec((cout, 1), lambda i: (0, 0)),
            pl.BlockSpec((cout, 1), lambda i: (0, 0)),
        ],
        out_specs=pl.BlockSpec((1, cout, lp), lambda i: (i, 0, 0)),
        compiler_params=_compiler_params(),
        cost_estimate=_cost(2 * n * cout * c * lp + 14 * n * cout * lp,
                            io_bytes, n),
    )(x1_flat, fu2, xs2, wq, g2, b2)
    if l == lp:
        return out.reshape(n, cout, h, wd)         # no pad lanes -> free reshape
    return out[:, :, :l].reshape(n, cout, h, wd)


# ----------------------------------------------------------------------------
# Module forward (FFT glue in plain JAX, hot path in Pallas)
# ----------------------------------------------------------------------------
def fft_block(x, params, enable_lfu=True, stride=1):
    """FFtBlock.forward: SpectralTransform + GroupNorm(1, out) + LeakyReLU(0.2)."""
    assert stride == 1, "only stride=1 (identity downsample) implemented"
    n, _, h, wd = x.shape
    l = h * wd

    # conv1: 1x1 conv + GN + LeakyReLU (Pallas, bf16 output)
    x1 = conv1x1_gn_lrelu(x, params["conv1_w"], params["conv1_g"], params["conv1_b"])
    c = x1.shape[1]
    x1_img = (x1.reshape(n, c, h, wd) if l == x1.shape[2]
              else x1[:, :, :l].reshape(n, c, h, wd))   # bf16 NCHW view for FFT/LFU

    # global Fourier unit
    fu_out = fourier_unit(x1_img, params["fu_w"], params["fu_g"], params["fu_b"])

    if enable_lfu:
        xa = x1_img[:, : c // 4]
        xs = jnp.concatenate(jnp.split(xa, 2, axis=2), axis=1)   # split H, stack in C
        xs = jnp.concatenate(jnp.split(xs, 2, axis=3), axis=1)   # split W, stack in C
        xs = fourier_unit(xs, params["lfu_w"], params["lfu_g"], params["lfu_b"])
        # TODO(synk): fold this 2x2 spatial repeat into the conv2 kernel via a
        # quadrant-broadcast index_map; for now it is materialized in bf16 so the
        # tile write + conv2 read cost half of the previous f32 version.
        xs = jnp.tile(xs.astype(jnp.bfloat16), (1, 1, 2, 2))
    else:
        xs = jnp.zeros((n, c, h, wd), jnp.bfloat16)

    # conv2 + residual sum + FFtBlock GroupNorm(1, out) + LeakyReLU, fully fused.
    return residual_conv2_gn_lrelu(x1, fu_out, xs, params["conv2_w"],
                                   params["bn_g"], params["bn_b"], h, wd)


# ----------------------------------------------------------------------------
# Pure-JAX f32 reference (for correctness check)
# ----------------------------------------------------------------------------
def _ref_gn_lrelu(z, g, b):
    mean = z.mean(axis=(1, 2, 3), keepdims=True)
    var = ((z - mean) ** 2).mean(axis=(1, 2, 3), keepdims=True)
    y = (z - mean) / jnp.sqrt(var + EPS)
    y = y * g[None, :, None, None] + b[None, :, None, None]
    return jnp.where(y >= 0, y, NEG_SLOPE * y)


def _ref_conv_gn_lrelu(x, w, g, b):
    return _ref_gn_lrelu(jnp.einsum("oc,nchw->nohw", w, x), g, b)


def _ref_fourier_unit(x, w, g, b):
    n, c, h, wd = x.shape
    f = jnp.fft.rfft2(x, norm="ortho")
    ff = jnp.stack((f.real, f.imag), axis=2).reshape(n, 2 * c, h, f.shape[-1])
    ff = _ref_conv_gn_lrelu(ff, w, g, b)
    ff = ff.reshape(n, c, 2, h, ff.shape[-1])
    comp = jax.lax.complex(ff[:, :, 0], ff[:, :, 1])
    return jnp.fft.irfft2(comp, s=(h, wd), norm="ortho")


def fft_block_ref(x, params, enable_lfu=True):
    x1 = _ref_conv_gn_lrelu(x, params["conv1_w"], params["conv1_g"], params["conv1_b"])
    out = _ref_fourier_unit(x1, params["fu_w"], params["fu_g"], params["fu_b"])
    if enable_lfu:
        n, c, h, wd = x1.shape
        xa = x1[:, : c // 4]
        xs = jnp.concatenate(jnp.split(xa, 2, axis=2), axis=1)
        xs = jnp.concatenate(jnp.split(xs, 2, axis=3), axis=1)
        xs = _ref_fourier_unit(xs, params["lfu_w"], params["lfu_g"], params["lfu_b"])
        xs = jnp.tile(xs, (1, 1, 2, 2))
    else:
        xs = 0.0
    y = jnp.einsum("oc,nchw->nohw", params["conv2_w"], x1 + out + xs)
    return _ref_gn_lrelu(y, params["bn_g"], params["bn_b"])


# ----------------------------------------------------------------------------
# Deterministic parameter init (shapes per FFtBlock / SpectralTransform, groups=1)
# ----------------------------------------------------------------------------
def init_params(key, in_channels, out_channels):
    c = out_channels // 2
    ks = jax.random.split(key, 12)

    def w_init(k, co, ci):
        return jax.random.normal(k, (co, ci), jnp.float32) / jnp.sqrt(float(ci))

    def g_init(k, nc):
        return 1.0 + 0.1 * jax.random.normal(k, (nc,), jnp.float32)

    def b_init(k, nc):
        return 0.1 * jax.random.normal(k, (nc,), jnp.float32)

    return dict(
        conv1_w=w_init(ks[0], c, in_channels),          # Conv2d(in, out//2, 1)
        conv1_g=g_init(ks[1], c), conv1_b=b_init(ks[2], c),
        fu_w=w_init(ks[3], 2 * c, 2 * c),               # FourierUnit conv (2c -> 2c)
        fu_g=g_init(ks[4], 2 * c), fu_b=b_init(ks[5], 2 * c),
        lfu_w=w_init(ks[6], 2 * c, 2 * c),              # local FourierUnit conv
        lfu_g=g_init(ks[7], 2 * c), lfu_b=b_init(ks[8], 2 * c),
        conv2_w=w_init(ks[9], out_channels, c),         # Conv2d(out//2, out, 1)
        bn_g=g_init(ks[10], out_channels),              # FFtBlock GroupNorm(1, out)
        bn_b=b_init(ks[11], out_channels),
    )


if __name__ == "__main__":
    key = jax.random.PRNGKey(0)
    kx, kp = jax.random.split(key)

    N, C_IN, H, W = 2, 4, 16, 16
    C_OUT = 8

    x = jax.random.normal(kx, (N, C_IN, H, W), jnp.float32)
    params = init_params(kp, C_IN, C_OUT)

    fwd = jax.jit(functools.partial(fft_block, enable_lfu=True))
    y = jax.block_until_ready(fwd(x, params))
    assert y.shape == (N, C_OUT, H, W), y.shape

    y_ref = fft_block_ref(x, params, enable_lfu=True)
    rel = float(jnp.linalg.norm(y - y_ref) / (jnp.linalg.norm(y_ref) + 1e-12))
    max_abs = float(jnp.max(jnp.abs(y - y_ref)))
    # bf16 matmul operands / bf16 intermediate + residual activations vs a pure-f32
    # reference: a real bug (wrong re/im de-interleave, wrong GN count with lane
    # padding) gives rel >= 0.3, so these tolerances still discriminate.
    assert rel < 5e-2, (rel, max_abs)
    assert jnp.allclose(y, y_ref, atol=1.5e-1, rtol=1e-1), (rel, max_abs)
    print("KERNEL_OK")
</pallas_src>

<mosaic_0001>
module attributes {stable_mosaic.version = 11 : i64} {
  func.func @_conv_gn_lrelu_kernel(%arg0: i32, %arg1: memref<1x4x256xbf16, #tpu.memory_space<vmem>>, %arg2: memref<4x4xbf16, #tpu.memory_space<vmem>>, %arg3: memref<4x1xf32, #tpu.memory_space<vmem>>, %arg4: memref<4x1xf32, #tpu.memory_space<vmem>>, %arg5: memref<1x4x256xbf16, #tpu.memory_space<vmem>>) attributes {dimension_semantics = [#tpu.dimension_semantics<parallel>], iteration_bounds = array<i64: 2>, scalar_prefetch = 0 : i64, scratch_operands = 0 : i64, tpu.core_type = #tpu.core_type<tc>, window_params = [{transform_indices = @transform_0, window_bounds = array<i64: 1, 4, 256>}, {pipeline_mode = #tpu.pipeline_mode<synchronous>, transform_indices = @transform_1, window_bounds = array<i64: 4, 4>}, {pipeline_mode = #tpu.pipeline_mode<synchronous>, transform_indices = @transform_2, window_bounds = array<i64: 4, 1>}, {pipeline_mode = #tpu.pipeline_mode<synchronous>, transform_indices = @transform_3, window_bounds = array<i64: 4, 1>}, {transform_indices = @transform_4, window_bounds = array<i64: 1, 4, 256>}]} {
    %c0 = arith.constant 0 : index
    %c0_0 = arith.constant 0 : index
    %0 = vector.load %arg2[%c0, %c0_0] : memref<4x4xbf16, #tpu.memory_space<vmem>>, vector<4x4xbf16>
    %c0_1 = arith.constant 0 : index
    %c0_2 = arith.constant 0 : index
    %c0_3 = arith.constant 0 : index
    %1 = vector.load %arg1[%c0_1, %c0_2, %c0_3] : memref<1x4x256xbf16, #tpu.memory_space<vmem>>, vector<1x4x256xbf16>
    %2 = vector.shape_cast %1 : vector<1x4x256xbf16> to vector<4x256xbf16>
    %cst = arith.constant dense<0.000000e+00> : vector<4x256xf32>
    %3 = tpu.matmul %0, %2, %cst {dimension_numbers = #tpu.dot_dimension_numbers<[1], [0], [0], [1], [0, 0, 1, 1], [], []>} : vector<4x4xbf16>, vector<4x256xbf16>, vector<4x256xf32> -> vector<4x256xf32>
    %c0_4 = arith.constant 0 : index
    %c0_5 = arith.constant 0 : index
    %4 = vector.load %arg3[%c0_4, %c0_5] : memref<4x1xf32, #tpu.memory_space<vmem>>, vector<4x1xf32>
    %c0_6 = arith.constant 0 : index
    %c0_7 = arith.constant 0 : index
    %5 = vector.load %arg4[%c0_6, %c0_7] : memref<4x1xf32, #tpu.memory_space<vmem>>, vector<4x1xf32>
    %6 = vector.shape_cast %3 : vector<4x256xf32> to vector<1x4x256xf32>
    %cst_8 = arith.constant dense<0.000000e+00> : vector<1xf32>
    %7 = vector.multi_reduction <add>, %6, %cst_8 [1, 2] : vector<1x4x256xf32> to vector<1xf32>
    %8 = vector.shape_cast %7 : vector<1xf32> to vector<1x1x1xf32>
    %9 = vector.extract %8[0, 0, 0] : f32 from vector<1x1x1xf32>
    %10 = arith.mulf %3, %3 : vector<4x256xf32>
    %11 = vector.shape_cast %10 : vector<4x256xf32> to vector<1x4x256xf32>
    %cst_9 = arith.constant dense<0.000000e+00> : vector<1xf32>
    %12 = vector.multi_reduction <add>, %11, %cst_9 [1, 2] : vector<1x4x256xf32> to vector<1xf32>
    %13 = vector.shape_cast %12 : vector<1xf32> to vector<1x1x1xf32>
    %14 = vector.extract %13[0, 0, 0] : f32 from vector<1x1x1xf32>
    %cst_10 = arith.constant 9.765625E-4 : f32
    %15 = arith.mulf %9, %cst_10 : f32
    %cst_11 = arith.constant 9.765625E-4 : f32
    %16 = arith.mulf %14, %cst_11 : f32
    %17 = arith.mulf %15, %15 : f32
    %18 = arith.subf %16, %17 : f32
    %cst_12 = arith.constant 0.000000e+00 : f32
    %19 = arith.maximumf %18, %cst_12 : f32
    %20 = vector.broadcast %15 : f32 to vector<4x256xf32>
    %21 = arith.subf %3, %20 : vector<4x256xf32>
    %cst_13 = arith.constant 9.99999974E-6 : f32
    %22 = arith.addf %19, %cst_13 : f32
    %23 = math.rsqrt %22 : f32
    %24 = vector.broadcast %23 : f32 to vector<4x256xf32>
    %25 = arith.mulf %21, %24 : vector<4x256xf32>
    %26 = vector.broadcast %4 : vector<4x1xf32> to vector<4x256xf32>
    %27 = arith.mulf %25, %26 : vector<4x256xf32>
    %28 = vector.broadcast %5 : vector<4x1xf32> to vector<4x256xf32>
    %29 = arith.addf %27, %28 : vector<4x256xf32>
    %cst_14 = arith.constant 0.000000e+00 : f32
    %30 = vector.broadcast %cst_14 : f32 to vector<4x256xf32>
    %31 = arith.cmpf oge, %29, %30 : vector<4x256xf32>
    %cst_15 = arith.constant 2.000000e-01 : f32
    %32 = vector.broadcast %cst_15 : f32 to vector<4x256xf32>
    %33 = arith.mulf %32, %29 : vector<4x256xf32>
    %34 = arith.select %31, %29, %33 : vector<4x256xi1>, vector<4x256xf32>
    %35 = arith.truncf %34 : vector<4x256xf32> to vector<4x256xbf16>
    %c0_16 = arith.constant 0 : index
    %c0_17 = arith.constant 0 : index
    %c0_18 = arith.constant 0 : index
    %36 = vector.load %arg5[%c0_16, %c0_17, %c0_18] : memref<1x4x256xbf16, #tpu.memory_space<vmem>>, vector<1x4x256xbf16>
    %37 = vector.shape_cast %36 : vector<1x4x256xbf16> to vector<4x256xbf16>
    %38 = vector.shape_cast %35 : vector<4x256xbf16> to vector<1x4x256xbf16>
    tpu.vector_store %arg5[%c0_16, %c0_17, %c0_18], %38 {strides = array<i32>} : memref<1x4x256xbf16, #tpu.memory_space<vmem>>, vector<1x4x256xbf16>,
    return
  }
  func.func @transform_0(%arg0: i32) -> (i32, i32, i32) {
    %c0_i32 = arith.constant 0 : i32
    %c0_i32_0 = arith.constant 0 : i32
    %c0_i32_1 = arith.constant 0 : i32
    return %arg0, %c0_i32, %c0_i32_0 : i32, i32, i32
  }
  func.func @transform_1(%arg0: i32) -> (i32, i32) {
    %c0_i32 = arith.constant 0 : i32
    %c0_i32_0 = arith.constant 0 : i32
    %c0_i32_1 = arith.constant 0 : i32
    return %c0_i32, %c0_i32_0 : i32, i32
  }
  func.func @transform_2(%arg0: i32) -> (i32, i32) {
    %c0_i32 = arith.constant 0 : i32
    %c0_i32_0 = arith.constant 0 : i32
    %c0_i32_1 = arith.constant 0 : i32
    return %c0_i32, %c0_i32_0 : i32, i32
  }
  func.func @transform_3(%arg0: i32) -> (i32, i32) {
    %c0_i32 = arith.constant 0 : i32
    %c0_i32_0 = arith.constant 0 : i32
    %c0_i32_1 = arith.constant 0 : i32
    return %c0_i32, %c0_i32_0 : i32, i32
  }
  func.func @transform_4(%arg0: i32) -> (i32, i32, i32) {
    %c0_i32 = arith.constant 0 : i32
    %c0_i32_0 = arith.constant 0 : i32
    %c0_i32_1 = arith.constant 0 : i32
    return %arg0, %c0_i32, %c0_i32_0 : i32, i32, i32
  }
}

module attributes {stable_mosaic.version = 11 : i64} {
  func.func @_fu_conv_gn_lrelu_kernel(%arg0: i32, %arg1: memref<1x8x128xbf16, #tpu.memory_space<vmem>>, %arg2: memref<8x8xbf16, #tpu.memory_space<vmem>>, %arg3: memref<8x1xf32, #tpu.memory_space<vmem>>, %arg4: memref<8x1xf32, #tpu.memory_space<vmem>>, %arg5: memref<1x8x128xbf16, #tpu.memory_space<vmem>>) attributes {dimension_semantics = [#tpu.dimension_semantics<parallel>], iteration_bounds = array<i64: 2>, scalar_prefetch = 0 : i64, scratch_operands = 0 : i64, tpu.core_type = #tpu.core_type<tc>, window_params = [{transform_indices = @transform_0, window_bounds = array<i64: 1, 8, 128>}, {pipeline_mode = #tpu.pipeline_mode<synchronous>, transform_indices = @transform_1, window_bounds = array<i64: 8, 8>}, {pipeline_mode = #tpu.pipeline_mode<synchronous>, transform_indices = @transform_2, window_bounds = array<i64: 8, 1>}, {pipeline_mode = #tpu.pipeline_mode<synchronous>, transform_indices = @transform_3, window_bounds = array<i64: 8, 1>}, {transform_indices = @transform_4, window_bounds = array<i64: 1, 8, 128>}]} {
    %c0 = arith.constant 0 : index
    %c0_0 = arith.constant 0 : index
    %0 = vector.load %arg2[%c0, %c0_0] : memref<8x8xbf16, #tpu.memory_space<vmem>>, vector<8x8xbf16>
    %c0_1 = arith.constant 0 : index
    %c0_2 = arith.constant 0 : index
    %c0_3 = arith.constant 0 : index
    %1 = vector.load %arg1[%c0_1, %c0_2, %c0_3] : memref<1x8x128xbf16, #tpu.memory_space<vmem>>, vector<1x8x128xbf16>
    %2 = vector.shape_cast %1 : vector<1x8x128xbf16> to vector<8x128xbf16>
    %cst = arith.constant dense<0.000000e+00> : vector<8x128xf32>
    %3 = tpu.matmul %0, %2, %cst {dimension_numbers = #tpu.dot_dimension_numbers<[1], [0], [0], [1], [0, 0, 1, 1], [], []>} : vector<8x8xbf16>, vector<8x128xbf16>, vector<8x128xf32> -> vector<8x128xf32>
    %c0_4 = arith.constant 0 : index
    %c0_5 = arith.constant 0 : index
    %4 = vector.load %arg3[%c0_4, %c0_5] : memref<8x1xf32, #tpu.memory_space<vmem>>, vector<8x1xf32>
    %c0_6 = arith.constant 0 : index
    %c0_7 = arith.constant 0 : index
    %5 = vector.load %arg4[%c0_6, %c0_7] : memref<8x1xf32, #tpu.memory_space<vmem>>, vector<8x1xf32>
    %6 = vector.shape_cast %3 : vector<8x128xf32> to vector<1x8x128xf32>
    %cst_8 = arith.constant dense<0.000000e+00> : vector<1xf32>
    %7 = vector.multi_reduction <add>, %6, %cst_8 [1, 2] : vector<1x8x128xf32> to vector<1xf32>
    %8 = vector.shape_cast %7 : vector<1xf32> to vector<1x1x1xf32>
    %9 = vector.extract %8[0, 0, 0] : f32 from vector<1x1x1xf32>
    %10 = arith.mulf %3, %3 : vector<8x128xf32>
    %11 = vector.shape_cast %10 : vector<8x128xf32> to vector<1x8x128xf32>
    %cst_9 = arith.constant dense<0.000000e+00> : vector<1xf32>
    %12 = vector.multi_reduction <add>, %11, %cst_9 [1, 2] : vector<1x8x128xf32> to vector<1xf32>
    %13 = vector.shape_cast %12 : vector<1xf32> to vector<1x1x1xf32>
    %14 = vector.extract %13[0, 0, 0] : f32 from vector<1x1x1xf32>
    %cst_10 = arith.constant 3.125000e-03 : f32
    %15 = arith.mulf %9, %cst_10 : f32
    %cst_11 = arith.constant 3.125000e-03 : f32
    %16 = arith.mulf %14, %cst_11 : f32
    %17 = arith.mulf %15, %15 : f32
    %18 = arith.subf %16, %17 : f32
    %cst_12 = arith.constant 0.000000e+00 : f32
    %19 = arith.maximumf %18, %cst_12 : f32
    %20 = vector.broadcast %15 : f32 to vector<8x128xf32>
    %21 = arith.subf %3, %20 : vector<8x128xf32>
    %cst_13 = arith.constant 9.99999974E-6 : f32
    %22 = arith.addf %19, %cst_13 : f32
    %23 = math.rsqrt %22 : f32
    %24 = vector.broadcast %23 : f32 to vector<8x128xf32>
    %25 = arith.mulf %21, %24 : vector<8x128xf32>
    %26 = vector.broadcast %4 : vector<8x1xf32> to vector<8x128xf32>
    %27 = arith.mulf %25, %26 : vector<8x128xf32>
    %28 = vector.broadcast %5 : vector<8x1xf32> to vector<8x128xf32>
    %29 = arith.addf %27, %28 : vector<8x128xf32>
    %cst_14 = arith.constant 0.000000e+00 : f32
    %30 = vector.broadcast %cst_14 : f32 to vector<8x128xf32>
    %31 = arith.cmpf oge, %29, %30 : vector<8x128xf32>
    %cst_15 = arith.constant 2.000000e-01 : f32
    %32 = vector.broadcast %cst_15 : f32 to vector<8x128xf32>
    %33 = arith.mulf %32, %29 : vector<8x128xf32>
    %34 = arith.select %31, %29, %33 : vector<8x128xi1>, vector<8x128xf32>
    %35 = arith.truncf %34 : vector<8x128xf32> to vector<8x128xbf16>
    %c0_16 = arith.constant 0 : index
    %c0_17 = arith.constant 0 : index
    %c0_18 = arith.constant 0 : index
    %36 = vector.load %arg5[%c0_16, %c0_17, %c0_18] : memref<1x8x128xbf16, #tpu.memory_space<vmem>>, vector<1x8x128xbf16>
    %37 = vector.shape_cast %36 : vector<1x8x128xbf16> to vector<8x128xbf16>
    %38 = vector.shape_cast %35 : vector<8x128xbf16> to vector<1x8x128xbf16>
    tpu.vector_store %arg5[%c0_16, %c0_17, %c0_18], %38 {strides = array<i32>} : memref<1x8x128xbf16, #tpu.memory_space<vmem>>, vector<1x8x128xbf16>,
    return
  }
  func.func @transform_0(%arg0: i32) -> (i32, i32, i32) {
    %c0_i32 = arith.constant 0 : i32
    %c0_i32_0 = arith.constant 0 : i32
    %c0_i32_1 = arith.constant 0 : i32
    return %arg0, %c0_i32, %c0_i32_0 : i32, i32, i32
  }
  func.func @transform_1(%arg0: i32) -> (i32, i32) {
    %c0_i32 = arith.constant 0 : i32
    %c0_i32_0 = arith.constant 0 : i32
    %c0_i32_1 = arith.constant 0 : i32
    return %c0_i32, %c0_i32_0 : i32, i32
  }
  func.func @transform_2(%arg0: i32) -> (i32, i32) {
    %c0_i32 = arith.constant 0 : i32
    %c0_i32_0 = arith.constant 0 : i32
    %c0_i32_1 = arith.constant 0 : i32
    return %c0_i32, %c0_i32_0 : i32, i32
  }
  func.func @transform_3(%arg0: i32) -> (i32, i32) {
    %c0_i32 = arith.constant 0 : i32
    %c0_i32_0 = arith.constant 0 : i32
    %c0_i32_1 = arith.constant 0 : i32
    return %c0_i32, %c0_i32_0 : i32, i32
  }
  func.func @transform_4(%arg0: i32) -> (i32, i32, i32) {
    %c0_i32 = arith.constant 0 : i32
    %c0_i32_0 = arith.constant 0 : i32
    %c0_i32_1 = arith.constant 0 : i32
    return %arg0, %c0_i32, %c0_i32_0 : i32, i32, i32
  }
}

module attributes {stable_mosaic.version = 11 : i64} {
  func.func @_fu_conv_gn_lrelu_kernel(%arg0: i32, %arg1: memref<1x8x256xbf16, #tpu.memory_space<vmem>>, %arg2: memref<8x8xbf16, #tpu.memory_space<vmem>>, %arg3: memref<8x1xf32, #tpu.memory_space<vmem>>, %arg4: memref<8x1xf32, #tpu.memory_space<vmem>>, %arg5: memref<1x8x256xbf16, #tpu.memory_space<vmem>>) attributes {dimension_semantics = [#tpu.dimension_semantics<parallel>], iteration_bounds = array<i64: 2>, scalar_prefetch = 0 : i64, scratch_operands = 0 : i64, tpu.core_type = #tpu.core_type<tc>, window_params = [{transform_indices = @transform_0, window_bounds = array<i64: 1, 8, 256>}, {pipeline_mode = #tpu.pipeline_mode<synchronous>, transform_indices = @transform_1, window_bounds = array<i64: 8, 8>}, {pipeline_mode = #tpu.pipeline_mode<synchronous>, transform_indices = @transform_2, window_bounds = array<i64: 8, 1>}, {pipeline_mode = #tpu.pipeline_mode<synchronous>, transform_indices = @transform_3, window_bounds = array<i64: 8, 1>}, {transform_indices = @transform_4, window_bounds = array<i64: 1, 8, 256>}]} {
    %c0 = arith.constant 0 : index
    %c0_0 = arith.constant 0 : index
    %0 = vector.load %arg2[%c0, %c0_0] : memref<8x8xbf16, #tpu.memory_space<vmem>>, vector<8x8xbf16>
    %c0_1 = arith.constant 0 : index
    %c0_2 = arith.constant 0 : index
    %c0_3 = arith.constant 0 : index
    %1 = vector.load %arg1[%c0_1, %c0_2, %c0_3] : memref<1x8x256xbf16, #tpu.memory_space<vmem>>, vector<1x8x256xbf16>
    %2 = vector.shape_cast %1 : vector<1x8x256xbf16> to vector<8x256xbf16>
    %cst = arith.constant dense<0.000000e+00> : vector<8x256xf32>
    %3 = tpu.matmul %0, %2, %cst {dimension_numbers = #tpu.dot_dimension_numbers<[1], [0], [0], [1], [0, 0, 1, 1], [], []>} : vector<8x8xbf16>, vector<8x256xbf16>, vector<8x256xf32> -> vector<8x256xf32>
    %c0_4 = arith.constant 0 : index
    %c0_5 = arith.constant 0 : index
    %4 = vector.load %arg3[%c0_4, %c0_5] : memref<8x1xf32, #tpu.memory_space<vmem>>, vector<8x1xf32>
    %c0_6 = arith.constant 0 : index
    %c0_7 = arith.constant 0 : index
    %5 = vector.load %arg4[%c0_6, %c0_7] : memref<8x1xf32, #tpu.memory_space<vmem>>, vector<8x1xf32>
    %6 = vector.shape_cast %3 : vector<8x256xf32> to vector<1x8x256xf32>
    %cst_8 = arith.constant dense<0.000000e+00> : vector<1xf32>
    %7 = vector.multi_reduction <add>, %6, %cst_8 [1, 2] : vector<1x8x256xf32> to vector<1xf32>
    %8 = vector.shape_cast %7 : vector<1xf32> to vector<1x1x1xf32>
    %9 = vector.extract %8[0, 0, 0] : f32 from vector<1x1x1xf32>
    %10 = arith.mulf %3, %3 : vector<8x256xf32>
    %11 = vector.shape_cast %10 : vector<8x256xf32> to vector<1x8x256xf32>
    %cst_9 = arith.constant dense<0.000000e+00> : vector<1xf32>
    %12 = vector.multi_reduction <add>, %11, %cst_9 [1, 2] : vector<1x8x256xf32> to vector<1xf32>
    %13 = vector.shape_cast %12 : vector<1xf32> to vector<1x1x1xf32>
    %14 = vector.extract %13[0, 0, 0] : f32 from vector<1x1x1xf32>
    %cst_10 = arith.constant 8.68055562E-4 : f32
    %15 = arith.mulf %9, %cst_10 : f32
    %cst_11 = arith.constant 8.68055562E-4 : f32
    %16 = arith.mulf %14, %cst_11 : f32
    %17 = arith.mulf %15, %15 : f32
    %18 = arith.subf %16, %17 : f32
    %cst_12 = arith.constant 0.000000e+00 : f32
    %19 = arith.maximumf %18, %cst_12 : f32
    %20 = vector.broadcast %15 : f32 to vector<8x256xf32>
    %21 = arith.subf %3, %20 : vector<8x256xf32>
    %cst_13 = arith.constant 9.99999974E-6 : f32
    %22 = arith.addf %19, %cst_13 : f32
    %23 = math.rsqrt %22 : f32
    %24 = vector.broadcast %23 : f32 to vector<8x256xf32>
    %25 = arith.mulf %21, %24 : vector<8x256xf32>
    %26 = vector.broadcast %4 : vector<8x1xf32> to vector<8x256xf32>
    %27 = arith.mulf %25, %26 : vector<8x256xf32>
    %28 = vector.broadcast %5 : vector<8x1xf32> to vector<8x256xf32>
    %29 = arith.addf %27, %28 : vector<8x256xf32>
    %cst_14 = arith.constant 0.000000e+00 : f32
    %30 = vector.broadcast %cst_14 : f32 to vector<8x256xf32>
    %31 = arith.cmpf oge, %29, %30 : vector<8x256xf32>
    %cst_15 = arith.constant 2.000000e-01 : f32
    %32 = vector.broadcast %cst_15 : f32 to vector<8x256xf32>
    %33 = arith.mulf %32, %29 : vector<8x256xf32>
    %34 = arith.select %31, %29, %33 : vector<8x256xi1>, vector<8x256xf32>
    %35 = arith.truncf %34 : vector<8x256xf32> to vector<8x256xbf16>
    %c0_16 = arith.constant 0 : index
    %c0_17 = arith.constant 0 : index
    %c0_18 = arith.constant 0 : index
    %36 = vector.load %arg5[%c0_16, %c0_17, %c0_18] : memref<1x8x256xbf16, #tpu.memory_space<vmem>>, vector<1x8x256xbf16>
    %37 = vector.shape_cast %36 : vector<1x8x256xbf16> to vector<8x256xbf16>
    %38 = vector.shape_cast %35 : vector<8x256xbf16> to vector<1x8x256xbf16>
    tpu.vector_store %arg5[%c0_16, %c0_17, %c0_18], %38 {strides = array<i32>} : memref<1x8x256xbf16, #tpu.memory_space<vmem>>, vector<1x8x256xbf16>,
    return
  }
  func.func @transform_0(%arg0: i32) -> (i32, i32, i32) {
    %c0_i32 = arith.constant 0 : i32
    %c0_i32_0 = arith.constant 0 : i32
    %c0_i32_1 = arith.constant 0 : i32
    return %arg0, %c0_i32, %c0_i32_0 : i32, i32, i32
  }
  func.func @transform_1(%arg0: i32) -> (i32, i32) {
    %c0_i32 = arith.constant 0 : i32
    %c0_i32_0 = arith.constant 0 : i32
    %c0_i32_1 = arith.constant 0 : i32
    return %c0_i32, %c0_i32_0 : i32, i32
  }
  func.func @transform_2(%arg0: i32) -> (i32, i32) {
    %c0_i32 = arith.constant 0 : i32
    %c0_i32_0 = arith.constant 0 : i32
    %c0_i32_1 = arith.constant 0 : i32
    return %c0_i32, %c0_i32_0 : i32, i32
  }
  func.func @transform_3(%arg0: i32) -> (i32, i32) {
    %c0_i32 = arith.constant 0 : i32
    %c0_i32_0 = arith.constant 0 : i32
    %c0_i32_1 = arith.constant 0 : i32
    return %c0_i32, %c0_i32_0 : i32, i32
  }
  func.func @transform_4(%arg0: i32) -> (i32, i32, i32) {
    %c0_i32 = arith.constant 0 : i32
    %c0_i32_0 = arith.constant 0 : i32
    %c0_i32_1 = arith.constant 0 : i32
    return %arg0, %c0_i32, %c0_i32_0 : i32, i32, i32
  }
}

module attributes {stable_mosaic.version = 11 : i64} {
  func.func @_sum_conv_gn_lrelu_kernel(%arg0: i32, %arg1: memref<1x4x256xbf16, #tpu.memory_space<vmem>>, %arg2: memref<1x4x256xbf16, #tpu.memory_space<vmem>>, %arg3: memref<1x4x256xbf16, #tpu.memory_space<vmem>>, %arg4: memref<8x4xbf16, #tpu.memory_space<vmem>>, %arg5: memref<8x1xf32, #tpu.memory_space<vmem>>, %arg6: memref<8x1xf32, #tpu.memory_space<vmem>>, %arg7: memref<1x8x256xf32, #tpu.memory_space<vmem>>) attributes {dimension_semantics = [#tpu.dimension_semantics<parallel>], iteration_bounds = array<i64: 2>, scalar_prefetch = 0 : i64, scratch_operands = 0 : i64, tpu.core_type = #tpu.core_type<tc>, window_params = [{transform_indices = @transform_0, window_bounds = array<i64: 1, 4, 256>}, {transform_indices = @transform_1, window_bounds = array<i64: 1, 4, 256>}, {transform_indices = @transform_2, window_bounds = array<i64: 1, 4, 256>}, {pipeline_mode = #tpu.pipeline_mode<synchronous>, transform_indices = @transform_3, window_bounds = array<i64: 8, 4>}, {pipeline_mode = #tpu.pipeline_mode<synchronous>, transform_indices = @transform_4, window_bounds = array<i64: 8, 1>}, {pipeline_mode = #tpu.pipeline_mode<synchronous>, transform_indices = @transform_5, window_bounds = array<i64: 8, 1>}, {transform_indices = @transform_6, window_bounds = array<i64: 1, 8, 256>}]} {
    %c0 = arith.constant 0 : index
    %c0_0 = arith.constant 0 : index
    %c0_1 = arith.constant 0 : index
    %0 = vector.load %arg1[%c0, %c0_0, %c0_1] : memref<1x4x256xbf16, #tpu.memory_space<vmem>>, vector<1x4x256xbf16>
    %1 = vector.shape_cast %0 : vector<1x4x256xbf16> to vector<4x256xbf16>
    %2 = arith.extf %1 : vector<4x256xbf16> to vector<4x256xf32>
    %c0_2 = arith.constant 0 : index
    %c0_3 = arith.constant 0 : index
    %c0_4 = arith.constant 0 : index
    %3 = vector.load %arg2[%c0_2, %c0_3, %c0_4] : memref<1x4x256xbf16, #tpu.memory_space<vmem>>, vector<1x4x256xbf16>
    %4 = vector.shape_cast %3 : vector<1x4x256xbf16> to vector<4x256xbf16>
    %5 = arith.extf %4 : vector<4x256xbf16> to vector<4x256xf32>
    %6 = arith.addf %2, %5 : vector<4x256xf32>
    %c0_5 = arith.constant 0 : index
    %c0_6 = arith.constant 0 : index
    %c0_7 = arith.constant 0 : index
    %7 = vector.load %arg3[%c0_5, %c0_6, %c0_7] : memref<1x4x256xbf16, #tpu.memory_space<vmem>>, vector<1x4x256xbf16>
    %8 = vector.shape_cast %7 : vector<1x4x256xbf16> to vector<4x256xbf16>
    %9 = arith.extf %8 : vector<4x256xbf16> to vector<4x256xf32>
    %10 = arith.addf %6, %9 : vector<4x256xf32>
    %c0_8 = arith.constant 0 : index
    %c0_9 = arith.constant 0 : index
    %11 = vector.load %arg4[%c0_8, %c0_9] : memref<8x4xbf16, #tpu.memory_space<vmem>>, vector<8x4xbf16>
    %12 = arith.truncf %10 : vector<4x256xf32> to vector<4x256xbf16>
    %cst = arith.constant dense<0.000000e+00> : vector<8x256xf32>
    %13 = tpu.matmul %11, %12, %cst {dimension_numbers = #tpu.dot_dimension_numbers<[1], [0], [0], [1], [0, 0, 1, 1], [], []>} : vector<8x4xbf16>, vector<4x256xbf16>, vector<8x256xf32> -> vector<8x256xf32>
    %c0_10 = arith.constant 0 : index
    %c0_11 = arith.constant 0 : index
    %14 = vector.load %arg5[%c0_10, %c0_11] : memref<8x1xf32, #tpu.memory_space<vmem>>, vector<8x1xf32>
    %c0_12 = arith.constant 0 : index
    %c0_13 = arith.constant 0 : index
    %15 = vector.load %arg6[%c0_12, %c0_13] : memref<8x1xf32, #tpu.memory_space<vmem>>, vector<8x1xf32>
    %16 = vector.shape_cast %13 : vector<8x256xf32> to vector<1x8x256xf32>
    %cst_14 = arith.constant dense<0.000000e+00> : vector<1xf32>
    %17 = vector.multi_reduction <add>, %16, %cst_14 [1, 2] : vector<1x8x256xf32> to vector<1xf32>
    %18 = vector.shape_cast %17 : vector<1xf32> to vector<1x1x1xf32>
    %19 = vector.extract %18[0, 0, 0] : f32 from vector<1x1x1xf32>
    %20 = arith.mulf %13, %13 : vector<8x256xf32>
    %21 = vector.shape_cast %20 : vector<8x256xf32> to vector<1x8x256xf32>
    %cst_15 = arith.constant dense<0.000000e+00> : vector<1xf32>
    %22 = vector.multi_reduction <add>, %21, %cst_15 [1, 2] : vector<1x8x256xf32> to vector<1xf32>
    %23 = vector.shape_cast %22 : vector<1xf32> to vector<1x1x1xf32>
    %24 = vector.extract %23[0, 0, 0] : f32 from vector<1x1x1xf32>
    %cst_16 = arith.constant 4.8828125E-4 : f32
    %25 = arith.mulf %19, %cst_16 : f32
    %cst_17 = arith.constant 4.8828125E-4 : f32
    %26 = arith.mulf %24, %cst_17 : f32
    %27 = arith.mulf %25, %25 : f32
    %28 = arith.subf %26, %27 : f32
    %cst_18 = arith.constant 0.000000e+00 : f32
    %29 = arith.maximumf %28, %cst_18 : f32
    %30 = vector.broadcast %25 : f32 to vector<8x256xf32>
    %31 = arith.subf %13, %30 : vector<8x256xf32>
    %cst_19 = arith.constant 9.99999974E-6 : f32
    %32 = arith.addf %29, %cst_19 : f32
    %33 = math.rsqrt %32 : f32
    %34 = vector.broadcast %33 : f32 to vector<8x256xf32>
    %35 = arith.mulf %31, %34 : vector<8x256xf32>
    %36 = vector.broadcast %14 : vector<8x1xf32> to vector<8x256xf32>
    %37 = arith.mulf %35, %36 : vector<8x256xf32>
    %38 = vector.broadcast %15 : vector<8x1xf32> to vector<8x256xf32>
    %39 = arith.addf %37, %38 : vector<8x256xf32>
    %cst_20 = arith.constant 0.000000e+00 : f32
    %40 = vector.broadcast %cst_20 : f32 to vector<8x256xf32>
    %41 = arith.cmpf oge, %39, %40 : vector<8x256xf32>
    %cst_21 = arith.constant 2.000000e-01 : f32
    %42 = vector.broadcast %cst_21 : f32 to vector<8x256xf32>
    %43 = arith.mulf %42, %39 : vector<8x256xf32>
    %44 = arith.select %41, %39, %43 : vector<8x256xi1>, vector<8x256xf32>
    %c0_22 = arith.constant 0 : index
    %c0_23 = arith.constant 0 : index
    %c0_24 = arith.constant 0 : index
    %45 = vector.load %arg7[%c0_22, %c0_23, %c0_24] : memref<1x8x256xf32, #tpu.memory_space<vmem>>, vector<1x8x256xf32>
    %46 = vector.shape_cast %45 : vector<1x8x256xf32> to vector<8x256xf32>
    %47 = vector.shape_cast %44 : vector<8x256xf32> to vector<1x8x256xf32>
    tpu.vector_store %arg7[%c0_22, %c0_23, %c0_24], %47 {strides = array<i32>} : memref<1x8x256xf32, #tpu.memory_space<vmem>>, vector<1x8x256xf32>,
    return
  }
  func.func @transform_0(%arg0: i32) -> (i32, i32, i32) {
    %c0_i32 = arith.constant 0 : i32
    %c0_i32_0 = arith.constant 0 : i32
    %c0_i32_1 = arith.constant 0 : i32
    return %arg0, %c0_i32, %c0_i32_0 : i32, i32, i32
  }
  func.func @transform_1(%arg0: i32) -> (i32, i32, i32) {
    %c0_i32 = arith.constant 0 : i32
    %c0_i32_0 = arith.constant 0 : i32
    %c0_i32_1 = arith.constant 0 : i32
    return %arg0, %c0_i32, %c0_i32_0 : i32, i32, i32
  }
  func.func @transform_2(%arg0: i32) -> (i32, i32, i32) {
    %c0_i32 = arith.constant 0 : i32
    %c0_i32_0 = arith.constant 0 : i32
    %c0_i32_1 = arith.constant 0 : i32
    return %arg0, %c0_i32, %c0_i32_0 : i32, i32, i32
  }
  func.func @transform_3(%arg0: i32) -> (i32, i32) {
    %c0_i32 = arith.constant 0 : i32
    %c0_i32_0 = arith.constant 0 : i32
    %c0_i32_1 = arith.constant 0 : i32
    return %c0_i32, %c0_i32_0 : i32, i32
  }
  func.func @transform_4(%arg0: i32) -> (i32, i32) {
    %c0_i32 = arith.constant 0 : i32
    %c0_i32_0 = arith.constant 0 : i32
    %c0_i32_1 = arith.constant 0 : i32
    return %c0_i32, %c0_i32_0 : i32, i32
  }
  func.func @transform_5(%arg0: i32) -> (i32, i32) {
    %c0_i32 = arith.constant 0 : i32
    %c0_i32_0 = arith.constant 0 : i32
    %c0_i32_1 = arith.constant 0 : i32
    return %c0_i32, %c0_i32_0 : i32, i32
  }
  func.func @transform_6(%arg0: i32) -> (i32, i32, i32) {
    %c0_i32 = arith.constant 0 : i32
    %c0_i32_0 = arith.constant 0 : i32
    %c0_i32_1 = arith.constant 0 : i32
    return %arg0, %c0_i32, %c0_i32_0 : i32, i32, i32
  }
}

</mosaic_0001>

<bundles_post_ra>
// kernel: fft_block.4
= control target key start
LH: loop header
LB: loop body
LE: loop exit
PB: predicated region body
PF: predicated region fallthrough
CT: control target
= control target key end

     0   :  { %9 = vsyncpa [#allocation3], 0  ;;  %s1101_s0 = inlined_call_operand.hbm [shape: bf16[2,4,256], index: 0, kind: input, shape index: {}]   ;;  %s1102_s1 = inlined_call_operand.hbm [shape: bf16[4,4], index: 1, kind: input, shape index: {}]   ;;  %s1103_s2 = inlined_call_operand.hbm [shape: f32[4,1], index: 2, kind: input, shape index: {}]   ;;  %s1104_s3 = inlined_call_operand.hbm [shape: f32[4,1], index: 3, kind: input, shape index: {}]   ;;  %s1105_s4 = inlined_call_operand.hbm [shape: bf16[2,4,256], index: 4, kind: output, shape index: {}]  }
   0x1   :  { %11 = vsyncpa [#allocation3 + $0x1], 0 }
   0x2   :  { %12 = vsyncpa [#allocation6], 0 }
   0x3   :  { %13 = vsyncpa [#allocation9], 0 }
   0x4   :  { %14 = vsyncpa [#allocation4], 0 }
   0x5   :  { %16 = vsyncpa [#allocation4 + $0x1], 0  ;;  %s846_s15 = smov 0   ;;  %s848_s16 = smov 0  }
   0x6   :  { %s850_s17 = smov 0   ;;  %s852_s18 = smov 0  }
   0x7 LB: > { %s867_s19 = sadd.s32 4294967295, %s812_s18   ;;  %s508_s20 = sadd.s32 4294967294, %s812_s18   ;;  %s812_s18 = sphi %s852_s18, %s1128_s18   ;;  %s808_s17 = sphi %s850_s17, %s1127_s17   ;;  %s804_s16 = sphi %s848_s16, %s1126_s16   ;;  %s800_s15 = sphi %s846_s15, %s1125_s15  }
   0x8   : > { %p42_p0 = scmp.ne.s32.totalorder %s804_s16, %s800_s15  ;;  %p1106_p1 = scmp.eq.s32.totalorder %s867_s19, 0 }
   0x9   : > { %p135_p3 = scmp.eq.s32.totalorder %s508_s20, 1  ;;  %p509_p5 = scmp.ge.s32.totalorder %s812_s18, 1 }
   0xa   : > { %p876_p4 = por %p1106_p1, %p42_p0  ;;  %p142_p7 = scmp.lt.s32.totalorder %s812_s18, 3 }
   0xb   : > { %p881_p6 = por %p135_p3, %p42_p0  ;;  %s814_s24 = smov [#allocation5]  }
   0xc   : > { %s1109_s21 = scalar_select %p876_p4, 1, 0 }
   0xd   : > { %s1110_s22 = scalar_select %p881_p6, 1, 0 }
   0xe   : > { %p886_p8 = pnand %p509_p5, %p142_p7  ;;  %s155_s25 = sshll.u32 %s814_s24, 4  ;;  %s156_s25 = int_to_ptr.vmem [resolvable:$true] %s155_s25 }
   0xf   : > { %s815_s26 = smov [#allocation7]   ;;  %s816_s29 = smov [#allocation8]  }
  0x10   : > { %s1111_s23 = scalar_select %p886_p8, 1, 0 }
  0x11   : > { %p557_p10 = pneg %p886_p8  ;;  %s166_s27 = sshll.u32 %s815_s26, 4  ;;  %s899_s27 = int_to_ptr.vmem [resolvable:$true] %s166_s27 }
  0x12   : > { %s177_s30 = sshll.u32 %s816_s29, 4  ;;  %s624_s7 = scalar_lea.hbm %s1102_s1, 32  ;;  %s901_s30 = int_to_ptr.vmem [resolvable:$true] %s177_s30 }
  0x13   : > { %p895_p11 = pnand %p557_p10, %p1106_p1  ;;  %p625_p12 = scmp.ne.s32.totalorder %s1102_s1, %s624_s7 }
  0x14   : > { %p631_p5 = scmp.lt.u32.totalorder %s624_s7, %s1102_s1 }
  0x15   : > { %p911_p13 = pneg %p895_p11 }
  0x17   : > { %p627_p0 = pnand %p911_p13, %p625_p12 }
  0x19   : > { %p628_p3 = pneg %p627_p0 }
  0x1b   : > { %p633_p7 = pnand %p631_p5, %p628_p3 }
  0x1d   : > { %636 = shalt.err (!%p633_p7)
}
  0x1e   : > { %s637_s13 = scalar_lea.vmem %s156_s25, 32  ;;  %p645_p2 = scmp.lt.s32.totalorder %s156_s25, %s156_s25 }
  0x1f   : > { %p638_p10 = scmp.ne.s32.totalorder %s156_s25, %s637_s13  ;;  %p646_p6 = scmp.lt.s32.totalorder %s637_s13, %s637_s13 }
  0x21   : > { %p640_p9 = pnand %p638_p10, %p911_p13  ;;  %p647_p4 = por %p646_p6, %p645_p2 }
  0x23   : > { %p641_p1 = pneg %p640_p9 }
  0x25   : > { %p648_p8 = pnand %p647_p4, %p641_p1 }
  0x27   : > { %651 = shalt.err (!%p648_p8)
}
  0x28   : > { %560 = dma.hbm_to_vmem [thread:$0]  (!%p895_p11), %s1102_s1, 32, %s156_s25, [#allocation6]  }
  0x29   : > { %s652_s29 = scalar_lea.hbm %s1103_s2, 64 }
  0x2a   : > { %p653_p9 = scmp.ne.s32.totalorder %s1103_s2, %s652_s29  ;;  %p659_p1 = scmp.lt.u32.totalorder %s652_s29, %s1103_s2 }
  0x2c   : > { %p655_p12 = pnand %p653_p9, %p911_p13 }
  0x2e   : > { %p656_p2 = pneg %p655_p12 }
  0x30   : > { %p661_p4 = pnand %p659_p1, %p656_p2 }
  0x32   : > { %664 = shalt.err (!%p661_p4)
}
  0x33   : > { %s665_s25 = scalar_lea.vmem %s899_s27, 64  ;;  %p673_p3 = scmp.lt.s32.totalorder %s899_s27, %s899_s27 }
  0x34   : > { %p666_p6 = scmp.ne.s32.totalorder %s899_s27, %s665_s25  ;;  %p674_p5 = scmp.lt.s32.totalorder %s665_s25, %s665_s25 }
  0x36   : > { %p668_p8 = pnand %p666_p6, %p911_p13  ;;  %p675_p7 = por %p674_p5, %p673_p3 }
  0x38   : > { %p669_p0 = pneg %p668_p8 }
  0x3a   : > { %p676_p10 = pnand %p675_p7, %p669_p0 }
  0x3c   : > { %679 = shalt.err (!%p676_p10)
}
  0x3d   : > { %563 = dma.hbm_to_vmem [thread:$0]  (!%p895_p11), %s1103_s2, 64, %s899_s27, [#allocation6]  }
  0x3e   : > { %s680_s14 = scalar_lea.hbm %s1104_s3, 64 }
  0x3f   : > { %p681_p9 = scmp.ne.s32.totalorder %s1104_s3, %s680_s14  ;;  %p687_p1 = scmp.lt.u32.totalorder %s680_s14, %s1104_s3 }
  0x41   : > { %p683_p12 = pnand %p681_p9, %p911_p13 }
  0x43   : > { %p684_p2 = pneg %p683_p12 }
  0x45   : > { %p689_p4 = pnand %p687_p1, %p684_p2 }
  0x47   : > { %692 = shalt.err (!%p689_p4)
}
  0x48   : > { %s693_s27 = scalar_lea.vmem %s901_s30, 64  ;;  %p701_p3 = scmp.lt.s32.totalorder %s901_s30, %s901_s30 }
  0x49   : > { %p694_p6 = scmp.ne.s32.totalorder %s901_s30, %s693_s27  ;;  %p702_p5 = scmp.lt.s32.totalorder %s693_s27, %s693_s27 }
  0x4b   : > { %p696_p8 = pnand %p694_p6, %p911_p13  ;;  %p703_p7 = por %p702_p5, %p701_p3 }
  0x4d   : > { %p697_p0 = pneg %p696_p8 }
  0x4f   : > { %p704_p10 = pnand %p703_p7, %p697_p0 }
  0x51   : > { %707 = shalt.err (!%p704_p10)
}
  0x52   : > { %566 = dma.hbm_to_vmem [thread:$0]  (!%p895_p11), %s1104_s3, 64, %s901_s30, [#allocation9]  }
  0x53   : > { %s974_s10 = sadd.s32 1, %s812_s18   ;;  %s29_s7 = sadd.s32 1, %s808_s17 }
  0x54   : > { %s26_s28 = ssub.s32 %s812_s18, %s974_s10  ;;  %p36_p9 = scmp.ne.s32.totalorder %s808_s17, %s804_s16 }
  0x55   : > { %p27_p13 = scmp.eq.s32.totalorder %s26_s28, 0  ;;  %p37_p12 = scmp.eq.s32.totalorder %s812_s18, 0 }
  0x56   : > { %p578_p2 = scmp.lt.s32.totalorder %s812_s18, 2  ;;  %p1114_p4 = scmp.eq.s32.totalorder %s867_s19, 1 }
  0x57   : > { %s984_s8 = scalar_select %p27_p13, %s808_s17, %s29_s7  }
  0x58   : > { %p38_p1 = por %p37_p12, %p36_p9  ;;  %p988_p6 = por %p1114_p4, %p36_p9 }
  0x59   : > { %s188_s9 = sand.u32 1, %s808_s17   ;;  %s533_s11 = sshll.u32 %s812_s18, 6 }
  0x5a   : > { %s514_s30 = sshll.u32 %s188_s9, 2  ;;  %s997_s14 = scalar_lea.hbm %s1101_s0, %s533_s11 }
  0x5b   : > { %s192_s20 = scalar_lea.vmem [#allocation2], %s514_s30  ;;  %p999_p11 = pnand %p578_p2, %p38_p1 }
  0x5c   : > { %s200_s24 = sshll.u32 %s192_s20, 4  ;;  %s189_s29 = scalar_lea.sflag [#allocation3], %s188_s9  ;;  %s1003_s24 = int_to_ptr.vmem [resolvable:$true] %s200_s24 }
  0x5d   : > { %s708_s27 = scalar_lea.hbm %s997_s14, 64  ;;  %p710_p0 = pneg %p999_p11 }
  0x5e   : > { %p709_p8 = scmp.ne.s32.totalorder %s997_s14, %s708_s27  ;;  %s713_s28 = scalar_lea.hbm %s1101_s0, 128 }
  0x5f   : > { %p714_p7 = scmp.lt.u32.totalorder %s997_s14, %s1101_s0  ;;  %p715_p10 = scmp.lt.u32.totalorder %s713_s28, %s708_s27 }
  0x60   : > { %p711_p3 = pnand %p710_p0, %p709_p8  ;;  %p717_p9 = scmp.lt.u32.totalorder %s708_s27, %s997_s14 }
  0x61   : > { %p716_p13 = por %p715_p10, %p714_p7 }
  0x62   : > { %p712_p5 = pneg %p711_p3 }
  0x63   : > { %p718_p12 = por %p717_p9, %p716_p13 }
  0x65   : > { %p719_p2 = pnand %p718_p12, %p712_p5 }
  0x67   : > { %722 = shalt.err (!%p719_p2)
}
  0x68   : > { %s723_s9 = scalar_lea.vmem %s1003_s24, 64  ;;  %s817_s30 = smov [#allocation2]  }
  0x69   : > { %p724_p1 = scmp.ne.s32.totalorder %s1003_s24, %s723_s9  ;;  %s728_s12 = sshll.u32 %s817_s30, 4  ;;  %s729_s12 = int_to_ptr.vmem [resolvable:$false] %s728_s12 }
  0x6a   : > { %s730_s13 = scalar_lea.vmem %s729_s12, 128  ;;  %p731_p3 = scmp.lt.s32.totalorder %s1003_s24, %s729_s12 }
  0x6b   : > { %p726_p4 = pnand %p724_p1, %p710_p0  ;;  %p732_p7 = scmp.lt.s32.totalorder %s730_s13, %s723_s9 }
  0x6d   : > { %p727_p8 = pneg %p726_p4  ;;  %p733_p10 = por %p732_p7, %p731_p3 }
  0x6f   : > { %p734_p13 = pnand %p733_p10, %p727_p8 }
  0x71   : > { %737 = shalt.err (!%p734_p13)
}
  0x72   : > { %570 = dma.hbm_to_vmem [thread:$0]  (!%p999_p11), %s997_s14, 64, %s1003_s24, %s189_s29  }
  0x73   : > { %p1117_p5 = scmp.ne.s32.totalorder %s1111_s23, 0 }
  0x74   : > { %s1033_s20 = sand.u32 (!%p1117_p5), 1, %s804_s16   ;;  %p1118_p0 = scmp.ne.s32.totalorder (!%p1117_p5), %s1109_s21, 0 }
  0x75   : > { %209 = sbr.rel (%p1117_p5) target bundleno = 659 (0x293), region = 36  ;;  %s518_s27 = sshll.u32 (!%p1117_p5), %s1033_s20, 2 }
  0x76   : > { %s212_s5 = scalar_lea.sflag (!%p1117_p5), [#allocation3], %s1033_s20  ;;  %s215_s6 = scalar_lea.vmem (!%p1117_p5), [#allocation2], %s518_s27 }
  0x7c   : > { %783 = dma.done.wait (%p1118_p0), %s212_s5, 64  }
  0x7d   : > { %785 = vsyncadd (%p1118_p0), %s212_s5, 4294967232  ;;  %p1119_p11 = scmp.eq.s32.totalorder %s867_s19, 0 }
  0x7f   : > { %787 = dma.done.wait (%p1119_p11), [#allocation6], 96   ;;  %p1120_p9 = pmov %p1119_p11 }
  0x81   : > { %789 = vsyncadd (%p1120_p9), [#allocation6], 4294967200  ;;  %p1121_p12 = pmov %p1120_p9 }
  0x82   : > { %p1122_p2 = pmov %p1120_p9 }
  0x83   : > { %791 = dma.done.wait (%p1121_p12), [#allocation9], 64  }
  0x84   : > { %793 = vsyncadd (%p1122_p2), [#allocation9], 4294967232  ;;  %v818_v0 = vmov 0   ;;  %vm268_vm0 = vcmask 1041408   ;;  %v253_v4 = vld [vmem:[#allocation5] sm:$0x3] }
  0x85   : > { %307 = vmatprep.mubr.bf16.mxu0 %v818_v0  ;;  %620 = vset.pattern.permute.xlu1 %v818_v0  ;;  %v523_v1 = vld.sshfl [vmem:[%s215_s6] sm:$0x33 pattern:$0x76325410]  ;;  %vm264_vm1 = vcmask 31744   ;;  %vm318_vm2 = vcmask 1043456  }
  0x86   : > { %621 = vset.pattern.permute.xlu0 %v818_v0  ;;  %v263_v2 = vcombine.high %v523_v1, %v523_v1  ;;  %v270_v3 = vsel %vm268_vm0, %v523_v1, 0  ;;  %v316_v17 = vld [vmem:[#allocation7] sm:$0xf]  ;;  %v317_v18 = vld [vmem:[#allocation8] sm:$0xf]  ;;  %s819_s28 = smov 0.0  }
  0x87   : > { %362 = vperm.xlu1 %620, %v316_v17   ;;  %s534_s30 = sshll.u32 %s867_s19, 6  ;;  %s251_s12 = scalar_lea.vmem [#allocation10], %s518_s27 }
  0x88   : > { %524 = vmatprep.subr.msk.bf16.mxu0 %vm268_vm0, %v263_v2  ;;  %s409_s13 = sshll.u32 %s251_s12, 4  ;;  %s395_s19 = scalar_lea.sflag [#allocation4], %s1033_s20  ;;  %s1059_s13 = int_to_ptr.vmem [resolvable:$true] %s409_s13 }
  0x89   : > { %276 = vmatpush1.bf16.msra.mxu0 %v270_v3  ;;  %s738_s27 = scalar_lea.vmem %s1059_s13, 64 }
  0x8a   : > { %p739_p1 = scmp.ne.s32.totalorder %s1059_s13, %s738_s27 }
  0x8b   : > { %369 = vperm.xlu1 %620, %v317_v18  }
  0x8c   : > { %525 = vmatmul.mubr.msk.bf16.vlgmr.msra.gmra.mrb[0].mxu0 %vm264_vm1, %v253_v4  ;;  %p740_p4 = pnand %p739_p1, %p988_p6 }
  0x8e   : > { %p741_p8 = pneg %p740_p4 }
 0x106   : > { %v363_v38 = vpop.permute.xlu1 %362 }
 0x10a   : > { %v370_v44 = vpop.permute.xlu1 %369 }
 0x15f   : > { %v309_v5 = vpop.f32.mrb[0].mxu0 }
 0x160   : > { %v331_v6 = vmul.f32 %v309_v5, %v309_v5  ;;  %v311_v7 = vpop.f32.mrb[1].mxu0  ;;  %v319_v8 = vsel %vm318_vm2, %v309_v5, 0.0 }
 0x161   : > { %v332_v9 = vmul.f32 %v311_v7, %v311_v7  ;;  %v313_v10 = vpop.f32.mrb[2].mxu0  ;;  %v320_v11 = vsel %vm318_vm2, %v311_v7, 0.0 }
 0x162   : > { %v314_v12 = vpop.f32.mrb[3].mxu0  ;;  %v321_v13 = vadd.f32 %v320_v11, %v319_v8  ;;  %v333_v14 = vsel %vm318_vm2, %v331_v6, 0.0 }
 0x163   : > { %v334_v15 = vsel %vm318_vm2, %v332_v9, 0.0 }
 0x164   : > { %322 = vadd.xlane.f32.xlu0 %v321_v13  ;;  %v335_v16 = vadd.f32 %v334_v15, %v333_v14 }
 0x168   : > { %336 = vadd.xlane.f32.xlu0 %v335_v16 }
 0x1f1   : > { %v323_v19 = vpop.xlane.xlu0 %322 }
 0x1f2   : > { %v324_v20 = vrot.slane %v323_v19, 4 }
 0x1f4   : > { %v325_v21 = vadd.f32 %v324_v20, %v323_v19 }
 0x1f5   : > { %v337_v22 = vpop.xlane.xlu0 %336 }
 0x1f6   : > { %v326_v23 = vrot.slane %v325_v21, 2  ;;  %v338_v24 = vrot.slane %v337_v22, 4 }
 0x1f8   : > { %v339_v25 = vadd.f32 %v338_v24, %v337_v22  ;;  %v327_v26 = vadd.f32 %v326_v23, %v325_v21 }
 0x1fa   : > { %v340_v27 = vrot.slane %v339_v25, 2  ;;  %v328_v28 = vrot.slane %v327_v26, 1 }
 0x1fc   : > { %v341_v29 = vadd.f32 %v340_v27, %v339_v25  ;;  %v329_v30 = vadd.f32 %v328_v28, %v327_v26 }
 0x1fe   : > { %535 = vpush %v329_v30  ;;  %v342_v31 = vrot.slane %v341_v29, 1 }
 0x200   : > { %v343_v32 = vadd.f32 %v342_v31, %v341_v29 }
 0x202   : > { %537 = vpush %v343_v32 }
 0x22f   : > { %s536_s21 = spop %535 }
 0x230   : > { %s345_s23 = smul.f32 0.0009765625, %s536_s21  ;;  %s1057_s21 = scalar_lea.hbm %s1105_s4, %s534_s30 }
 0x232   : > { %v350_v33 = vstv %s345_s23  ;;  %s347_s14 = smul.f32 %s345_s23, %s345_s23  ;;  %s820_s23 = smov [#allocation10]  }
 0x233   : > { %s538_s24 = spop %537  ;;  %v351_v34 = vsub.f32 %v309_v5, %v350_v33  ;;  %v352_v35 = vsub.f32 %v311_v7, %v350_v33 }
 0x234   : > { %s346_s26 = smul.f32 0.0009765625, %s538_s24 }
 0x236   : > { %s348_s29 = ssub.f32 %s346_s26, %s347_s14  ;;  %s742_s14 = sshll.u32 %s820_s23, 4  ;;  %s743_s14 = int_to_ptr.vmem [resolvable:$false] %s742_s14 }
 0x237   : > { %s744_s24 = scalar_lea.vmem %s743_s14, 128  ;;  %p745_p3 = scmp.lt.s32.totalorder %s1059_s13, %s743_s14 }
 0x238   : > { %s349_s7 = smax.f32 %s819_s28, %s348_s29  ;;  %p746_p7 = scmp.lt.s32.totalorder %s744_s24, %s738_s27 }
 0x239   : > { %s353_s11 = sadd.f32 1e-05, %s349_s7 }
 0x23a   : > { %p747_p10 = por %p746_p7, %p745_p3 }
 0x23b   : > { %v354_v36 = vstv %s353_s11 }
 0x23c   : > { %622 = vrsqrt.f32 %v354_v36  ;;  %p748_p13 = pnand %p747_p10, %p741_p8 }
 0x246   : > { %v623_v37 = vpop.eup %622 }
 0x247   : > { %539 = vpush %v623_v37 }
 0x278   : > { %s540_s9 = spop %539 }
 0x279   : > { %v357_v39 = vstv %s540_s9 }
 0x27a   : > { %v358_v40 = vmul.f32 %v357_v39, %v351_v34  ;;  %v359_v41 = vmul.f32 %v357_v39, %v352_v35 }
 0x27c   : > { %v365_v42 = vmul.f32 %v363_v38, %v358_v40  ;;  %v366_v43 = vmul.f32 %v363_v38, %v359_v41 }
 0x27e   : > { %v372_v45 = vadd.f32 %v370_v44, %v365_v42  ;;  %v373_v46 = vadd.f32 %v370_v44, %v366_v43 }
 0x280   : > { %vm374_vm3 = vcmp.ge.f32.partialorder %v372_v45, 0.0  ;;  %vm375_vm4 = vcmp.ge.f32.partialorder %v373_v46, 0.0  ;;  %v376_v47 = vmul.f32 0.2, %v372_v45  ;;  %v377_v48 = vmul.f32 0.2, %v373_v46 }
 0x282   : > { %v378_v49 = vsel %vm374_vm3, %v372_v45, %v376_v47  ;;  %v379_v50 = vsel %vm375_vm4, %v373_v46, %v377_v48 }
 0x283   : > { %v526_v51 = vpack.c.bf16 %v379_v50, %v378_v49 }
 0x285   : > { %527 = vst.sshfl [vmem:[%s251_s12] sm:$0x33 pattern:$0x76325410] %v526_v51 }
 0x286   : > { %751 = shalt.err (!%p748_p13)
}
 0x287   : > { %s752_s20 = scalar_lea.hbm %s1057_s21, 64  ;;  %s756_s28 = scalar_lea.hbm %s1105_s4, 128 }
 0x288   : > { %p753_p5 = scmp.ne.s32.totalorder %s1057_s21, %s752_s20  ;;  %p757_p9 = scmp.lt.u32.totalorder %s1057_s21, %s1105_s4 }
 0x289   : > { %p758_p12 = scmp.lt.u32.totalorder %s756_s28, %s752_s20  ;;  %p760_p1 = scmp.lt.u32.totalorder %s752_s20, %s1057_s21 }
 0x28a   : > { %p754_p0 = pnand %p753_p5, %p988_p6 }
 0x28b   : > { %p759_p2 = por %p758_p12, %p757_p9 }
 0x28c   : > { %p755_p11 = pneg %p754_p0 }
 0x28d   : > { %p761_p4 = por %p760_p1, %p759_p2 }
 0x28f   : > { %p762_p8 = pnand %p761_p4, %p755_p11 }
 0x291   : > { %765 = shalt.err (!%p762_p8)
}
 0x292   : > { %555 = dma.vmem_to_hbm [thread:$0]  (%p988_p6), %s1059_s13, 64, %s1057_s21, %s395_s19  }
 0x293 PF: > { %s421_s9 = sand.u32 1, %s800_s15   ;;  %p1123_p3 = scmp.ne.s32.totalorder %s1110_s22, 0 }
 0x294   : > { %p1124_p7 = scmp.ge.s32.totalorder %s812_s18, 2  ;;  %s422_s30 = scalar_lea.sflag [#allocation4], %s421_s9 }
 0x296   : > { %p572_p10 = pnand %p1124_p7, %p1123_p3 }
 0x298   : > { %795 = dma.done.wait (!%p572_p10), %s422_s30, 64  }
 0x299   : > { %797 = vsyncadd (!%p572_p10), %s422_s30, 4294967232  ;;  %p19_p13 = scmp.ge.s32.totalorder %s974_s10, 4   ;;  %s1125_s15 = smov %s804_s16 }
 0x29a   : > { %s1126_s16 = smov %s808_s17  ;;  %s1127_s17 = smov %s984_s8 }
 0x29b   : > { %s1128_s18 = smov %s974_s10  ;;  %21 = sbr.rel (!%p19_p13) target bundleno = 7 (0x7), region = 93 }
 0x2a2   :  { %427 = vsyncpa [#allocation3], 1 }
 0x2a3   :  { %429 = vsyncpa [#allocation3 + $0x1], 1 }
 0x2a4   :  { %430 = vsyncpa [#allocation6], 1 }
 0x2a5   :  { %431 = vsyncpa [#allocation9], 1 }
 0x2a6   :  { %432 = vsyncpa [#allocation4], 1 }
 0x2a7   :  { %434 = vsyncpa [#allocation4 + $0x1], 1 }

// kernel: reverse.1
= control target key start
LH: loop header
LB: loop body
LE: loop exit
PB: predicated region body
PF: predicated region fallthrough
CT: control target
= control target key end

     0   :  { %v79_v8 = vld [vmem:[#allocation1 + $0x38] sm:$0xf]  ;;  %v89_v9 = vld [vmem:[#allocation1 + $0x30] sm:$0xf]  ;;  %v99_v10 = vld [vmem:[#allocation1 + $0x28] sm:$0xf]  ;;  %v156_v12 = vlaneseq  ;;  %s487_s0 = inlined_call_operand.vmem [shape: f32[2,4,8,3], index: 0, kind: input, shape index: {}]   ;;  %s488_s1 = inlined_call_operand.vmem [shape: f32[2,4,8,3], index: 1, kind: output, shape index: {}]  }
   0x1   :  { %v18_v0 = vld [vmem:[%s487_s0] sm:$0xf]  ;;  %v20_v1 = vld [vmem:[%s487_s0 + $0x4] sm:$0xf]  ;;  %v22_v2 = vld [vmem:[%s487_s0 + $0x8] sm:$0xf] }
   0x2   :  { %19 = vst [vmem:[#allocation1 + $0x4] sm:$0xf] %v18_v0  ;;  %21 = vst [vmem:[#allocation1 + $0xc] sm:$0xf] %v20_v1  ;;  %v24_v3 = vld [vmem:[%s487_s0 + $0xc] sm:$0xf] }
   0x3   :  { %23 = vst [vmem:[#allocation1 + $0x14] sm:$0xf] %v22_v2  ;;  %v26_v4 = vld [vmem:[%s487_s0 + $0x10] sm:$0xf]  ;;  %v28_v5 = vld [vmem:[%s487_s0 + $0x14] sm:$0xf] }
   0x4   :  { %25 = vst [vmem:[#allocation1 + $0x1c] sm:$0xf] %v24_v3  ;;  %27 = vst [vmem:[#allocation1 + $0x24] sm:$0xf] %v26_v4  ;;  %v30_v6 = vld [vmem:[%s487_s0 + $0x18] sm:$0xf] }
   0x5   :  { %29 = vst [vmem:[#allocation1 + $0x2c] sm:$0xf] %v28_v5  ;;  %v32_v7 = vld [vmem:[%s487_s0 + $0x1c] sm:$0xf]  ;;  %31 = vst [vmem:[#allocation1 + $0x34] sm:$0xf] %v30_v6 }
   0x6   :  { %33 = vst [vmem:[#allocation1 + $0x3c] sm:$0xf] %v32_v7  ;;  %81 = vst [vmem:[#allocation0 + $0x70] sm:$0xf] %v79_v8  ;;  %v109_v11 = vld [vmem:[#allocation1 + $0x20] sm:$0xf] }
   0x7   :  { %91 = vst [vmem:[#allocation0 + $0x60] sm:$0xf] %v89_v9  ;;  %101 = vst [vmem:[#allocation0 + $0x50] sm:$0xf] %v99_v10  ;;  %v119_v13 = vld [vmem:[#allocation1 + $0x18] sm:$0xf] }
   0x8   :  { %111 = vst [vmem:[#allocation0 + $0x40] sm:$0xf] %v109_v11  ;;  %v129_v14 = vld [vmem:[#allocation1 + $0x10] sm:$0xf]  ;;  %v139_v15 = vld [vmem:[#allocation1 + $0x8] sm:$0xf] }
   0x9   :  { %121 = vst [vmem:[#allocation0 + $0x30] sm:$0xf] %v119_v13  ;;  %131 = vst [vmem:[#allocation0 + $0x20] sm:$0xf] %v129_v14  ;;  %v146_v16 = vld [vmem:[#allocation1] sm:$0xf] }
   0xa   :  { %141 = vst [vmem:[#allocation0 + $0x10] sm:$0xf] %v139_v15  ;;  %147 = vst [vmem:[#allocation0] sm:$0xf] %v146_v16  ;;  %v456_v17 = vshrl.u32 %v156_v12, 7 }
   0xb   :  { %v124_v18 = vld [vmem:[#allocation1 + $0x14] sm:$0xf]  ;;  %v134_v19 = vld [vmem:[#allocation1 + $0xc] sm:$0xf]  ;;  %v143_v20 = vld [vmem:[#allocation1 + $0x4] sm:$0xf] }
   0xc   :  { %v94_v21 = vld [vmem:[#allocation1 + $0x2c] sm:$0xf]  ;;  %v104_v22 = vld [vmem:[#allocation1 + $0x24] sm:$0xf]  ;;  %v114_v23 = vld [vmem:[#allocation1 + $0x1c] sm:$0xf] }
   0xd   :  { %126 = vst [vmem:[#allocation0 + $0x28] sm:$0xf] %v124_v18  ;;  %136 = vst [vmem:[#allocation0 + $0x18] sm:$0xf] %v134_v19  ;;  %v74_v24 = vld [vmem:[#allocation1 + $0x3c] sm:$0xf] }
   0xe   :  { %145 = vst [vmem:[#allocation0 + $0x8] sm:$0xf] %v143_v20  ;;  %v84_v25 = vld [vmem:[#allocation1 + $0x34] sm:$0xf]  ;;  %96 = vst [vmem:[#allocation0 + $0x58] sm:$0xf] %v94_v21 }
   0xf   :  { %106 = vst [vmem:[#allocation0 + $0x48] sm:$0xf] %v104_v22  ;;  %116 = vst [vmem:[#allocation0 + $0x38] sm:$0xf] %v114_v23  ;;  %v247_v26 = vld [vmem:[#allocation0 + $0x77] ss:$-1 sm:$0xff] }
  0x10   :  { %76 = vst [vmem:[#allocation0 + $0x78] sm:$0xf] %v74_v24  ;;  %86 = vst [vmem:[#allocation0 + $0x68] sm:$0xf] %v84_v25  ;;  %v205_v27 = vld [vmem:[#allocation0 + $0x47] ss:$-1 sm:$0xff] }
  0x11   :  { %v219_v28 = vld [vmem:[#allocation0 + $0x57] ss:$-1 sm:$0xff]  ;;  %v233_v29 = vld [vmem:[#allocation0 + $0x67] ss:$-1 sm:$0xff]  ;;  %v206_v37 = vrot.slane %v205_v27, 5  ;;  %v248_v41 = vrot.slane %v247_v26, 5 }
  0x12   :  { %v163_v30 = vld [vmem:[#allocation0 + $0x17] ss:$-1 sm:$0xff]  ;;  %v177_v31 = vld [vmem:[#allocation0 + $0x27] ss:$-1 sm:$0xff]  ;;  %v220_v39 = vrot.slane %v219_v28, 5  ;;  %v234_v40 = vrot.slane %v233_v29, 5 }
  0x13   :  { %v191_v32 = vld [vmem:[#allocation0 + $0x37] ss:$-1 sm:$0xff]  ;;  %v149_v33 = vld [vmem:[#allocation0 + $0x7] ss:$-1 sm:$0xff]  ;;  %v164_v34 = vrot.slane %v163_v30, 5  ;;  %v178_v35 = vrot.slane %v177_v31, 5 }
  0x14   :  { %v192_v36 = vrot.slane %v191_v32, 5  ;;  %v150_v38 = vrot.slane %v149_v33, 5  ;;  %vm158_vm0 = vcmp.lt.s32.totalorder %v456_v17, 3  ;;  %207 = vst [vmem:[#allocation2 + $0x20] sm:$0xff] %v206_v37  ;;  %v168_v43 = vld [vmem:[#allocation0 + $0x1f] ss:$-1 sm:$0xff] }
  0x15   :  { %165 = vst [vmem:[#allocation2 + $0x8] sm:$0xff] %v164_v34  ;;  %179 = vst [vmem:[#allocation2 + $0x10] sm:$0xff] %v178_v35  ;;  %v154_v42 = vld [vmem:[#allocation0 + $0xf] ss:$-1 sm:$0xff]  ;;  %v169_v46 = vrot.slane %v168_v43, 5 }
  0x16   :  { %193 = vst [vmem:[#allocation2 + $0x18] sm:$0xff] %v192_v36  ;;  %151 = vst [vmem:[#allocation2] sm:$0xff] %v150_v38  ;;  %v182_v44 = vld [vmem:[#allocation0 + $0x2f] ss:$-1 sm:$0xff]  ;;  %v155_v45 = vrot.slane %v154_v42, 5 }
  0x17   :  { %221 = vst [vmem:[#allocation2 + $0x28] sm:$0xff] %v220_v39  ;;  %235 = vst [vmem:[#allocation2 + $0x30] sm:$0xff] %v234_v40  ;;  %v183_v47 = vrot.slane %v182_v44, 5  ;;  %v196_v48 = vld [vmem:[#allocation0 + $0x3f] ss:$-1 sm:$0xff] }
  0x18   :  { %249 = vst [vmem:[#allocation2 + $0x38] sm:$0xff] %v248_v41  ;;  %v197_v49 = vrot.slane %v196_v48, 5  ;;  %v210_v50 = vld [vmem:[#allocation0 + $0x4f] ss:$-1 sm:$0xff]  ;;  %v224_v51 = vld [vmem:[#allocation0 + $0x5f] ss:$-1 sm:$0xff] }
  0x19   :  { %159 = vst.msk [vmem:[#allocation2] sm:$0xff] %vm158_vm0, %v155_v45  ;;  %173 = vst.msk [vmem:[#allocation2 + $0x8] sm:$0xff] %vm158_vm0, %v169_v46  ;;  %v211_v52 = vrot.slane %v210_v50, 5  ;;  %v225_v53 = vrot.slane %v224_v51, 5  ;;  %v238_v54 = vld [vmem:[#allocation0 + $0x6f] ss:$-1 sm:$0xff] }
  0x1a   :  { %187 = vst.msk [vmem:[#allocation2 + $0x10] sm:$0xff] %vm158_vm0, %v183_v47  ;;  %v252_v55 = vld [vmem:[#allocation0 + $0x7f] ss:$-1 sm:$0xff]  ;;  %201 = vst.msk [vmem:[#allocation2 + $0x18] sm:$0xff] %vm158_vm0, %v197_v49  ;;  %v239_v56 = vrot.slane %v238_v54, 5 }
  0x1b   :  { %v253_v57 = vrot.slane %v252_v55, 5  ;;  %215 = vst.msk [vmem:[#allocation2 + $0x20] sm:$0xff] %vm158_vm0, %v211_v52  ;;  %229 = vst.msk [vmem:[#allocation2 + $0x28] sm:$0xff] %vm158_vm0, %v225_v53 }
  0x1c   :  { %243 = vst.msk [vmem:[#allocation2 + $0x30] sm:$0xff] %vm158_vm0, %v239_v56 }
  0x1d   :  { %257 = vst.msk [vmem:[#allocation2 + $0x38] sm:$0xff] %vm158_vm0, %v253_v57 }
  0x20   :  { %v261_v58 = vld [vmem:[#allocation2] sm:$0xf]  ;;  %v265_v59 = vld [vmem:[#allocation2 + $0x8] sm:$0xf] }
  0x21   :  { %v270_v60 = vld [vmem:[#allocation2 + $0x10] sm:$0xf]  ;;  %263 = vst [vmem:[#allocation3] sm:$0xf] %v261_v58  ;;  %268 = vst [vmem:[#allocation3 + $0x4] sm:$0xf] %v265_v59 }
  0x22   :  { %274 = vst [vmem:[#allocation3 + $0x8] sm:$0xf] %v270_v60  ;;  %v276_v61 = vld [vmem:[#allocation2 + $0x18] sm:$0xf]  ;;  %v282_v62 = vld [vmem:[#allocation2 + $0x20] sm:$0xf] }
  0x23   :  { %280 = vst [vmem:[#allocation3 + $0xc] sm:$0xf] %v276_v61  ;;  %v288_v63 = vld [vmem:[#allocation2 + $0x28] sm:$0xf]  ;;  %286 = vst [vmem:[#allocation3 + $0x10] sm:$0xf] %v282_v62 }
  0x24   :  { %292 = vst [vmem:[#allocation3 + $0x14] sm:$0xf] %v288_v63  ;;  %v294_v0 = vld [vmem:[#allocation2 + $0x30] sm:$0xf]  ;;  %v300_v1 = vld [vmem:[#allocation2 + $0x38] sm:$0xf] }
  0x25   :  { %298 = vst [vmem:[#allocation3 + $0x18] sm:$0xf] %v294_v0  ;;  %304 = vst [vmem:[#allocation3 + $0x1c] sm:$0xf] %v300_v1 }
  0x28   :  { %v320_v2 = vld [vmem:[#allocation3] sm:$0xff]  }
  0x29   :  { %321 = vst [vmem:[%s488_s1] sm:$0xff] %v320_v2  }
  0x2a   :  { %v324_v3 = vld [vmem:[#allocation3 + $0x8] sm:$0xff]  }
  0x2b   :  { %325 = vst [vmem:[%s488_s1 + $0x8] sm:$0xff] %v324_v3   ;;  %v328_v4 = vld [vmem:[#allocation3 + $0x10] sm:$0xff]  }
  0x2c   :  { %329 = vst [vmem:[%s488_s1 + $0x10] sm:$0xff] %v328_v4   ;;  %v332_v5 = vld [vmem:[#allocation3 + $0x18] sm:$0xff]  }
  0x2d   :  { %333 = vst [vmem:[%s488_s1 + $0x18] sm:$0xff] %v332_v5  }

// kernel: fft_block.6
= control target key start
LH: loop header
LB: loop body
LE: loop exit
PB: predicated region body
PF: predicated region fallthrough
CT: control target
= control target key end

     0   :  { %9 = vsyncpa [#allocation3], 0  ;;  %s1063_s0 = inlined_call_operand.hbm [shape: bf16[2,8,128], index: 0, kind: input, shape index: {}]   ;;  %s1064_s1 = inlined_call_operand.hbm [shape: bf16[8,8], index: 1, kind: input, shape index: {}]   ;;  %s1065_s2 = inlined_call_operand.hbm [shape: f32[8,1], index: 2, kind: input, shape index: {}]   ;;  %s1066_s3 = inlined_call_operand.hbm [shape: f32[8,1], index: 3, kind: input, shape index: {}]   ;;  %s1067_s4 = inlined_call_operand.hbm [shape: bf16[2,8,128], index: 4, kind: output, shape index: {}]  }
   0x1   :  { %11 = vsyncpa [#allocation3 + $0x1], 0 }
   0x2   :  { %12 = vsyncpa [#allocation6], 0 }
   0x3   :  { %13 = vsyncpa [#allocation9], 0 }
   0x4   :  { %14 = vsyncpa [#allocation4], 0 }
   0x5   :  { %16 = vsyncpa [#allocation4 + $0x1], 0  ;;  %s808_s15 = smov 0   ;;  %s810_s16 = smov 0  }
   0x6   :  { %s812_s17 = smov 0   ;;  %s814_s18 = smov 0  }
   0x7 LB: > { %s829_s19 = sadd.s32 4294967295, %s772_s18   ;;  %s466_s20 = sadd.s32 4294967294, %s772_s18   ;;  %s772_s18 = sphi %s814_s18, %s1090_s18   ;;  %s768_s17 = sphi %s812_s17, %s1089_s17   ;;  %s764_s16 = sphi %s810_s16, %s1088_s16   ;;  %s760_s15 = sphi %s808_s15, %s1087_s15  }
   0x8   : > { %p42_p0 = scmp.ne.s32.totalorder %s764_s16, %s760_s15  ;;  %p1068_p1 = scmp.eq.s32.totalorder %s829_s19, 0 }
   0x9   : > { %p135_p3 = scmp.eq.s32.totalorder %s466_s20, 1  ;;  %p467_p5 = scmp.ge.s32.totalorder %s772_s18, 1 }
   0xa   : > { %p838_p4 = por %p1068_p1, %p42_p0  ;;  %p142_p7 = scmp.lt.s32.totalorder %s772_s18, 3 }
   0xb   : > { %p843_p6 = por %p135_p3, %p42_p0  ;;  %s774_s24 = smov [#allocation5]  }
   0xc   : > { %s1071_s21 = scalar_select %p838_p4, 1, 0 }
   0xd   : > { %s1072_s22 = scalar_select %p843_p6, 1, 0 }
   0xe   : > { %p848_p8 = pnand %p467_p5, %p142_p7  ;;  %s155_s25 = sshll.u32 %s774_s24, 4  ;;  %s156_s25 = int_to_ptr.vmem [resolvable:$true] %s155_s25 }
   0xf   : > { %s775_s26 = smov [#allocation7]   ;;  %s776_s29 = smov [#allocation8]  }
  0x10   : > { %s1073_s23 = scalar_select %p848_p8, 1, 0 }
  0x11   : > { %p515_p10 = pneg %p848_p8  ;;  %s166_s27 = sshll.u32 %s775_s26, 4  ;;  %s861_s27 = int_to_ptr.vmem [resolvable:$true] %s166_s27 }
  0x12   : > { %s177_s30 = sshll.u32 %s776_s29, 4  ;;  %s584_s7 = scalar_lea.hbm %s1064_s1, 64  ;;  %s863_s30 = int_to_ptr.vmem [resolvable:$true] %s177_s30 }
  0x13   : > { %p857_p11 = pnand %p515_p10, %p1068_p1  ;;  %p585_p12 = scmp.ne.s32.totalorder %s1064_s1, %s584_s7 }
  0x14   : > { %p591_p5 = scmp.lt.u32.totalorder %s584_s7, %s1064_s1 }
  0x15   : > { %p873_p13 = pneg %p857_p11 }
  0x17   : > { %p587_p0 = pnand %p873_p13, %p585_p12 }
  0x19   : > { %p588_p3 = pneg %p587_p0 }
  0x1b   : > { %p593_p7 = pnand %p591_p5, %p588_p3 }
  0x1d   : > { %596 = shalt.err (!%p593_p7)
}
  0x1e   : > { %s597_s13 = scalar_lea.vmem %s156_s25, 64  ;;  %p605_p2 = scmp.lt.s32.totalorder %s156_s25, %s156_s25 }
  0x1f   : > { %p598_p10 = scmp.ne.s32.totalorder %s156_s25, %s597_s13  ;;  %p606_p6 = scmp.lt.s32.totalorder %s597_s13, %s597_s13 }
  0x21   : > { %p600_p9 = pnand %p598_p10, %p873_p13  ;;  %p607_p4 = por %p606_p6, %p605_p2 }
  0x23   : > { %p601_p1 = pneg %p600_p9 }
  0x25   : > { %p608_p8 = pnand %p607_p4, %p601_p1 }
  0x27   : > { %611 = shalt.err (!%p608_p8)
}
  0x28   : > { %518 = dma.hbm_to_vmem [thread:$0]  (!%p857_p11), %s1064_s1, 64, %s156_s25, [#allocation6]  }
  0x29   : > { %s612_s29 = scalar_lea.hbm %s1065_s2, 128 }
  0x2a   : > { %p613_p9 = scmp.ne.s32.totalorder %s1065_s2, %s612_s29  ;;  %p619_p1 = scmp.lt.u32.totalorder %s612_s29, %s1065_s2 }
  0x2c   : > { %p615_p12 = pnand %p613_p9, %p873_p13 }
  0x2e   : > { %p616_p2 = pneg %p615_p12 }
  0x30   : > { %p621_p4 = pnand %p619_p1, %p616_p2 }
  0x32   : > { %624 = shalt.err (!%p621_p4)
}
  0x33   : > { %s625_s25 = scalar_lea.vmem %s861_s27, 128  ;;  %p633_p3 = scmp.lt.s32.totalorder %s861_s27, %s861_s27 }
  0x34   : > { %p626_p6 = scmp.ne.s32.totalorder %s861_s27, %s625_s25  ;;  %p634_p5 = scmp.lt.s32.totalorder %s625_s25, %s625_s25 }
  0x36   : > { %p628_p8 = pnand %p626_p6, %p873_p13  ;;  %p635_p7 = por %p634_p5, %p633_p3 }
  0x38   : > { %p629_p0 = pneg %p628_p8 }
  0x3a   : > { %p636_p10 = pnand %p635_p7, %p629_p0 }
  0x3c   : > { %639 = shalt.err (!%p636_p10)
}
  0x3d   : > { %521 = dma.hbm_to_vmem [thread:$0]  (!%p857_p11), %s1065_s2, 128, %s861_s27, [#allocation6]  }
  0x3e   : > { %s640_s14 = scalar_lea.hbm %s1066_s3, 128 }
  0x3f   : > { %p641_p9 = scmp.ne.s32.totalorder %s1066_s3, %s640_s14  ;;  %p647_p1 = scmp.lt.u32.totalorder %s640_s14, %s1066_s3 }
  0x41   : > { %p643_p12 = pnand %p641_p9, %p873_p13 }
  0x43   : > { %p644_p2 = pneg %p643_p12 }
  0x45   : > { %p649_p4 = pnand %p647_p1, %p644_p2 }
  0x47   : > { %652 = shalt.err (!%p649_p4)
}
  0x48   : > { %s653_s27 = scalar_lea.vmem %s863_s30, 128  ;;  %p661_p3 = scmp.lt.s32.totalorder %s863_s30, %s863_s30 }
  0x49   : > { %p654_p6 = scmp.ne.s32.totalorder %s863_s30, %s653_s27  ;;  %p662_p5 = scmp.lt.s32.totalorder %s653_s27, %s653_s27 }
  0x4b   : > { %p656_p8 = pnand %p654_p6, %p873_p13  ;;  %p663_p7 = por %p662_p5, %p661_p3 }
  0x4d   : > { %p657_p0 = pneg %p656_p8 }
  0x4f   : > { %p664_p10 = pnand %p663_p7, %p657_p0 }
  0x51   : > { %667 = shalt.err (!%p664_p10)
}
  0x52   : > { %524 = dma.hbm_to_vmem [thread:$0]  (!%p857_p11), %s1066_s3, 128, %s863_s30, [#allocation9]  }
  0x53   : > { %s936_s10 = sadd.s32 1, %s772_s18   ;;  %s29_s7 = sadd.s32 1, %s768_s17 }
  0x54   : > { %s26_s28 = ssub.s32 %s772_s18, %s936_s10  ;;  %p36_p9 = scmp.ne.s32.totalorder %s768_s17, %s764_s16 }
  0x55   : > { %p27_p13 = scmp.eq.s32.totalorder %s26_s28, 0  ;;  %p37_p12 = scmp.eq.s32.totalorder %s772_s18, 0 }
  0x56   : > { %p536_p2 = scmp.lt.s32.totalorder %s772_s18, 2  ;;  %p1076_p4 = scmp.eq.s32.totalorder %s829_s19, 1 }
  0x57   : > { %s946_s8 = scalar_select %p27_p13, %s768_s17, %s29_s7  }
  0x58   : > { %p38_p1 = por %p37_p12, %p36_p9  ;;  %p950_p6 = por %p1076_p4, %p36_p9 }
  0x59   : > { %s188_s9 = sand.u32 1, %s768_s17   ;;  %s473_s11 = sshll.u32 %s772_s18, 6 }
  0x5a   : > { %s472_s30 = sshll.u32 %s188_s9, 2  ;;  %s959_s14 = scalar_lea.hbm %s1063_s0, %s473_s11 }
  0x5b   : > { %s192_s20 = scalar_lea.vmem [#allocation2], %s472_s30  ;;  %p961_p11 = pnand %p536_p2, %p38_p1 }
  0x5c   : > { %s199_s24 = sshll.u32 %s192_s20, 4  ;;  %s189_s29 = scalar_lea.sflag [#allocation3], %s188_s9  ;;  %s965_s24 = int_to_ptr.vmem [resolvable:$true] %s199_s24 }
  0x5d   : > { %s668_s27 = scalar_lea.hbm %s959_s14, 64  ;;  %p670_p0 = pneg %p961_p11 }
  0x5e   : > { %p669_p8 = scmp.ne.s32.totalorder %s959_s14, %s668_s27  ;;  %s673_s28 = scalar_lea.hbm %s1063_s0, 128 }
  0x5f   : > { %p674_p7 = scmp.lt.u32.totalorder %s959_s14, %s1063_s0  ;;  %p675_p10 = scmp.lt.u32.totalorder %s673_s28, %s668_s27 }
  0x60   : > { %p671_p3 = pnand %p670_p0, %p669_p8  ;;  %p677_p9 = scmp.lt.u32.totalorder %s668_s27, %s959_s14 }
  0x61   : > { %p676_p13 = por %p675_p10, %p674_p7 }
  0x62   : > { %p672_p5 = pneg %p671_p3 }
  0x63   : > { %p678_p12 = por %p677_p9, %p676_p13 }
  0x65   : > { %p679_p2 = pnand %p678_p12, %p672_p5 }
  0x67   : > { %682 = shalt.err (!%p679_p2)
}
  0x68   : > { %s683_s9 = scalar_lea.vmem %s965_s24, 64  ;;  %s777_s30 = smov [#allocation2]  }
  0x69   : > { %p684_p1 = scmp.ne.s32.totalorder %s965_s24, %s683_s9  ;;  %s688_s12 = sshll.u32 %s777_s30, 4  ;;  %s689_s12 = int_to_ptr.vmem [resolvable:$false] %s688_s12 }
  0x6a   : > { %s690_s13 = scalar_lea.vmem %s689_s12, 128  ;;  %p691_p3 = scmp.lt.s32.totalorder %s965_s24, %s689_s12 }
  0x6b   : > { %p686_p4 = pnand %p684_p1, %p670_p0  ;;  %p692_p7 = scmp.lt.s32.totalorder %s690_s13, %s683_s9 }
  0x6d   : > { %p687_p8 = pneg %p686_p4  ;;  %p693_p10 = por %p692_p7, %p691_p3 }
  0x6f   : > { %p694_p13 = pnand %p693_p10, %p687_p8 }
  0x71   : > { %697 = shalt.err (!%p694_p13)
}
  0x72   : > { %528 = dma.hbm_to_vmem [thread:$0]  (!%p961_p11), %s959_s14, 64, %s965_s24, %s189_s29  }
  0x73   : > { %p1079_p5 = scmp.ne.s32.totalorder %s1073_s23, 0 }
  0x74   : > { %s995_s20 = sand.u32 (!%p1079_p5), 1, %s764_s16   ;;  %p1080_p0 = scmp.ne.s32.totalorder (!%p1079_p5), %s1071_s21, 0 }
  0x75   : > { %208 = sbr.rel (%p1079_p5) target bundleno = 653 (0x28d), region = 36  ;;  %s475_s27 = sshll.u32 (!%p1079_p5), %s995_s20, 2 }
  0x76   : > { %s211_s5 = scalar_lea.sflag (!%p1079_p5), [#allocation3], %s995_s20  ;;  %s214_s6 = scalar_lea.vmem (!%p1079_p5), [#allocation2], %s475_s27 }
  0x7c   : > { %743 = dma.done.wait (%p1080_p0), %s211_s5, 64  }
  0x7d   : > { %745 = vsyncadd (%p1080_p0), %s211_s5, 4294967232  ;;  %p1081_p11 = scmp.eq.s32.totalorder %s829_s19, 0 }
  0x7f   : > { %747 = dma.done.wait (%p1081_p11), [#allocation6], 192   ;;  %p1082_p9 = pmov %p1081_p11 }
  0x81   : > { %749 = vsyncadd (%p1082_p9), [#allocation6], 4294967104  ;;  %p1083_p12 = pmov %p1082_p9 }
  0x82   : > { %p1084_p2 = pmov %p1082_p9 }
  0x83   : > { %751 = dma.done.wait (%p1083_p12), [#allocation9], 128  }
  0x84   : > { %753 = vsyncadd (%p1084_p2), [#allocation9], 4294967168  ;;  %v778_v0 = vmov 0.0   ;;  %vm779_vm0 = vmmov 0   ;;  %vm258_vm1 = vcmask 1043456   ;;  %vm254_vm2 = vcmask 64512  }
  0x85   : > { %487 = vmatprep.subr.bf16.mxu0 %v778_v0  ;;  %489 = vmatprep.mubr.msk.bf16.mxu0 %vm779_vm0, %v778_v0  ;;  %v253_v1 = vld [vmem:[%s214_s6] sm:$0xf]  ;;  %v252_v3 = vld [vmem:[#allocation5] sm:$0xf]  ;;  %v780_v9 = vmov 0   ;;  %v302_v10 = vld [vmem:[#allocation7] sm:$0xff] }
  0x86   : > { %v260_v2 = vsel %vm258_vm1, %v253_v1, 0  ;;  %580 = vset.pattern.permute.xlu1 %v780_v9  ;;  %581 = vset.pattern.permute.xlu0 %v780_v9  ;;  %v303_v11 = vld [vmem:[#allocation8] sm:$0xff]  ;;  %s781_s28 = smov 0.0   ;;  %s482_s30 = sshll.u32 %s829_s19, 6 }
  0x87   : > { %488 = vmatpush3.bf16.msra.mxu0 %v260_v2  ;;  %338 = vperm.xlu1 %580, %v302_v10   ;;  %s250_s12 = scalar_lea.vmem [#allocation10], %s475_s27  ;;  %s782_s19 = smov [#allocation10]  }
  0x88   : > { %s367_s13 = sshll.u32 %s250_s12, 4  ;;  %s702_s27 = sshll.u32 %s782_s19, 4  ;;  %s1021_s13 = int_to_ptr.vmem [resolvable:$true] %s367_s13  ;;  %s703_s27 = int_to_ptr.vmem [resolvable:$false] %s702_s27 }
  0x89   : > { %p705_p3 = scmp.lt.s32.totalorder %s1021_s13, %s703_s27 }
  0x8a   : > { %490 = vmatmul.mubr.msk.bf16.vlgmr.msra.gmra.mrb[0].mxu0 %vm254_vm2, %v252_v3 }
  0x8b   : > { %344 = vperm.xlu1 %580, %v303_v11  }
 0x106   : > { %v339_v30 = vpop.permute.xlu1 %338 }
 0x10a   : > { %v345_v34 = vpop.permute.xlu1 %344 }
 0x15d   : > { %v296_v4 = vpop.f32.mrb[0].mxu0 }
 0x15e   : > { %304 = vadd.xlane.f32.xlu0 %v296_v4  ;;  %v491_v5 = vpop.f32.mrb[1].mxu0  ;;  %v313_v8 = vmul.f32 %v296_v4, %v296_v4 }
 0x15f   : > { %v299_v6 = vpop.f32.mrb[2].mxu0 }
 0x160   : > { %v492_v7 = vpop.f32.mrb[3].mxu0 }
 0x162   : > { %314 = vadd.xlane.f32.xlu0 %v313_v8 }
 0x1eb   : > { %v305_v12 = vpop.xlane.xlu0 %304 }
 0x1ec   : > { %v306_v13 = vrot.slane %v305_v12, 4 }
 0x1ee   : > { %v307_v14 = vadd.f32 %v306_v13, %v305_v12 }
 0x1ef   : > { %v315_v15 = vpop.xlane.xlu0 %314 }
 0x1f0   : > { %v308_v16 = vrot.slane %v307_v14, 2  ;;  %v316_v17 = vrot.slane %v315_v15, 4 }
 0x1f2   : > { %v317_v18 = vadd.f32 %v316_v17, %v315_v15  ;;  %v309_v19 = vadd.f32 %v308_v16, %v307_v14 }
 0x1f4   : > { %v318_v20 = vrot.slane %v317_v18, 2  ;;  %v310_v21 = vrot.slane %v309_v19, 1 }
 0x1f6   : > { %v319_v22 = vadd.f32 %v318_v20, %v317_v18  ;;  %v311_v23 = vadd.f32 %v310_v21, %v309_v19 }
 0x1f8   : > { %493 = vpush %v311_v23  ;;  %v320_v24 = vrot.slane %v319_v22, 1 }
 0x1fa   : > { %v321_v25 = vadd.f32 %v320_v24, %v319_v22 }
 0x1fc   : > { %495 = vpush %v321_v25 }
 0x229   : > { %s494_s21 = spop %493 }
 0x22a   : > { %s323_s23 = smul.f32 0.003125, %s494_s21  ;;  %s1019_s21 = scalar_lea.hbm %s1067_s4, %s482_s30 }
 0x22c   : > { %v328_v26 = vstv %s323_s23  ;;  %s325_s14 = smul.f32 %s323_s23, %s323_s23  ;;  %s354_s23 = scalar_lea.sflag [#allocation4], %s995_s20 }
 0x22d   : > { %s496_s24 = spop %495  ;;  %v329_v27 = vsub.f32 %v296_v4, %v328_v26 }
 0x22e   : > { %s324_s26 = smul.f32 0.003125, %s496_s24  ;;  %s704_s24 = scalar_lea.vmem %s703_s27, 128 }
 0x230   : > { %s326_s29 = ssub.f32 %s324_s26, %s325_s14  ;;  %s698_s14 = scalar_lea.vmem %s1021_s13, 64 }
 0x231   : > { %p699_p1 = scmp.ne.s32.totalorder %s1021_s13, %s698_s14  ;;  %p706_p7 = scmp.lt.s32.totalorder %s704_s24, %s698_s14 }
 0x232   : > { %s327_s7 = smax.f32 %s781_s28, %s326_s29 }
 0x233   : > { %s330_s11 = sadd.f32 1e-05, %s327_s7  ;;  %p700_p4 = pnand %p699_p1, %p950_p6 }
 0x234   : > { %p707_p10 = por %p706_p7, %p705_p3 }
 0x235   : > { %v331_v28 = vstv %s330_s11  ;;  %p701_p8 = pneg %p700_p4 }
 0x236   : > { %582 = vrsqrt.f32 %v331_v28 }
 0x237   : > { %p708_p13 = pnand %p707_p10, %p701_p8 }
 0x240   : > { %v583_v29 = vpop.eup %582 }
 0x241   : > { %497 = vpush %v583_v29 }
 0x272   : > { %s498_s9 = spop %497 }
 0x273   : > { %v334_v31 = vstv %s498_s9 }
 0x274   : > { %v335_v32 = vmul.f32 %v334_v31, %v329_v27 }
 0x276   : > { %v341_v33 = vmul.f32 %v339_v30, %v335_v32 }
 0x278   : > { %v347_v35 = vadd.f32 %v345_v34, %v341_v33 }
 0x27a   : > { %vm348_vm3 = vcmp.ge.f32.partialorder %v347_v35, 0.0  ;;  %v349_v36 = vmul.f32 0.2, %v347_v35 }
 0x27c   : > { %v350_v37 = vsel %vm348_vm3, %v347_v35, %v349_v36 }
 0x27d   : > { %v351_v38 = vpack.c.bf16 %v350_v37, %v350_v37 }
 0x27f   : > { %352 = vst [vmem:[%s250_s12] sm:$0xf] %v351_v38 }
 0x280   : > { %711 = shalt.err (!%p708_p13)
}
 0x281   : > { %s712_s20 = scalar_lea.hbm %s1019_s21, 64  ;;  %s716_s28 = scalar_lea.hbm %s1067_s4, 128 }
 0x282   : > { %p713_p5 = scmp.ne.s32.totalorder %s1019_s21, %s712_s20  ;;  %p717_p9 = scmp.lt.u32.totalorder %s1019_s21, %s1067_s4 }
 0x283   : > { %p718_p12 = scmp.lt.u32.totalorder %s716_s28, %s712_s20  ;;  %p720_p1 = scmp.lt.u32.totalorder %s712_s20, %s1019_s21 }
 0x284   : > { %p714_p0 = pnand %p713_p5, %p950_p6 }
 0x285   : > { %p719_p2 = por %p718_p12, %p717_p9 }
 0x286   : > { %p715_p11 = pneg %p714_p0 }
 0x287   : > { %p721_p4 = por %p720_p1, %p719_p2 }
 0x289   : > { %p722_p8 = pnand %p721_p4, %p715_p11 }
 0x28b   : > { %725 = shalt.err (!%p722_p8)
}
 0x28c   : > { %513 = dma.vmem_to_hbm [thread:$0]  (%p950_p6), %s1021_s13, 64, %s1019_s21, %s354_s23  }
 0x28d PF: > { %s379_s9 = sand.u32 1, %s760_s15   ;;  %p1085_p3 = scmp.ne.s32.totalorder %s1072_s22, 0 }
 0x28e   : > { %p1086_p7 = scmp.ge.s32.totalorder %s772_s18, 2  ;;  %s380_s30 = scalar_lea.sflag [#allocation4], %s379_s9 }
 0x290   : > { %p530_p10 = pnand %p1086_p7, %p1085_p3 }
 0x292   : > { %755 = dma.done.wait (!%p530_p10), %s380_s30, 64  }
 0x293   : > { %757 = vsyncadd (!%p530_p10), %s380_s30, 4294967232  ;;  %p19_p13 = scmp.ge.s32.totalorder %s936_s10, 4   ;;  %s1087_s15 = smov %s764_s16 }
 0x294   : > { %s1088_s16 = smov %s768_s17  ;;  %s1089_s17 = smov %s946_s8 }
 0x295   : > { %s1090_s18 = smov %s936_s10  ;;  %21 = sbr.rel (!%p19_p13) target bundleno = 7 (0x7), region = 93 }
 0x29c   :  { %385 = vsyncpa [#allocation3], 1 }
 0x29d   :  { %387 = vsyncpa [#allocation3 + $0x1], 1 }
 0x29e   :  { %388 = vsyncpa [#allocation6], 1 }
 0x29f   :  { %389 = vsyncpa [#allocation9], 1 }
 0x2a0   :  { %390 = vsyncpa [#allocation4], 1 }
 0x2a1   :  { %392 = vsyncpa [#allocation4 + $0x1], 1 }

// kernel: tile.9
= control target key start
LH: loop header
LB: loop body
LE: loop exit
PB: predicated region body
PF: predicated region fallthrough
CT: control target
= control target key end

     0   :  { %vm2053_vm0 = vcmask 1041409   ;;  %vm2057_vm1 = vcmask 1042434   ;;  %vm2061_vm2 = vcmask 1043459   ;;  %vm2065_vm3 = vcmask 1044484   ;;  %s3630_s12 = smov 120   ;;  %s3631_s13 = smov 112   ;;  %s4291_s0 = inlined_call_operand.vmem [shape: bf16[2,4,2,8,2,8], index: 0, kind: input, shape index: {}]   ;;  %s4292_s1 = inlined_call_operand.hbm [shape: bf16[2,4,256], index: 1, kind: output, shape index: {}]  }
   0x1   :  { %v3387_v0 = vld [vmem:[%s4291_s0 + $0x7f] sm:$0x1]  ;;  %v3395_v1 = vld [vmem:[%s4291_s0 + $0x77] sm:$0x1]  ;;  %v3403_v2 = vld [vmem:[%s4291_s0 + $0x6f] sm:$0x1] }
   0x2   :  { %v18_v3 = vunpack.c.l.bf16 %v3387_v0  ;;  %v146_v4 = vunpack.c.l.bf16 %v3395_v1  ;;  %v274_v5 = vunpack.c.l.bf16 %v3403_v2  ;;  %v3411_v6 = vld [vmem:[%s4291_s0 + $0x67] sm:$0x1]  ;;  %v3419_v7 = vld [vmem:[%s4291_s0 + $0x5f] sm:$0x1]  ;;  %v3427_v8 = vld [vmem:[%s4291_s0 + $0x57] sm:$0x1] }
   0x3   :  { %v402_v9 = vunpack.c.l.bf16 %v3411_v6  ;;  %v530_v10 = vunpack.c.l.bf16 %v3419_v7  ;;  %v658_v11 = vunpack.c.l.bf16 %v3427_v8  ;;  %v3435_v12 = vld [vmem:[%s4291_s0 + $0x4f] sm:$0x1]  ;;  %v3443_v13 = vld [vmem:[%s4291_s0 + $0x47] sm:$0x1]  ;;  %v3451_v14 = vld [vmem:[%s4291_s0 + $0x3f] sm:$0x1] }
   0x4   :  { %21 = vst [vmem:[#allocation3 + $0x3f8] sm:$0x3] %v18_v3  ;;  %149 = vst [vmem:[#allocation3 + $0x3b8] sm:$0x3] %v146_v4  ;;  %v786_v15 = vunpack.c.l.bf16 %v3435_v12  ;;  %v914_v16 = vunpack.c.l.bf16 %v3443_v13  ;;  %v1042_v17 = vunpack.c.l.bf16 %v3451_v14  ;;  %v3459_v18 = vld [vmem:[%s4291_s0 + $0x37] sm:$0x1] }
   0x5   :  { %277 = vst [vmem:[#allocation3 + $0x378] sm:$0x3] %v274_v5  ;;  %v3467_v19 = vld [vmem:[%s4291_s0 + $0x2f] sm:$0x1]  ;;  %v3475_v20 = vld [vmem:[%s4291_s0 + $0x27] sm:$0x1]  ;;  %v1170_v21 = vunpack.c.l.bf16 %v3459_v18 }
   0x6   :  { %405 = vst [vmem:[#allocation3 + $0x338] sm:$0x3] %v402_v9  ;;  %533 = vst [vmem:[#allocation3 + $0x2f8] sm:$0x3] %v530_v10  ;;  %v1298_v22 = vunpack.c.l.bf16 %v3467_v19  ;;  %v1426_v23 = vunpack.c.l.bf16 %v3475_v20  ;;  %v3483_v24 = vld [vmem:[%s4291_s0 + $0x1f] sm:$0x1] }
   0x7   :  { %661 = vst [vmem:[#allocation3 + $0x2b8] sm:$0x3] %v658_v11  ;;  %v3491_v25 = vld [vmem:[%s4291_s0 + $0x17] sm:$0x1]  ;;  %v3499_v26 = vld [vmem:[%s4291_s0 + $0xf] sm:$0x1]  ;;  %v1554_v27 = vunpack.c.l.bf16 %v3483_v24 }
   0x8   :  { %789 = vst [vmem:[#allocation3 + $0x278] sm:$0x3] %v786_v15  ;;  %917 = vst [vmem:[#allocation3 + $0x238] sm:$0x3] %v914_v16  ;;  %v1682_v28 = vunpack.c.l.bf16 %v3491_v25  ;;  %v1810_v29 = vunpack.c.l.bf16 %v3499_v26  ;;  %v3507_v30 = vld [vmem:[%s4291_s0 + $0x7] sm:$0x1] }
   0x9   :  { %1045 = vst [vmem:[#allocation3 + $0x1f8] sm:$0x3] %v1042_v17  ;;  %v3388_v31 = vld [vmem:[%s4291_s0 + $0x7e] sm:$0x1]  ;;  %1173 = vst [vmem:[#allocation3 + $0x1b8] sm:$0x3] %v1170_v21  ;;  %v1938_v32 = vunpack.c.l.bf16 %v3507_v30 }
   0xa   :  { %1301 = vst [vmem:[#allocation3 + $0x178] sm:$0x3] %v1298_v22  ;;  %1429 = vst [vmem:[#allocation3 + $0x138] sm:$0x3] %v1426_v23  ;;  %v3396_v33 = vld [vmem:[%s4291_s0 + $0x76] sm:$0x1]  ;;  %v34_v34 = vunpack.c.l.bf16 %v3388_v31 }
   0xb   :  { %1557 = vst [vmem:[#allocation3 + $0xf8] sm:$0x3] %v1554_v27  ;;  %1685 = vst [vmem:[#allocation3 + $0xb8] sm:$0x3] %v1682_v28  ;;  %v3404_v35 = vld [vmem:[%s4291_s0 + $0x6e] sm:$0x1]  ;;  %v162_v36 = vunpack.c.l.bf16 %v3396_v33 }
   0xc   :  { %1813 = vst [vmem:[#allocation3 + $0x78] sm:$0x3] %v1810_v29  ;;  %1941 = vst [vmem:[#allocation3 + $0x38] sm:$0x3] %v1938_v32  ;;  %v290_v37 = vunpack.c.l.bf16 %v3404_v35  ;;  %v3412_v38 = vld [vmem:[%s4291_s0 + $0x66] sm:$0x1] }
   0xd   :  { %v3420_v39 = vld [vmem:[%s4291_s0 + $0x5e] sm:$0x1]  ;;  %v3428_v40 = vld [vmem:[%s4291_s0 + $0x56] sm:$0x1]  ;;  %37 = vst [vmem:[#allocation3 + $0x3f0] sm:$0x3] %v34_v34  ;;  %v418_v41 = vunpack.c.l.bf16 %v3412_v38 }
   0xe   :  { %v546_v42 = vunpack.c.l.bf16 %v3420_v39  ;;  %v674_v43 = vunpack.c.l.bf16 %v3428_v40  ;;  %v3436_v44 = vld [vmem:[%s4291_s0 + $0x4e] sm:$0x1]  ;;  %v3444_v45 = vld [vmem:[%s4291_s0 + $0x46] sm:$0x1]  ;;  %v3452_v46 = vld [vmem:[%s4291_s0 + $0x3e] sm:$0x1] }
   0xf   :  { %165 = vst [vmem:[#allocation3 + $0x3b0] sm:$0x3] %v162_v36  ;;  %293 = vst [vmem:[#allocation3 + $0x370] sm:$0x3] %v290_v37  ;;  %v802_v47 = vunpack.c.l.bf16 %v3436_v44  ;;  %v930_v48 = vunpack.c.l.bf16 %v3444_v45  ;;  %v1058_v49 = vunpack.c.l.bf16 %v3452_v46  ;;  %vm2069_vm4 = vcmask 1045509   ;;  %s3632_s9 = smov 104  }
  0x10   :  { %v2165_v50 = vld [vmem:[#allocation3 + $0x2b8] sm:$0x2]   ;;  %421 = vst [vmem:[#allocation3 + $0x330] sm:$0x3] %v418_v41  ;;  %549 = vst [vmem:[#allocation3 + $0x2f0] sm:$0x3] %v546_v42 }
  0x11   :  { %v2169_v51 = vld [vmem:[#allocation3 + $0x337] sm:$0x4]   ;;  %677 = vst [vmem:[#allocation3 + $0x2b0] sm:$0x3] %v674_v43  ;;  %vm2073_vm5 = vcmask 1046534   ;;  %vm2077_vm6 = vcmask 1047559  }
  0x12   :  { %v2163_v52 = vld [vmem:[#allocation3 + $0x239] sm:$0x1]   ;;  %805 = vst [vmem:[#allocation3 + $0x270] sm:$0x3] %v802_v47  ;;  %933 = vst [vmem:[#allocation3 + $0x230] sm:$0x3] %v930_v48 }
  0x13   :  { %v2173_v53 = vld [vmem:[#allocation3 + $0x3b6] sm:$0x8]   ;;  %1061 = vst [vmem:[#allocation3 + $0x1f0] sm:$0x3] %v1058_v49  ;;  %v2167_v55 = vsel %vm2053_vm0, %v2165_v50, %v2163_v52  ;;  %v3460_v2 = vld [vmem:[%s4291_s0 + $0x36] sm:$0x1] }
  0x14   :  { %v2133_v54 = vld [vmem:[#allocation3 + $0x137] sm:$0x4]   ;;  %v2171_v62 = vsel %vm2057_vm1, %v2169_v51, %v2167_v55  ;;  %v3468_v3 = vld [vmem:[%s4291_s0 + $0x2e] sm:$0x1]  ;;  %v1186_v6 = vunpack.c.l.bf16 %v3460_v2  ;;  %v3476_v8 = vld [vmem:[%s4291_s0 + $0x26] sm:$0x1] }
  0x15   :  { %v2177_v56 = vld [vmem:[#allocation3 + $0x275] sm:$0x10]   ;;  %v2175_v0 = vsel %vm2061_vm2, %v2173_v53, %v2171_v62  ;;  %v1314_v7 = vunpack.c.l.bf16 %v3468_v3  ;;  %v3484_v9 = vld [vmem:[%s4291_s0 + $0x1e] sm:$0x1]  ;;  %v3492_v10 = vld [vmem:[%s4291_s0 + $0x16] sm:$0x1]  ;;  %v1442_v14 = vunpack.c.l.bf16 %v3476_v8 }
  0x16   :  { %v2181_v57 = vld [vmem:[#allocation3 + $0x2f4] sm:$0x20]   ;;  %v2179_v5 = vsel %vm2065_vm3, %v2177_v56, %v2175_v0  ;;  %v1570_v15 = vunpack.c.l.bf16 %v3484_v9  ;;  %v3500_v16 = vld [vmem:[%s4291_s0 + $0xe] sm:$0x1]  ;;  %v3508_v17 = vld [vmem:[%s4291_s0 + $0x6] sm:$0x1]  ;;  %v1698_v21 = vunpack.c.l.bf16 %v3492_v10 }
  0x17   :  { %v2185_v58 = vld [vmem:[#allocation3 + $0x373] sm:$0x40]   ;;  %v2183_v13 = vsel %vm2069_vm4, %v2181_v57, %v2179_v5  ;;  %1189 = vst [vmem:[#allocation3 + $0x1b0] sm:$0x3] %v1186_v6  ;;  %1317 = vst [vmem:[#allocation3 + $0x170] sm:$0x3] %v1314_v7  ;;  %v1826_v22 = vunpack.c.l.bf16 %v3500_v16  ;;  %v1954_v27 = vunpack.c.l.bf16 %v3508_v17 }
  0x18   :  { %v2129_v59 = vld [vmem:[#allocation3 + $0xb8] sm:$0x2]   ;;  %v2187_v20 = vsel %vm2073_vm5, %v2185_v58, %v2183_v13  ;;  %v2311_v23 = vld [vmem:[#allocation3 + $0x2b0] sm:$0x2]   ;;  %1445 = vst [vmem:[#allocation3 + $0x130] sm:$0x3] %v1442_v14 }
  0x19   :  { %v2137_v60 = vld [vmem:[#allocation3 + $0x1b6] sm:$0x8]   ;;  %v2315_v24 = vld [vmem:[#allocation3 + $0x32f] sm:$0x4]   ;;  %1573 = vst [vmem:[#allocation3 + $0xf0] sm:$0x3] %v1570_v15 }
  0x1a   :  { %v2141_v61 = vld [vmem:[#allocation3 + $0x75] sm:$0x10]   ;;  %v2309_v28 = vld [vmem:[#allocation3 + $0x231] sm:$0x1]   ;;  %1701 = vst [vmem:[#allocation3 + $0xb0] sm:$0x3] %v1698_v21 }
  0x1b   :  { %v2127_v63 = vld [vmem:[#allocation3 + $0x39] sm:$0x1]   ;;  %v2319_v29 = vld [vmem:[#allocation3 + $0x3ae] sm:$0x8]   ;;  %1829 = vst [vmem:[#allocation3 + $0x70] sm:$0x3] %v1826_v22  ;;  %v2313_v32 = vsel %vm2053_vm0, %v2311_v23, %v2309_v28 }
  0x1c   :  { %v2189_v1 = vld [vmem:[#allocation3 + $0x3f2] sm:$0x80]   ;;  %v2131_v4 = vsel %vm2053_vm0, %v2129_v59, %v2127_v63  ;;  %v2323_v33 = vld [vmem:[#allocation3 + $0x26d] sm:$0x10]   ;;  %v2200_v34 = vld [vmem:[#allocation3 + $0x38] sm:$0x1]   ;;  %v2317_v36 = vsel %vm2057_vm1, %v2315_v24, %v2313_v32 }
  0x1d   :  { %v2135_v11 = vsel %vm2057_vm1, %v2133_v54, %v2131_v4  ;;  %v2145_v12 = vld [vmem:[#allocation3 + $0xf4] sm:$0x20]   ;;  %v2191_v31 = vsel %vm2077_vm6, %v2189_v1, %v2187_v20  ;;  %1957 = vst [vmem:[#allocation3 + $0x30] sm:$0x3] %v1954_v27  ;;  %v2202_v37 = vld [vmem:[#allocation3 + $0xb7] sm:$0x2]   ;;  %v2321_v41 = vsel %vm2061_vm2, %v2319_v29, %v2317_v36 }
  0x1e   :  { %v2139_v18 = vsel %vm2061_vm2, %v2137_v60, %v2135_v11  ;;  %v2149_v19 = vld [vmem:[#allocation3 + $0x173] sm:$0x40]   ;;  %v2206_v38 = vld [vmem:[#allocation3 + $0x136] sm:$0x4]   ;;  %v2327_v42 = vld [vmem:[#allocation3 + $0x2ec] sm:$0x20]   ;;  %v2204_v43 = vsel %vm2053_vm0, %v2202_v37, %v2200_v34  ;;  %v2325_v51 = vsel %vm2065_vm3, %v2323_v33, %v2321_v41 }
  0x1f   :  { %v2143_v25 = vsel %vm2065_vm3, %v2141_v61, %v2139_v18  ;;  %v2153_v26 = vld [vmem:[#allocation3 + $0x1f2] sm:$0x80]   ;;  %v2210_v39 = vld [vmem:[#allocation3 + $0x1b5] sm:$0x8]   ;;  %v2208_v47 = vsel %vm2057_vm1, %v2206_v38, %v2204_v43  ;;  %v2331_v57 = vld [vmem:[#allocation3 + $0x36b] sm:$0x40]   ;;  %v2329_v5 = vsel %vm2069_vm4, %v2327_v42, %v2325_v51 }
  0x20   :  { %v2147_v30 = vsel %vm2069_vm4, %v2145_v12, %v2143_v25  ;;  %v2214_v44 = vld [vmem:[#allocation3 + $0x74] sm:$0x10]   ;;  %v2212_v52 = vsel %vm2061_vm2, %v2210_v39, %v2208_v47  ;;  %v2279_v62 = vld [vmem:[#allocation3 + $0x12f] sm:$0x4]   ;;  %v2356_v20 = vld [vmem:[#allocation3 + $0x1ad] sm:$0x8]   ;;  %v2333_v25 = vsel %vm2073_vm5, %v2331_v57, %v2329_v5 }
  0x21   :  { %v2151_v35 = vsel %vm2073_vm5, %v2149_v19, %v2147_v30  ;;  %v2218_v45 = vld [vmem:[#allocation3 + $0xf3] sm:$0x20]   ;;  %v2216_v58 = vsel %vm2065_vm3, %v2214_v44, %v2212_v52  ;;  %v2283_v63 = vld [vmem:[#allocation3 + $0x1ae] sm:$0x8]   ;;  %v2348_v14 = vld [vmem:[#allocation3 + $0xaf] sm:$0x2]  }
  0x22   :  { %v2155_v40 = vsel %vm2077_vm6, %v2153_v26, %v2151_v35  ;;  %v2222_v48 = vld [vmem:[#allocation3 + $0x172] sm:$0x40]   ;;  %v2220_v0 = vsel %vm2069_vm4, %v2218_v45, %v2216_v58  ;;  %v2275_v3 = vld [vmem:[#allocation3 + $0xb0] sm:$0x2]   ;;  %v2352_v19 = vld [vmem:[#allocation3 + $0x12e] sm:$0x4]  }
  0x23   :  { %v3531_v46 = vpack.i.bf16 %v2191_v31, %v2155_v40  ;;  %v2236_v49 = vld [vmem:[#allocation3 + $0x238] sm:$0x1]   ;;  %v2287_v4 = vld [vmem:[#allocation3 + $0x6d] sm:$0x10]   ;;  %v2224_v6 = vsel %vm2073_vm5, %v2222_v48, %v2220_v0  ;;  %v2360_v21 = vld [vmem:[#allocation3 + $0x6c] sm:$0x10]  }
  0x24   :  { %v2238_v50 = vld [vmem:[#allocation3 + $0x2b7] sm:$0x2]   ;;  %v2273_v9 = vld [vmem:[#allocation3 + $0x31] sm:$0x1]   ;;  %v2346_v13 = vld [vmem:[#allocation3 + $0x30] sm:$0x1]  }
  0x25   :  { %v2240_v53 = vsel %vm2053_vm0, %v2238_v50, %v2236_v49  ;;  %v2242_v54 = vld [vmem:[#allocation3 + $0x336] sm:$0x4]   ;;  %3532 = vrot.lane.b32.xlu0 %v3531_v46, %s3630_s12  ;;  %v2335_v10 = vld [vmem:[#allocation3 + $0x3ea] sm:$0x80]   ;;  %v2277_v15 = vsel %vm2053_vm0, %v2275_v3, %v2273_v9  ;;  %v2350_v18 = vsel %vm2053_vm0, %v2348_v14, %v2346_v13  ;;  %v2364_v28 = vld [vmem:[#allocation3 + $0xeb] sm:$0x20]  }
  0x26   :  { %v2246_v55 = vld [vmem:[#allocation3 + $0x3b5] sm:$0x8]   ;;  %v2244_v60 = vsel %vm2057_vm1, %v2242_v54, %v2240_v53  ;;  %v2295_v16 = vld [vmem:[#allocation3 + $0x16b] sm:$0x40]   ;;  %v2281_v22 = vsel %vm2057_vm1, %v2279_v62, %v2277_v15  ;;  %v2354_v27 = vsel %vm2057_vm1, %v2352_v19, %v2350_v18  ;;  %v2368_v29 = vld [vmem:[#allocation3 + $0x16a] sm:$0x40]   ;;  %v2337_v43 = vsel %vm2077_vm6, %v2335_v10, %v2333_v25 }
  0x27   :  { %v2250_v56 = vld [vmem:[#allocation3 + $0x274] sm:$0x10]   ;;  %v2248_v1 = vsel %vm2061_vm2, %v2246_v55, %v2244_v60  ;;  %v2291_v23 = vld [vmem:[#allocation3 + $0xec] sm:$0x20]   ;;  %v2285_v30 = vsel %vm2061_vm2, %v2283_v63, %v2281_v22  ;;  %v2358_v32 = vsel %vm2061_vm2, %v2356_v20, %v2354_v27  ;;  %v2372_v33 = vld [vmem:[#allocation3 + $0x1e9] sm:$0x80]  }
  0x28   :  { %v2226_v59 = vld [vmem:[#allocation3 + $0x1f1] sm:$0x80]   ;;  %v2252_v7 = vsel %vm2065_vm3, %v2250_v56, %v2248_v1  ;;  %v2299_v24 = vld [vmem:[#allocation3 + $0x1ea] sm:$0x80]   ;;  %v2382_v34 = vld [vmem:[#allocation3 + $0x230] sm:$0x1]   ;;  %v2289_v36 = vsel %vm2065_vm3, %v2287_v4, %v2285_v30  ;;  %v2362_v37 = vsel %vm2065_vm3, %v2360_v21, %v2358_v32 }
  0x29   :  { %v2254_v61 = vld [vmem:[#allocation3 + $0x2f3] sm:$0x20]   ;;  %v2228_v11 = vsel %vm2077_vm6, %v2226_v59, %v2224_v6  ;;  %v2384_v35 = vld [vmem:[#allocation3 + $0x2af] sm:$0x2]   ;;  %v2293_v42 = vsel %vm2069_vm4, %v2291_v23, %v2289_v36  ;;  %v2366_v44 = vsel %vm2069_vm4, %v2364_v28, %v2362_v37  ;;  %v3389_v52 = vld [vmem:[%s4291_s0 + $0x7d] sm:$0x1] }
  0x2a   :  { %v2258_v2 = vld [vmem:[#allocation3 + $0x372] sm:$0x40]   ;;  %v2256_v12 = vsel %vm2069_vm4, %v2254_v61, %v2252_v7  ;;  %v2386_v38 = vsel %vm2053_vm0, %v2384_v35, %v2382_v34  ;;  %v2388_v39 = vld [vmem:[#allocation3 + $0x32e] sm:$0x4]   ;;  %v2297_v49 = vsel %vm2073_vm5, %v2295_v16, %v2293_v42  ;;  %v2370_v50 = vsel %vm2073_vm5, %v2368_v29, %v2366_v44  ;;  %v3397_v53 = vld [vmem:[%s4291_s0 + $0x75] sm:$0x1] }
  0x2b   :  { %v2262_v8 = vld [vmem:[#allocation3 + $0x3f1] sm:$0x80]   ;;  %v2260_v17 = vsel %vm2073_vm5, %v2258_v2, %v2256_v12  ;;  %v2392_v40 = vld [vmem:[#allocation3 + $0x3ad] sm:$0x8]   ;;  %v2390_v45 = vsel %vm2057_vm1, %v2388_v39, %v2386_v38  ;;  %v3405_v54 = vld [vmem:[%s4291_s0 + $0x6d] sm:$0x1]  ;;  %v2301_v55 = vsel %vm2077_vm6, %v2299_v24, %v2297_v49  ;;  %v2374_v56 = vsel %vm2077_vm6, %v2372_v33, %v2370_v50 }
  0x2c   :  { %v2264_v26 = vsel %vm2077_vm6, %v2262_v8, %v2260_v17  ;;  %v2396_v41 = vld [vmem:[#allocation3 + $0x26c] sm:$0x10]   ;;  %v2394_v51 = vsel %vm2061_vm2, %v2392_v40, %v2390_v45  ;;  %v50_v58 = vunpack.c.l.bf16 %v3389_v52  ;;  %v3413_v59 = vld [vmem:[%s4291_s0 + $0x65] sm:$0x1]  ;;  %v3421_v60 = vld [vmem:[%s4291_s0 + $0x5d] sm:$0x1]  ;;  %v3541_v62 = vpack.i.bf16 %v2337_v43, %v2301_v55 }
  0x2d   :  { %v3536_v31 = vpack.i.bf16 %v2264_v26, %v2228_v11  ;;  %v2400_v46 = vld [vmem:[#allocation3 + $0x2eb] sm:$0x20]   ;;  %v2398_v57 = vsel %vm2065_vm3, %v2396_v41, %v2394_v51  ;;  %v3429_v61 = vld [vmem:[%s4291_s0 + $0x55] sm:$0x1]  ;;  %v178_v0 = vunpack.c.l.bf16 %v3397_v53  ;;  %v306_v1 = vunpack.c.l.bf16 %v3405_v54  ;;  %v3437_v2 = vld [vmem:[%s4291_s0 + $0x4d] sm:$0x1] }
  0x2e   :  { %v2404_v47 = vld [vmem:[#allocation3 + $0x36a] sm:$0x40]   ;;  %v2402_v63 = vsel %vm2069_vm4, %v2400_v46, %v2398_v57  ;;  %v3445_v3 = vld [vmem:[%s4291_s0 + $0x45] sm:$0x1]  ;;  %v3453_v4 = vld [vmem:[%s4291_s0 + $0x3d] sm:$0x1]  ;;  %v434_v6 = vunpack.c.l.bf16 %v3413_v59  ;;  %v562_v7 = vunpack.c.l.bf16 %v3421_v60  ;;  %v690_v8 = vunpack.c.l.bf16 %v3429_v61  ;;  %3542 = vrot.lane.b32.xlu1 %v3541_v62, %s3632_s9 }
  0x2f   :  { %3537 = vrot.lane.b32.xlu0 %v3536_v31, %s3631_s13  ;;  %v2408_v48 = vld [vmem:[#allocation3 + $0x3e9] sm:$0x80]   ;;  %v2406_v5 = vsel %vm2073_vm5, %v2404_v47, %v2402_v63  ;;  %53 = vst [vmem:[#allocation3 + $0x3e8] sm:$0x3] %v50_v58  ;;  %v3461_v9 = vld [vmem:[%s4291_s0 + $0x35] sm:$0x1]  ;;  %v818_v13 = vunpack.c.l.bf16 %v3437_v2  ;;  %v946_v14 = vunpack.c.l.bf16 %v3445_v3  ;;  %v1074_v15 = vunpack.c.l.bf16 %v3453_v4 }
  0x30   :  { %v3469_v10 = vld [vmem:[%s4291_s0 + $0x2d] sm:$0x1]  ;;  %v3477_v11 = vld [vmem:[%s4291_s0 + $0x25] sm:$0x1]  ;;  %v2410_v12 = vsel %vm2077_vm6, %v2408_v48, %v2406_v5  ;;  %181 = vst [vmem:[#allocation3 + $0x3a8] sm:$0x3] %v178_v0  ;;  %v1202_v20 = vunpack.c.l.bf16 %v3461_v9 }
  0x31   :  { %309 = vst [vmem:[#allocation3 + $0x368] sm:$0x3] %v306_v1  ;;  %v3485_v16 = vld [vmem:[%s4291_s0 + $0x1d] sm:$0x1]  ;;  %v3493_v17 = vld [vmem:[%s4291_s0 + $0x15] sm:$0x1]  ;;  %v3546_v19 = vpack.i.bf16 %v2410_v12, %v2374_v56  ;;  %v1330_v21 = vunpack.c.l.bf16 %v3469_v10  ;;  %v1458_v22 = vunpack.c.l.bf16 %v3477_v11 }
  0x32   :  { %v3501_v18 = vld [vmem:[%s4291_s0 + $0xd] sm:$0x1]  ;;  %437 = vst [vmem:[#allocation3 + $0x328] sm:$0x3] %v434_v6  ;;  %565 = vst [vmem:[#allocation3 + $0x2e8] sm:$0x3] %v562_v7  ;;  %v1586_v25 = vunpack.c.l.bf16 %v3485_v16  ;;  %v1714_v26 = vunpack.c.l.bf16 %v3493_v17 }
  0x33   :  { %693 = vst [vmem:[#allocation3 + $0x2a8] sm:$0x3] %v690_v8  ;;  %v3509_v23 = vld [vmem:[%s4291_s0 + $0x5] sm:$0x1]  ;;  %v3390_v24 = vld [vmem:[%s4291_s0 + $0x7c] sm:$0x1]  ;;  %v1842_v27 = vunpack.c.l.bf16 %v3501_v18 }
  0x34   :  { %821 = vst [vmem:[#allocation3 + $0x268] sm:$0x3] %v818_v13  ;;  %949 = vst [vmem:[#allocation3 + $0x228] sm:$0x3] %v946_v14  ;;  %v1970_v28 = vunpack.c.l.bf16 %v3509_v23  ;;  %v3398_v29 = vld [vmem:[%s4291_s0 + $0x74] sm:$0x1]  ;;  %v66_v32 = vunpack.c.l.bf16 %v3390_v24 }
  0x35   :  { %1077 = vst [vmem:[#allocation3 + $0x1e8] sm:$0x3] %v1074_v15  ;;  %v3406_v30 = vld [vmem:[%s4291_s0 + $0x6c] sm:$0x1]  ;;  %v3414_v31 = vld [vmem:[%s4291_s0 + $0x64] sm:$0x1]  ;;  %v194_v33 = vunpack.c.l.bf16 %v3398_v29 }
  0x36   :  { %1205 = vst [vmem:[#allocation3 + $0x1a8] sm:$0x3] %v1202_v20  ;;  %1333 = vst [vmem:[#allocation3 + $0x168] sm:$0x3] %v1330_v21  ;;  %v322_v34 = vunpack.c.l.bf16 %v3406_v30  ;;  %v450_v35 = vunpack.c.l.bf16 %v3414_v31  ;;  %v3422_v36 = vld [vmem:[%s4291_s0 + $0x5c] sm:$0x1] }
  0x37   :  { %1461 = vst [vmem:[#allocation3 + $0x128] sm:$0x3] %v1458_v22  ;;  %v3430_v37 = vld [vmem:[%s4291_s0 + $0x54] sm:$0x1]  ;;  %v3438_v38 = vld [vmem:[%s4291_s0 + $0x4c] sm:$0x1]  ;;  %v578_v39 = vunpack.c.l.bf16 %v3422_v36 }
  0x38   :  { %s3633_s3 = smov 96   ;;  %1589 = vst [vmem:[#allocation3 + $0xe8] sm:$0x3] %v1586_v25  ;;  %1717 = vst [vmem:[#allocation3 + $0xa8] sm:$0x3] %v1714_v26  ;;  %v706_v40 = vunpack.c.l.bf16 %v3430_v37  ;;  %v834_v41 = vunpack.c.l.bf16 %v3438_v38  ;;  %s3634_s22 = smov 88  }
  0x39   :  { %3547 = vrot.lane.b32.xlu1 %v3546_v19, %s3633_s3  ;;  %1845 = vst [vmem:[#allocation3 + $0x68] sm:$0x3] %v1842_v27  ;;  %1973 = vst [vmem:[#allocation3 + $0x28] sm:$0x3] %v1970_v28  ;;  %v3446_v42 = vld [vmem:[%s4291_s0 + $0x44] sm:$0x1] }
  0x3a   :  { %v3454_v43 = vld [vmem:[%s4291_s0 + $0x3c] sm:$0x1]  ;;  %v3462_v44 = vld [vmem:[%s4291_s0 + $0x34] sm:$0x1]  ;;  %69 = vst [vmem:[#allocation3 + $0x3e0] sm:$0x3] %v66_v32  ;;  %v962_v45 = vunpack.c.l.bf16 %v3446_v42 }
  0x3b   :  { %197 = vst [vmem:[#allocation3 + $0x3a0] sm:$0x3] %v194_v33  ;;  %325 = vst [vmem:[#allocation3 + $0x360] sm:$0x3] %v322_v34  ;;  %v1090_v46 = vunpack.c.l.bf16 %v3454_v43  ;;  %v1218_v47 = vunpack.c.l.bf16 %v3462_v44  ;;  %v3470_v48 = vld [vmem:[%s4291_s0 + $0x2c] sm:$0x1] }
  0x3c   :  { %453 = vst [vmem:[#allocation3 + $0x320] sm:$0x3] %v450_v35  ;;  %v3478_v49 = vld [vmem:[%s4291_s0 + $0x24] sm:$0x1]  ;;  %v3486_v50 = vld [vmem:[%s4291_s0 + $0x1c] sm:$0x1]  ;;  %v1346_v51 = vunpack.c.l.bf16 %v3470_v48 }
  0x3d   :  { %581 = vst [vmem:[#allocation3 + $0x2e0] sm:$0x3] %v578_v39  ;;  %709 = vst [vmem:[#allocation3 + $0x2a0] sm:$0x3] %v706_v40  ;;  %v1474_v52 = vunpack.c.l.bf16 %v3478_v49  ;;  %v1602_v53 = vunpack.c.l.bf16 %v3486_v50  ;;  %v3494_v54 = vld [vmem:[%s4291_s0 + $0x14] sm:$0x1] }
  0x3e   :  { %837 = vst [vmem:[#allocation3 + $0x260] sm:$0x3] %v834_v41  ;;  %965 = vst [vmem:[#allocation3 + $0x220] sm:$0x3] %v962_v45  ;;  %v1730_v55 = vunpack.c.l.bf16 %v3494_v54  ;;  %v2457_v56 = vld [vmem:[#allocation3 + $0x2a8] sm:$0x2]  }
  0x3f   :  { %1093 = vst [vmem:[#allocation3 + $0x1e0] sm:$0x3] %v1090_v46  ;;  %1221 = vst [vmem:[#allocation3 + $0x1a0] sm:$0x3] %v1218_v47  ;;  %v2461_v57 = vld [vmem:[#allocation3 + $0x327] sm:$0x4]  }
  0x40   :  { %1349 = vst [vmem:[#allocation3 + $0x160] sm:$0x3] %v1346_v51  ;;  %1477 = vst [vmem:[#allocation3 + $0x120] sm:$0x3] %v1474_v52  ;;  %v2455_v58 = vld [vmem:[#allocation3 + $0x229] sm:$0x1]  }
  0x41   :  { %1605 = vst [vmem:[#allocation3 + $0xe0] sm:$0x3] %v1602_v53  ;;  %v2465_v59 = vld [vmem:[#allocation3 + $0x3a6] sm:$0x8]   ;;  %1733 = vst [vmem:[#allocation3 + $0xa0] sm:$0x3] %v1730_v55  ;;  %v2459_v63 = vsel %vm2053_vm0, %v2457_v56, %v2455_v58 }
  0x42   :  { %v2473_v60 = vld [vmem:[#allocation3 + $0x2e4] sm:$0x20]   ;;  %v2463_v5 = vsel %vm2057_vm1, %v2461_v57, %v2459_v63  ;;  %v2492_v10 = vld [vmem:[#allocation3 + $0x28] sm:$0x1]   ;;  %v3502_v42 = vld [vmem:[%s4291_s0 + $0xc] sm:$0x1] }
  0x43   :  { %v2425_v61 = vld [vmem:[#allocation3 + $0x127] sm:$0x4]   ;;  %v2467_v9 = vsel %vm2061_vm2, %v2465_v59, %v2463_v5  ;;  %v2494_v11 = vld [vmem:[#allocation3 + $0xa7] sm:$0x2]   ;;  %v3510_v43 = vld [vmem:[%s4291_s0 + $0x4] sm:$0x1]  ;;  %v1858_v48 = vunpack.c.l.bf16 %v3502_v42 }
  0x44   :  { %v2429_v62 = vld [vmem:[#allocation3 + $0x1a6] sm:$0x8]   ;;  %v2496_v15 = vsel %vm2053_vm0, %v2494_v11, %v2492_v10  ;;  %v2498_v16 = vld [vmem:[#allocation3 + $0x126] sm:$0x4]   ;;  %v1986_v52 = vunpack.c.l.bf16 %v3510_v43  ;;  %v2603_v56 = vld [vmem:[#allocation3 + $0x2a0] sm:$0x2]  }
  0x45   :  { %v2469_v0 = vld [vmem:[#allocation3 + $0x265] sm:$0x10]   ;;  %v2502_v17 = vld [vmem:[#allocation3 + $0x1a5] sm:$0x8]   ;;  %v2500_v23 = vsel %vm2057_vm1, %v2498_v16, %v2496_v15  ;;  %v2601_v53 = vld [vmem:[#allocation3 + $0x221] sm:$0x1]  }
  0x46   :  { %v2477_v1 = vld [vmem:[#allocation3 + $0x363] sm:$0x40]   ;;  %v2471_v14 = vsel %vm2065_vm3, %v2469_v0, %v2467_v9  ;;  %v2506_v18 = vld [vmem:[#allocation3 + $0x64] sm:$0x10]   ;;  %v2504_v28 = vsel %vm2061_vm2, %v2502_v17, %v2500_v23  ;;  %1861 = vst [vmem:[#allocation3 + $0x60] sm:$0x3] %v1858_v48 }
  0x47   :  { %v2419_v2 = vld [vmem:[#allocation3 + $0x29] sm:$0x1]   ;;  %v2538_v19 = vld [vmem:[#allocation3 + $0x3a5] sm:$0x8]   ;;  %v2475_v22 = vsel %vm2069_vm4, %v2473_v60, %v2471_v14  ;;  %v2508_v34 = vsel %vm2065_vm3, %v2506_v18, %v2504_v28  ;;  %v2607_v57 = vld [vmem:[#allocation3 + $0x31f] sm:$0x4]   ;;  %v2605_v60 = vsel %vm2053_vm0, %v2603_v56, %v2601_v53 }
  0x48   :  { %v2421_v3 = vld [vmem:[#allocation3 + $0xa8] sm:$0x2]   ;;  %v2510_v24 = vld [vmem:[#allocation3 + $0xe3] sm:$0x20]   ;;  %v2479_v27 = vsel %vm2073_vm5, %v2477_v1, %v2475_v22  ;;  %v2611_v58 = vld [vmem:[#allocation3 + $0x39e] sm:$0x8]   ;;  %v2609_v63 = vsel %vm2057_vm1, %v2607_v57, %v2605_v60 }
  0x49   :  { %v2433_v4 = vld [vmem:[#allocation3 + $0x65] sm:$0x10]   ;;  %v2423_v7 = vsel %vm2053_vm0, %v2421_v3, %v2419_v2  ;;  %v2514_v25 = vld [vmem:[#allocation3 + $0x162] sm:$0x40]   ;;  %v2512_v39 = vsel %vm2069_vm4, %v2510_v24, %v2508_v34  ;;  %1989 = vst [vmem:[#allocation3 + $0x20] sm:$0x3] %v1986_v52  ;;  %v2613_v2 = vsel %vm2061_vm2, %v2611_v58, %v2609_v63 }
  0x4a   :  { %v2481_v6 = vld [vmem:[#allocation3 + $0x3e2] sm:$0x80]   ;;  %v2427_v12 = vsel %vm2057_vm1, %v2425_v61, %v2423_v7  ;;  %v2528_v29 = vld [vmem:[#allocation3 + $0x228] sm:$0x1]   ;;  %v2516_v45 = vsel %vm2073_vm5, %v2514_v25, %v2512_v39  ;;  %v2615_v61 = vld [vmem:[#allocation3 + $0x25d] sm:$0x10]  }
  0x4b   :  { %v2437_v8 = vld [vmem:[#allocation3 + $0xe4] sm:$0x20]   ;;  %v2431_v20 = vsel %vm2061_vm2, %v2429_v62, %v2427_v12  ;;  %v2530_v30 = vld [vmem:[#allocation3 + $0x2a7] sm:$0x2]   ;;  %v2483_v33 = vsel %vm2077_vm6, %v2481_v6, %v2479_v27  ;;  %v2619_v0 = vld [vmem:[#allocation3 + $0x2dc] sm:$0x20]   ;;  %v2617_v5 = vsel %vm2065_vm3, %v2615_v61, %v2613_v2 }
  0x4c   :  { %v2445_v13 = vld [vmem:[#allocation3 + $0x1e2] sm:$0x80]   ;;  %v2435_v26 = vsel %vm2065_vm3, %v2433_v4, %v2431_v20  ;;  %v2534_v31 = vld [vmem:[#allocation3 + $0x326] sm:$0x4]   ;;  %v2532_v36 = vsel %vm2053_vm0, %v2530_v30, %v2528_v29  ;;  %v2623_v3 = vld [vmem:[#allocation3 + $0x35b] sm:$0x40]   ;;  %v2621_v10 = vsel %vm2069_vm4, %v2619_v0, %v2617_v5 }
  0x4d   :  { %v2441_v21 = vld [vmem:[#allocation3 + $0x163] sm:$0x40]   ;;  %v2439_v32 = vsel %vm2069_vm4, %v2437_v8, %v2435_v26  ;;  %v2518_v35 = vld [vmem:[#allocation3 + $0x1e1] sm:$0x80]   ;;  %v2536_v40 = vsel %vm2057_vm1, %v2534_v31, %v2532_v36  ;;  %v2567_v4 = vld [vmem:[#allocation3 + $0xa0] sm:$0x2]   ;;  %v2625_v16 = vsel %vm2073_vm5, %v2623_v3, %v2621_v10 }
  0x4e   :  { %v2542_v37 = vld [vmem:[#allocation3 + $0x264] sm:$0x10]   ;;  %v2443_v38 = vsel %vm2073_vm5, %v2441_v21, %v2439_v32  ;;  %v2540_v46 = vsel %vm2061_vm2, %v2538_v19, %v2536_v40  ;;  %v2520_v54 = vsel %vm2077_vm6, %v2518_v35, %v2516_v45  ;;  %v2627_v6 = vld [vmem:[#allocation3 + $0x3da] sm:$0x80]   ;;  %v2640_v7 = vld [vmem:[#allocation3 + $0x9f] sm:$0x2]  }
  0x4f   :  { %v2546_v41 = vld [vmem:[#allocation3 + $0x2e3] sm:$0x20]   ;;  %v2447_v44 = vsel %vm2077_vm6, %v2445_v13, %v2443_v38  ;;  %v2544_v50 = vsel %vm2065_vm3, %v2542_v37, %v2540_v46  ;;  %v2674_v8 = vld [vmem:[#allocation3 + $0x220] sm:$0x1]   ;;  %s3635_s23 = smov 80   ;;  %v3942_v28 = vsel %vm2077_vm6, %v2627_v6, %v2625_v16  ;;  %s3636_s20 = smov 72  }
  0x50   :  { %v2550_v47 = vld [vmem:[#allocation3 + $0x362] sm:$0x40]   ;;  %v3551_v49 = vpack.i.bf16 %v2483_v33, %v2447_v44  ;;  %v2548_v55 = vsel %vm2069_vm4, %v2546_v41, %v2544_v50  ;;  %v2571_v9 = vld [vmem:[#allocation3 + $0x11f] sm:$0x4]   ;;  %v2644_v11 = vld [vmem:[#allocation3 + $0x11e] sm:$0x4]  }
  0x51   :  { %v2554_v51 = vld [vmem:[#allocation3 + $0x3e1] sm:$0x80]   ;;  %v2552_v59 = vsel %vm2073_vm5, %v2550_v47, %v2548_v55  ;;  %v2676_v12 = vld [vmem:[#allocation3 + $0x29f] sm:$0x2]   ;;  %v2575_v15 = vld [vmem:[#allocation3 + $0x19e] sm:$0x8]  }
  0x52   :  { %3552 = vrot.lane.b32.xlu0 %v3551_v49, %s3634_s22  ;;  %v2556_v62 = vsel %vm2077_vm6, %v2554_v51, %v2552_v59  ;;  %v2680_v13 = vld [vmem:[#allocation3 + $0x31e] sm:$0x4]   ;;  %v2678_v18 = vsel %vm2053_vm0, %v2676_v12, %v2674_v8  ;;  %v2579_v22 = vld [vmem:[#allocation3 + $0x5d] sm:$0x10]   ;;  %v3391_v32 = vld [vmem:[%s4291_s0 + $0x7b] sm:$0x1] }
  0x53   :  { %v3556_v1 = vpack.i.bf16 %v2556_v62, %v2520_v54  ;;  %v2684_v14 = vld [vmem:[#allocation3 + $0x39d] sm:$0x8]   ;;  %v2682_v24 = vsel %vm2057_vm1, %v2680_v13, %v2678_v18  ;;  %v2565_v26 = vld [vmem:[#allocation3 + $0x21] sm:$0x1]   ;;  %v82_v38 = vunpack.c.l.bf16 %v3391_v32  ;;  %v3399_v39 = vld [vmem:[%s4291_s0 + $0x73] sm:$0x1] }
  0x54   :  { %v2648_v17 = vld [vmem:[#allocation3 + $0x19d] sm:$0x8]   ;;  %v2583_v27 = vld [vmem:[#allocation3 + $0xdc] sm:$0x20]   ;;  %v2686_v31 = vsel %vm2061_vm2, %v2684_v14, %v2682_v24  ;;  %v2569_v33 = vsel %vm2053_vm0, %v2567_v4, %v2565_v26  ;;  %v3407_v40 = vld [vmem:[%s4291_s0 + $0x6b] sm:$0x1]  ;;  %v210_v47 = vunpack.c.l.bf16 %v3399_v39 }
  0x55   :  { %3557 = vrot.lane.b32.xlu1 %v3556_v1, %s3635_s23  ;;  %v2688_v19 = vld [vmem:[#allocation3 + $0x25c] sm:$0x10]   ;;  %v2587_v34 = vld [vmem:[#allocation3 + $0x15b] sm:$0x40]   ;;  %v3415_v41 = vld [vmem:[%s4291_s0 + $0x63] sm:$0x1]  ;;  %v2573_v42 = vsel %vm2057_vm1, %v2571_v9, %v2569_v33  ;;  %v338_v53 = vunpack.c.l.bf16 %v3407_v40 }
  0x56   :  { %v2692_v20 = vld [vmem:[#allocation3 + $0x2db] sm:$0x20]   ;;  %v2690_v37 = vsel %vm2065_vm3, %v2688_v19, %v2686_v31  ;;  %v2591_v43 = vld [vmem:[#allocation3 + $0x1da] sm:$0x80]   ;;  %v3423_v48 = vld [vmem:[%s4291_s0 + $0x5b] sm:$0x1]  ;;  %v2577_v50 = vsel %vm2061_vm2, %v2575_v15, %v2573_v42  ;;  %v466_v60 = vunpack.c.l.bf16 %v3415_v41 }
  0x57   :  { %v2696_v21 = vld [vmem:[#allocation3 + $0x35a] sm:$0x40]   ;;  %v2694_v46 = vsel %vm2069_vm4, %v2692_v20, %v2690_v37  ;;  %v3431_v49 = vld [vmem:[%s4291_s0 + $0x53] sm:$0x1]  ;;  %85 = vst [vmem:[#allocation3 + $0x3d8] sm:$0x3] %v82_v38  ;;  %v2581_v57 = vsel %vm2065_vm3, %v2579_v22, %v2577_v50  ;;  %v594_v2 = vunpack.c.l.bf16 %v3423_v48 }
  0x58   :  { %v2652_v23 = vld [vmem:[#allocation3 + $0x5c] sm:$0x10]   ;;  %v2698_v52 = vsel %vm2073_vm5, %v2696_v21, %v2694_v46  ;;  %v3439_v54 = vld [vmem:[%s4291_s0 + $0x4b] sm:$0x1]  ;;  %v3447_v55 = vld [vmem:[%s4291_s0 + $0x43] sm:$0x1]  ;;  %v2585_v0 = vsel %vm2069_vm4, %v2583_v27, %v2581_v57  ;;  %v722_v3 = vunpack.c.l.bf16 %v3431_v49 }
  0x59   :  { %v2700_v25 = vld [vmem:[#allocation3 + $0x3d9] sm:$0x80]   ;;  %v3455_v56 = vld [vmem:[%s4291_s0 + $0x3b] sm:$0x1]  ;;  %213 = vst [vmem:[#allocation3 + $0x398] sm:$0x3] %v210_v47  ;;  %v850_v9 = vunpack.c.l.bf16 %v3439_v54  ;;  %v978_v10 = vunpack.c.l.bf16 %v3447_v55 }
  0x5a   :  { %v2638_v29 = vld [vmem:[#allocation3 + $0x20] sm:$0x1]   ;;  %v2702_v59 = vsel %vm2077_vm6, %v2700_v25, %v2698_v52  ;;  %v3463_v61 = vld [vmem:[%s4291_s0 + $0x33] sm:$0x1]  ;;  %v3471_v62 = vld [vmem:[%s4291_s0 + $0x2b] sm:$0x1]  ;;  %v1106_v16 = vunpack.c.l.bf16 %v3455_v56 }
  0x5b   :  { %v2656_v30 = vld [vmem:[#allocation3 + $0xdb] sm:$0x20]   ;;  %v2642_v35 = vsel %vm2053_vm0, %v2640_v7, %v2638_v29  ;;  %v3479_v63 = vld [vmem:[%s4291_s0 + $0x23] sm:$0x1]  ;;  %341 = vst [vmem:[#allocation3 + $0x358] sm:$0x3] %v338_v53  ;;  %v2589_v7 = vsel %vm2073_vm5, %v2587_v34, %v2585_v0 }
  0x5c   :  { %v2660_v36 = vld [vmem:[#allocation3 + $0x15a] sm:$0x40]   ;;  %v2646_v44 = vsel %vm2057_vm1, %v2644_v11, %v2642_v35  ;;  %v3487_v4 = vld [vmem:[%s4291_s0 + $0x1b] sm:$0x1]  ;;  %v3495_v5 = vld [vmem:[%s4291_s0 + $0x13] sm:$0x1]  ;;  %v2593_v14 = vsel %vm2077_vm6, %v2591_v43, %v2589_v7  ;;  %v1490_v24 = vunpack.c.l.bf16 %v3479_v63 }
  0x5d   :  { %v2664_v45 = vld [vmem:[#allocation3 + $0x1d9] sm:$0x80]   ;;  %v2650_v51 = vsel %vm2061_vm2, %v2648_v17, %v2646_v44  ;;  %v3503_v6 = vld [vmem:[%s4291_s0 + $0xb] sm:$0x1]  ;;  %469 = vst [vmem:[#allocation3 + $0x318] sm:$0x3] %v466_v60  ;;  %v1234_v17 = vunpack.c.l.bf16 %v3463_v61  ;;  %v3561_v21 = vpack.i.bf16 %v3942_v28, %v2593_v14  ;;  %v1618_v28 = vunpack.c.l.bf16 %v3487_v4 }
  0x5e   :  { %v2654_v58 = vsel %vm2065_vm3, %v2652_v23, %v2650_v51  ;;  %v3511_v11 = vld [vmem:[%s4291_s0 + $0x3] sm:$0x1]  ;;  %v3392_v12 = vld [vmem:[%s4291_s0 + $0x7a] sm:$0x1]  ;;  %v3400_v13 = vld [vmem:[%s4291_s0 + $0x72] sm:$0x1]  ;;  %v1362_v23 = vunpack.c.l.bf16 %v3471_v62  ;;  %v1746_v29 = vunpack.c.l.bf16 %v3495_v5 }
  0x5f   :  { %v2658_v1 = vsel %vm2069_vm4, %v2656_v30, %v2654_v58  ;;  %597 = vst [vmem:[#allocation3 + $0x2d8] sm:$0x3] %v594_v2  ;;  %725 = vst [vmem:[#allocation3 + $0x298] sm:$0x3] %v722_v3  ;;  %v3408_v18 = vld [vmem:[%s4291_s0 + $0x6a] sm:$0x1]  ;;  %v1874_v30 = vunpack.c.l.bf16 %v3503_v6  ;;  %v2002_v31 = vunpack.c.l.bf16 %v3511_v11  ;;  %3562 = vrot.lane.b32.xlu0 %v3561_v21, %s3636_s20  ;;  %v98_v35 = vunpack.c.l.bf16 %v3392_v12 }
  0x60   :  { %v2662_v8 = vsel %vm2073_vm5, %v2660_v36, %v2658_v1  ;;  %v3416_v19 = vld [vmem:[%s4291_s0 + $0x62] sm:$0x1]  ;;  %v3424_v20 = vld [vmem:[%s4291_s0 + $0x5a] sm:$0x1]  ;;  %853 = vst [vmem:[#allocation3 + $0x258] sm:$0x3] %v850_v9  ;;  %v226_v36 = vunpack.c.l.bf16 %v3400_v13  ;;  %v354_v37 = vunpack.c.l.bf16 %v3408_v18 }
  0x61   :  { %v2666_v15 = vsel %vm2077_vm6, %v2664_v45, %v2662_v8  ;;  %981 = vst [vmem:[#allocation3 + $0x218] sm:$0x3] %v978_v10  ;;  %v3432_v25 = vld [vmem:[%s4291_s0 + $0x52] sm:$0x1]  ;;  %v3440_v26 = vld [vmem:[%s4291_s0 + $0x4a] sm:$0x1]  ;;  %v482_v38 = vunpack.c.l.bf16 %v3416_v19  ;;  %v610_v40 = vunpack.c.l.bf16 %v3424_v20 }
  0x62   :  { %v3566_v22 = vpack.i.bf16 %v2702_v59, %v2666_v15  ;;  %v3448_v27 = vld [vmem:[%s4291_s0 + $0x42] sm:$0x1]  ;;  %1109 = vst [vmem:[#allocation3 + $0x1d8] sm:$0x3] %v1106_v16  ;;  %1237 = vst [vmem:[#allocation3 + $0x198] sm:$0x3] %v1234_v17  ;;  %v738_v41 = vunpack.c.l.bf16 %v3432_v25  ;;  %v866_v42 = vunpack.c.l.bf16 %v3440_v26 }
  0x63   :  { %v3456_v32 = vld [vmem:[%s4291_s0 + $0x3a] sm:$0x1]  ;;  %v3464_v33 = vld [vmem:[%s4291_s0 + $0x32] sm:$0x1]  ;;  %v3472_v34 = vld [vmem:[%s4291_s0 + $0x2a] sm:$0x1]  ;;  %v994_v43 = vunpack.c.l.bf16 %v3448_v27 }
  0x64   :  { %s3637_s21 = smov 64   ;;  %1365 = vst [vmem:[#allocation3 + $0x158] sm:$0x3] %v1362_v23  ;;  %1493 = vst [vmem:[#allocation3 + $0x118] sm:$0x3] %v1490_v24  ;;  %v1122_v45 = vunpack.c.l.bf16 %v3456_v32  ;;  %v1250_v46 = vunpack.c.l.bf16 %v3464_v33  ;;  %v1378_v47 = vunpack.c.l.bf16 %v3472_v34  ;;  %s3638_s3 = smov 56  }
  0x65   :  { %3567 = vrot.lane.b32.xlu1 %v3566_v22, %s3637_s21  ;;  %v3480_v39 = vld [vmem:[%s4291_s0 + $0x22] sm:$0x1]  ;;  %1621 = vst [vmem:[#allocation3 + $0xd8] sm:$0x3] %v1618_v28  ;;  %1749 = vst [vmem:[#allocation3 + $0x98] sm:$0x3] %v1746_v29 }
  0x66   :  { %1877 = vst [vmem:[#allocation3 + $0x58] sm:$0x3] %v1874_v30  ;;  %2005 = vst [vmem:[#allocation3 + $0x18] sm:$0x3] %v2002_v31  ;;  %v3488_v44 = vld [vmem:[%s4291_s0 + $0x1a] sm:$0x1]  ;;  %v1506_v48 = vunpack.c.l.bf16 %v3480_v39 }
  0x67   :  { %101 = vst [vmem:[#allocation3 + $0x3d0] sm:$0x3] %v98_v35  ;;  %229 = vst [vmem:[#allocation3 + $0x390] sm:$0x3] %v226_v36  ;;  %v3496_v49 = vld [vmem:[%s4291_s0 + $0x12] sm:$0x1]  ;;  %v1634_v52 = vunpack.c.l.bf16 %v3488_v44 }
  0x68   :  { %357 = vst [vmem:[#allocation3 + $0x350] sm:$0x3] %v354_v37  ;;  %485 = vst [vmem:[#allocation3 + $0x310] sm:$0x3] %v482_v38  ;;  %v2753_v50 = vld [vmem:[#allocation3 + $0x317] sm:$0x4]   ;;  %v1762_v53 = vunpack.c.l.bf16 %v3496_v49 }
  0x69   :  { %v2757_v51 = vld [vmem:[#allocation3 + $0x396] sm:$0x8]   ;;  %613 = vst [vmem:[#allocation3 + $0x2d0] sm:$0x3] %v610_v40  ;;  %741 = vst [vmem:[#allocation3 + $0x290] sm:$0x3] %v738_v41 }
  0x6a   :  { %869 = vst [vmem:[#allocation3 + $0x250] sm:$0x3] %v866_v42  ;;  %997 = vst [vmem:[#allocation3 + $0x210] sm:$0x3] %v994_v43  ;;  %v3504_v54 = vld [vmem:[%s4291_s0 + $0xa] sm:$0x1] }
  0x6b   :  { %v2749_v55 = vld [vmem:[#allocation3 + $0x298] sm:$0x2]   ;;  %v2822_v56 = vld [vmem:[#allocation3 + $0x297] sm:$0x2]   ;;  %1125 = vst [vmem:[#allocation3 + $0x1d0] sm:$0x3] %v1122_v45  ;;  %v1890_v58 = vunpack.c.l.bf16 %v3504_v54 }
  0x6c   :  { %v2826_v57 = vld [vmem:[#allocation3 + $0x316] sm:$0x4]   ;;  %1253 = vst [vmem:[#allocation3 + $0x190] sm:$0x3] %v1250_v46  ;;  %1381 = vst [vmem:[#allocation3 + $0x150] sm:$0x3] %v1378_v47 }
  0x6d   :  { %1509 = vst [vmem:[#allocation3 + $0x110] sm:$0x3] %v1506_v48  ;;  %v2747_v59 = vld [vmem:[#allocation3 + $0x219] sm:$0x1]   ;;  %v2820_v60 = vld [vmem:[#allocation3 + $0x218] sm:$0x1]  }
  0x6e   :  { %v2830_v61 = vld [vmem:[#allocation3 + $0x395] sm:$0x8]   ;;  %1637 = vst [vmem:[#allocation3 + $0xd0] sm:$0x3] %v1634_v52  ;;  %1765 = vst [vmem:[#allocation3 + $0x90] sm:$0x3] %v1762_v53  ;;  %v2751_v62 = vsel %vm2053_vm0, %v2749_v55, %v2747_v59  ;;  %v2824_v2 = vsel %vm2053_vm0, %v2822_v56, %v2820_v60 }
  0x6f   :  { %v2761_v63 = vld [vmem:[#allocation3 + $0x255] sm:$0x10]   ;;  %1893 = vst [vmem:[#allocation3 + $0x50] sm:$0x3] %v1890_v58  ;;  %v2755_v5 = vsel %vm2057_vm1, %v2753_v50, %v2751_v62  ;;  %v2794_v7 = vld [vmem:[#allocation3 + $0x195] sm:$0x8]   ;;  %v2828_v8 = vsel %vm2057_vm1, %v2826_v57, %v2824_v2 }
  0x70   :  { %v2765_v0 = vld [vmem:[#allocation3 + $0x2d4] sm:$0x20]   ;;  %v2759_v11 = vsel %vm2061_vm2, %v2757_v51, %v2755_v5  ;;  %v2790_v12 = vld [vmem:[#allocation3 + $0x116] sm:$0x4]   ;;  %v2832_v18 = vsel %vm2061_vm2, %v2830_v61, %v2828_v8  ;;  %v3512_v39 = vld [vmem:[%s4291_s0 + $0x2] sm:$0x1] }
  0x71   :  { %v2769_v1 = vld [vmem:[#allocation3 + $0x353] sm:$0x40]   ;;  %v2763_v15 = vsel %vm2065_vm3, %v2761_v63, %v2759_v11  ;;  %v2784_v16 = vld [vmem:[#allocation3 + $0x18] sm:$0x1]   ;;  %v2018_v44 = vunpack.c.l.bf16 %v3512_v39  ;;  %v2893_v48 = vld [vmem:[#allocation3 + $0x211] sm:$0x1]  }
  0x72   :  { %v2717_v3 = vld [vmem:[#allocation3 + $0x117] sm:$0x4]   ;;  %v2786_v17 = vld [vmem:[#allocation3 + $0x97] sm:$0x2]   ;;  %v2767_v23 = vsel %vm2069_vm4, %v2765_v0, %v2763_v15  ;;  %v2895_v52 = vld [vmem:[#allocation3 + $0x290] sm:$0x2]  }
  0x73   :  { %v2721_v4 = vld [vmem:[#allocation3 + $0x196] sm:$0x8]   ;;  %v2842_v19 = vld [vmem:[#allocation3 + $0x352] sm:$0x40]   ;;  %v2788_v24 = vsel %vm2053_vm0, %v2786_v17, %v2784_v16  ;;  %v2771_v28 = vsel %vm2073_vm5, %v2769_v1, %v2767_v23  ;;  %2021 = vst [vmem:[#allocation3 + $0x10] sm:$0x3] %v2018_v44  ;;  %v2897_v57 = vsel %vm2053_vm0, %v2895_v52, %v2893_v48 }
  0x74   :  { %v2773_v6 = vld [vmem:[#allocation3 + $0x3d2] sm:$0x80]   ;;  %v2798_v25 = vld [vmem:[#allocation3 + $0x54] sm:$0x10]   ;;  %v2792_v29 = vsel %vm2057_vm1, %v2790_v12, %v2788_v24  ;;  %v2899_v53 = vld [vmem:[#allocation3 + $0x30f] sm:$0x4]  }
  0x75   :  { %v2711_v9 = vld [vmem:[#allocation3 + $0x19] sm:$0x1]   ;;  %v2846_v26 = vld [vmem:[#allocation3 + $0x3d1] sm:$0x80]   ;;  %v2775_v35 = vsel %vm2077_vm6, %v2773_v6, %v2771_v28  ;;  %v2796_v36 = vsel %vm2061_vm2, %v2794_v7, %v2792_v29  ;;  %v2903_v54 = vld [vmem:[#allocation3 + $0x38e] sm:$0x8]   ;;  %v2901_v60 = vsel %vm2057_vm1, %v2899_v53, %v2897_v57 }
  0x76   :  { %v2713_v10 = vld [vmem:[#allocation3 + $0x98] sm:$0x2]   ;;  %v2802_v30 = vld [vmem:[#allocation3 + $0xd3] sm:$0x20]   ;;  %v2800_v41 = vsel %vm2065_vm3, %v2798_v25, %v2796_v36  ;;  %v2907_v58 = vld [vmem:[#allocation3 + $0x24d] sm:$0x10]   ;;  %v2905_v63 = vsel %vm2061_vm2, %v2903_v54, %v2901_v60 }
  0x77   :  { %v2715_v13 = vsel %vm2053_vm0, %v2713_v10, %v2711_v9  ;;  %v2725_v14 = vld [vmem:[#allocation3 + $0x55] sm:$0x10]   ;;  %v2834_v31 = vld [vmem:[#allocation3 + $0x254] sm:$0x10]   ;;  %v2804_v46 = vsel %vm2069_vm4, %v2802_v30, %v2800_v41  ;;  %v2911_v61 = vld [vmem:[#allocation3 + $0x2cc] sm:$0x20]   ;;  %v2909_v2 = vsel %vm2065_vm3, %v2907_v58, %v2905_v63 }
  0x78   :  { %v2719_v20 = vsel %vm2057_vm1, %v2717_v3, %v2715_v13  ;;  %v2729_v21 = vld [vmem:[#allocation3 + $0xd4] sm:$0x20]   ;;  %v2838_v32 = vld [vmem:[#allocation3 + $0x2d3] sm:$0x20]   ;;  %v2836_v38 = vsel %vm2065_vm3, %v2834_v31, %v2832_v18  ;;  %v2859_v62 = vld [vmem:[#allocation3 + $0x90] sm:$0x2]   ;;  %v2913_v7 = vsel %vm2069_vm4, %v2911_v61, %v2909_v2 }
  0x79   :  { %v2733_v22 = vld [vmem:[#allocation3 + $0x153] sm:$0x40]   ;;  %v2723_v27 = vsel %vm2061_vm2, %v2721_v4, %v2719_v20  ;;  %v2806_v37 = vld [vmem:[#allocation3 + $0x152] sm:$0x40]   ;;  %v2840_v43 = vsel %vm2069_vm4, %v2838_v32, %v2836_v38  ;;  %v2915_v0 = vld [vmem:[#allocation3 + $0x34b] sm:$0x40]  }
  0x7a   :  { %v2727_v33 = vsel %vm2065_vm3, %v2725_v14, %v2723_v27  ;;  %v2737_v34 = vld [vmem:[#allocation3 + $0x1d2] sm:$0x80]   ;;  %v2810_v42 = vld [vmem:[#allocation3 + $0x1d1] sm:$0x80]   ;;  %v2844_v47 = vsel %vm2073_vm5, %v2842_v19, %v2840_v43  ;;  %v2808_v50 = vsel %vm2073_vm5, %v2806_v37, %v2804_v46  ;;  %s3639_s4 = smov 48   ;;  %v2917_v13 = vsel %vm2073_vm5, %v2915_v0, %v2913_v7  ;;  %s3640_s26 = smov 40  }
  0x7b   :  { %v2731_v40 = vsel %vm2069_vm4, %v2729_v21, %v2727_v33  ;;  %v2848_v51 = vsel %vm2077_vm6, %v2846_v26, %v2844_v47  ;;  %v2812_v56 = vsel %vm2077_vm6, %v2810_v42, %v2808_v50  ;;  %v2863_v1 = vld [vmem:[#allocation3 + $0x10f] sm:$0x4]   ;;  %v2932_v4 = vld [vmem:[#allocation3 + $0x8f] sm:$0x2]   ;;  %v3401_v32 = vld [vmem:[%s4291_s0 + $0x71] sm:$0x1] }
  0x7c   :  { %v2735_v45 = vsel %vm2073_vm5, %v2733_v22, %v2731_v40  ;;  %v3576_v59 = vpack.i.bf16 %v2848_v51, %v2812_v56  ;;  %v2919_v3 = vld [vmem:[#allocation3 + $0x3ca] sm:$0x80]   ;;  %v2936_v5 = vld [vmem:[#allocation3 + $0x10e] sm:$0x4]   ;;  %v3409_v40 = vld [vmem:[%s4291_s0 + $0x69] sm:$0x1] }
  0x7d   :  { %v2739_v49 = vsel %vm2077_vm6, %v2737_v34, %v2735_v45  ;;  %v2867_v6 = vld [vmem:[#allocation3 + $0x18e] sm:$0x8]   ;;  %v2940_v8 = vld [vmem:[#allocation3 + $0x18d] sm:$0x8]   ;;  %v4098_v26 = vsel %vm2077_vm6, %v2919_v3, %v2917_v13  ;;  %v3417_v41 = vld [vmem:[%s4291_s0 + $0x61] sm:$0x1]  ;;  %v242_v45 = vunpack.c.l.bf16 %v3401_v32  ;;  %v370_v52 = vunpack.c.l.bf16 %v3409_v40 }
  0x7e   :  { %v3571_v55 = vpack.i.bf16 %v2775_v35, %v2739_v49  ;;  %3577 = vrot.lane.b32.xlu1 %v3576_v59, %s3639_s4  ;;  %v2966_v9 = vld [vmem:[#allocation3 + $0x210] sm:$0x1]   ;;  %v2871_v12 = vld [vmem:[#allocation3 + $0x4d] sm:$0x10]   ;;  %v3433_v47 = vld [vmem:[%s4291_s0 + $0x51] sm:$0x1]  ;;  %v498_v59 = vunpack.c.l.bf16 %v3417_v41 }
  0x7f   :  { %v2968_v10 = vld [vmem:[#allocation3 + $0x28f] sm:$0x2]   ;;  %v2857_v18 = vld [vmem:[#allocation3 + $0x11] sm:$0x1]   ;;  %v3441_v48 = vld [vmem:[%s4291_s0 + $0x49] sm:$0x1]  ;;  %v754_v2 = vunpack.c.l.bf16 %v3433_v47 }
  0x80   :  { %3572 = vrot.lane.b32.xlu0 %v3571_v55, %s3638_s3  ;;  %v2972_v11 = vld [vmem:[#allocation3 + $0x30e] sm:$0x4]   ;;  %v2970_v15 = vsel %vm2053_vm0, %v2968_v10, %v2966_v9  ;;  %v2875_v19 = vld [vmem:[#allocation3 + $0xcc] sm:$0x20]   ;;  %v2861_v24 = vsel %vm2053_vm0, %v2859_v62, %v2857_v18  ;;  %v3449_v53 = vld [vmem:[%s4291_s0 + $0x41] sm:$0x1] }
  0x81   :  { %v2944_v14 = vld [vmem:[#allocation3 + $0x4c] sm:$0x10]   ;;  %v2974_v22 = vsel %vm2057_vm1, %v2972_v11, %v2970_v15  ;;  %v2879_v25 = vld [vmem:[#allocation3 + $0x14b] sm:$0x40]   ;;  %v2865_v33 = vsel %vm2057_vm1, %v2863_v1, %v2861_v24  ;;  %v3465_v55 = vld [vmem:[%s4291_s0 + $0x31] sm:$0x1]  ;;  %v1010_v9 = vunpack.c.l.bf16 %v3449_v53 }
  0x82   :  { %v2976_v16 = vld [vmem:[#allocation3 + $0x38d] sm:$0x8]   ;;  %v3393_v31 = vld [vmem:[%s4291_s0 + $0x79] sm:$0x1]  ;;  %v2869_v42 = vsel %vm2061_vm2, %v2867_v6, %v2865_v33  ;;  %245 = vst [vmem:[#allocation3 + $0x388] sm:$0x3] %v242_v45 }
  0x83   :  { %v2980_v17 = vld [vmem:[#allocation3 + $0x24c] sm:$0x10]   ;;  %v2978_v29 = vsel %vm2061_vm2, %v2976_v16, %v2974_v22  ;;  %v2883_v34 = vld [vmem:[#allocation3 + $0x1ca] sm:$0x80]   ;;  %v114_v39 = vunpack.c.l.bf16 %v3393_v31  ;;  %v2873_v49 = vsel %vm2065_vm3, %v2871_v12, %v2869_v42  ;;  %v3473_v60 = vld [vmem:[%s4291_s0 + $0x29] sm:$0x1]  ;;  %v1266_v16 = vunpack.c.l.bf16 %v3465_v55 }
  0x84   :  { %v2930_v20 = vld [vmem:[#allocation3 + $0x10] sm:$0x1]   ;;  %v2982_v37 = vsel %vm2065_vm3, %v2980_v17, %v2978_v29  ;;  %v3425_v46 = vld [vmem:[%s4291_s0 + $0x59] sm:$0x1]  ;;  %v2877_v56 = vsel %vm2069_vm4, %v2875_v19, %v2873_v49  ;;  %v3481_v61 = vld [vmem:[%s4291_s0 + $0x21] sm:$0x1] }
  0x85   :  { %v2948_v21 = vld [vmem:[#allocation3 + $0xcb] sm:$0x20]   ;;  %v2934_v27 = vsel %vm2053_vm0, %v2932_v4, %v2930_v20  ;;  %117 = vst [vmem:[#allocation3 + $0x3c8] sm:$0x3] %v114_v39  ;;  %v3457_v54 = vld [vmem:[%s4291_s0 + $0x39] sm:$0x1]  ;;  %v2881_v63 = vsel %vm2073_vm5, %v2879_v25, %v2877_v56  ;;  %v626_v1 = vunpack.c.l.bf16 %v3425_v46  ;;  %v1394_v20 = vunpack.c.l.bf16 %v3473_v60 }
  0x86   :  { %v2984_v23 = vld [vmem:[#allocation3 + $0x2cb] sm:$0x20]   ;;  %v2938_v35 = vsel %vm2057_vm1, %v2936_v5, %v2934_v27  ;;  %v3489_v62 = vld [vmem:[%s4291_s0 + $0x19] sm:$0x1]  ;;  %373 = vst [vmem:[#allocation3 + $0x348] sm:$0x3] %v370_v52  ;;  %v2885_v6 = vsel %vm2077_vm6, %v2883_v34, %v2881_v63  ;;  %v1138_v15 = vunpack.c.l.bf16 %v3457_v54 }
  0x87   :  { %v2952_v28 = vld [vmem:[#allocation3 + $0x14a] sm:$0x40]   ;;  %v2942_v43 = vsel %vm2061_vm2, %v2940_v8, %v2938_v35  ;;  %v2986_v44 = vsel %vm2069_vm4, %v2984_v23, %v2982_v37  ;;  %v3497_v3 = vld [vmem:[%s4291_s0 + $0x11] sm:$0x1]  ;;  %v3505_v4 = vld [vmem:[%s4291_s0 + $0x9] sm:$0x1]  ;;  %v882_v8 = vunpack.c.l.bf16 %v3441_v48  ;;  %v3581_v13 = vpack.i.bf16 %v4098_v26, %v2885_v6 }
  0x88   :  { %v2988_v30 = vld [vmem:[#allocation3 + $0x34a] sm:$0x40]   ;;  %v2946_v50 = vsel %vm2065_vm3, %v2944_v14, %v2942_v43  ;;  %v3513_v5 = vld [vmem:[%s4291_s0 + $0x1] sm:$0x1]  ;;  %501 = vst [vmem:[#allocation3 + $0x308] sm:$0x3] %v498_v59  ;;  %v1650_v22 = vunpack.c.l.bf16 %v3489_v62  ;;  %v1778_v23 = vunpack.c.l.bf16 %v3497_v3  ;;  %v1906_v27 = vunpack.c.l.bf16 %v3505_v4 }
  0x89   :  { %v2956_v36 = vld [vmem:[#allocation3 + $0x1c9] sm:$0x80]   ;;  %v2990_v51 = vsel %vm2073_vm5, %v2988_v30, %v2986_v44  ;;  %v2950_v57 = vsel %vm2069_vm4, %v2948_v21, %v2946_v50  ;;  %v3402_v11 = vld [vmem:[%s4291_s0 + $0x70] sm:$0x1]  ;;  %v3410_v12 = vld [vmem:[%s4291_s0 + $0x68] sm:$0x1]  ;;  %v1522_v21 = vunpack.c.l.bf16 %v3481_v61  ;;  %3582 = vrot.lane.b32.xlu0 %v3581_v13, %s3640_s26 }
  0x8a   :  { %v2992_v38 = vld [vmem:[#allocation3 + $0x3c9] sm:$0x80]   ;;  %v2954_v0 = vsel %vm2073_vm5, %v2952_v28, %v2950_v57  ;;  %629 = vst [vmem:[#allocation3 + $0x2c8] sm:$0x3] %v626_v1  ;;  %757 = vst [vmem:[#allocation3 + $0x288] sm:$0x3] %v754_v2  ;;  %v2033_v28 = vunpack.c.l.bf16 %v3513_v5  ;;  %v258_v30 = vunpack.c.l.bf16 %v3402_v11  ;;  %v386_v33 = vunpack.c.l.bf16 %v3410_v12 }
  0x8b   :  { %v2994_v58 = vsel %vm2077_vm6, %v2992_v38, %v2990_v51  ;;  %v2958_v7 = vsel %vm2077_vm6, %v2956_v36, %v2954_v0  ;;  %v3394_v10 = vld [vmem:[%s4291_s0 + $0x78] sm:$0x1]  ;;  %v3418_v17 = vld [vmem:[%s4291_s0 + $0x60] sm:$0x1]  ;;  %v3434_v19 = vld [vmem:[%s4291_s0 + $0x50] sm:$0x1] }
  0x8c   :  { %v3586_v14 = vpack.i.bf16 %v2994_v58, %v2958_v7  ;;  %v3426_v18 = vld [vmem:[%s4291_s0 + $0x58] sm:$0x1]  ;;  %885 = vst [vmem:[#allocation3 + $0x248] sm:$0x3] %v882_v8  ;;  %1013 = vst [vmem:[#allocation3 + $0x208] sm:$0x3] %v1010_v9  ;;  %v130_v29 = vunpack.c.l.bf16 %v3394_v10  ;;  %v514_v34 = vunpack.c.l.bf16 %v3418_v17  ;;  %v770_v36 = vunpack.c.l.bf16 %v3434_v19 }
  0x8d   :  { %v3442_v24 = vld [vmem:[%s4291_s0 + $0x48] sm:$0x1]  ;;  %v3450_v25 = vld [vmem:[%s4291_s0 + $0x40] sm:$0x1]  ;;  %v3458_v26 = vld [vmem:[%s4291_s0 + $0x38] sm:$0x1]  ;;  %v642_v35 = vunpack.c.l.bf16 %v3426_v18 }
  0x8e   :  { %s3641_s27 = smov 32   ;;  %1141 = vst [vmem:[#allocation3 + $0x1c8] sm:$0x3] %v1138_v15  ;;  %1269 = vst [vmem:[#allocation3 + $0x188] sm:$0x3] %v1266_v16  ;;  %v898_v38 = vunpack.c.l.bf16 %v3442_v24  ;;  %v1026_v39 = vunpack.c.l.bf16 %v3450_v25  ;;  %v1154_v40 = vunpack.c.l.bf16 %v3458_v26  ;;  %s3643_s13 = smov 16  }
  0x8f   :  { %3587 = vrot.lane.b32.xlu1 %v3586_v14, %s3641_s27  ;;  %v3466_v31 = vld [vmem:[%s4291_s0 + $0x30] sm:$0x1]  ;;  %v3474_v32 = vld [vmem:[%s4291_s0 + $0x28] sm:$0x1]  ;;  %1397 = vst [vmem:[#allocation3 + $0x148] sm:$0x3] %v1394_v20 }
  0x90   :  { %1525 = vst [vmem:[#allocation3 + $0x108] sm:$0x3] %v1522_v21  ;;  %1653 = vst [vmem:[#allocation3 + $0xc8] sm:$0x3] %v1650_v22  ;;  %v3482_v37 = vld [vmem:[%s4291_s0 + $0x20] sm:$0x1]  ;;  %v1282_v41 = vunpack.c.l.bf16 %v3466_v31  ;;  %v1410_v43 = vunpack.c.l.bf16 %v3474_v32 }
  0x91   :  { %1781 = vst [vmem:[#allocation3 + $0x88] sm:$0x3] %v1778_v23  ;;  %1909 = vst [vmem:[#allocation3 + $0x48] sm:$0x3] %v1906_v27  ;;  %v3490_v42 = vld [vmem:[%s4291_s0 + $0x18] sm:$0x1]  ;;  %v1538_v44 = vunpack.c.l.bf16 %v3482_v37 }
  0x92   :  { %2036 = vst [vmem:[#allocation3 + $0x8] sm:$0x3] %v2033_v28  ;;  %133 = vst [vmem:[#allocation3 + $0x3c0] sm:$0x3] %v130_v29  ;;  %v1666_v45 = vunpack.c.l.bf16 %v3490_v42  ;;  %v3498_v46 = vld [vmem:[%s4291_s0 + $0x10] sm:$0x1] }
  0x93   :  { %261 = vst [vmem:[#allocation3 + $0x380] sm:$0x3] %v258_v30  ;;  %389 = vst [vmem:[#allocation3 + $0x340] sm:$0x3] %v386_v33  ;;  %v3045_v47 = vld [vmem:[#allocation3 + $0x307] sm:$0x4]   ;;  %v1794_v49 = vunpack.c.l.bf16 %v3498_v46 }
  0x94   :  { %517 = vst [vmem:[#allocation3 + $0x300] sm:$0x3] %v514_v34  ;;  %645 = vst [vmem:[#allocation3 + $0x2c0] sm:$0x3] %v642_v35  ;;  %v3049_v48 = vld [vmem:[#allocation3 + $0x386] sm:$0x8]  }
  0x95   :  { %773 = vst [vmem:[#allocation3 + $0x280] sm:$0x3] %v770_v36  ;;  %901 = vst [vmem:[#allocation3 + $0x240] sm:$0x3] %v898_v38  ;;  %v3506_v50 = vld [vmem:[%s4291_s0 + $0x8] sm:$0x1] }
  0x96   :  { %1029 = vst [vmem:[#allocation3 + $0x200] sm:$0x3] %v1026_v39  ;;  %1157 = vst [vmem:[#allocation3 + $0x1c0] sm:$0x3] %v1154_v40  ;;  %v3041_v51 = vld [vmem:[#allocation3 + $0x288] sm:$0x2]   ;;  %v1922_v54 = vunpack.c.l.bf16 %v3506_v50 }
  0x97   :  { %1285 = vst [vmem:[#allocation3 + $0x180] sm:$0x3] %v1282_v41  ;;  %v3114_v52 = vld [vmem:[#allocation3 + $0x287] sm:$0x2]   ;;  %1413 = vst [vmem:[#allocation3 + $0x140] sm:$0x3] %v1410_v43 }
  0x98   :  { %v3118_v53 = vld [vmem:[#allocation3 + $0x306] sm:$0x4]   ;;  %1541 = vst [vmem:[#allocation3 + $0x100] sm:$0x3] %v1538_v44  ;;  %1669 = vst [vmem:[#allocation3 + $0xc0] sm:$0x3] %v1666_v45 }
  0x99   :  { %v3039_v55 = vld [vmem:[#allocation3 + $0x209] sm:$0x1]   ;;  %v3112_v56 = vld [vmem:[#allocation3 + $0x208] sm:$0x1]   ;;  %1797 = vst [vmem:[#allocation3 + $0x80] sm:$0x3] %v1794_v49 }
  0x9a   :  { %v3122_v57 = vld [vmem:[#allocation3 + $0x385] sm:$0x8]   ;;  %v3043_v58 = vsel %vm2053_vm0, %v3041_v51, %v3039_v55  ;;  %v3053_v59 = vld [vmem:[#allocation3 + $0x245] sm:$0x10]   ;;  %v3116_v62 = vsel %vm2053_vm0, %v3114_v52, %v3112_v56  ;;  %1925 = vst [vmem:[#allocation3 + $0x40] sm:$0x3] %v1922_v54 }
  0x9b   :  { %v3057_v60 = vld [vmem:[#allocation3 + $0x2c4] sm:$0x20]   ;;  %v3047_v2 = vsel %vm2057_vm1, %v3045_v47, %v3043_v58  ;;  %v3120_v4 = vsel %vm2057_vm1, %v3118_v53, %v3116_v62  ;;  %v3086_v8 = vld [vmem:[#allocation3 + $0x185] sm:$0x8]   ;;  %v2046_v35 = vld [vmem:[%s4291_s0] sm:$0x1] }
  0x9c   :  { %v3061_v61 = vld [vmem:[#allocation3 + $0x343] sm:$0x40]   ;;  %v3051_v7 = vsel %vm2061_vm2, %v3049_v48, %v3047_v2  ;;  %v3076_v11 = vld [vmem:[#allocation3 + $0x8] sm:$0x1]   ;;  %v3124_v14 = vsel %vm2061_vm2, %v3122_v57, %v3120_v4  ;;  %v2047_v40 = vunpack.c.l.bf16 %v2046_v35  ;;  %v2090_v48 = vld [vmem:[#allocation3 + $0x23f] sm:$0x2]  }
  0x9d   :  { %v3005_v63 = vld [vmem:[#allocation3 + $0x88] sm:$0x2]   ;;  %v3055_v10 = vsel %vm2065_vm3, %v3053_v59, %v3051_v7  ;;  %v3078_v12 = vld [vmem:[#allocation3 + $0x87] sm:$0x2]   ;;  %v2088_v44 = vld [vmem:[#allocation3 + $0x200] sm:$0x1]  }
  0x9e   :  { %v3009_v0 = vld [vmem:[#allocation3 + $0x107] sm:$0x4]   ;;  %v3082_v13 = vld [vmem:[#allocation3 + $0x106] sm:$0x4]   ;;  %v3059_v19 = vsel %vm2069_vm4, %v3057_v60, %v3055_v10  ;;  %v3080_v20 = vsel %vm2053_vm0, %v3078_v12, %v3076_v11  ;;  %2049 = vst [vmem:[#allocation3] sm:$0x3] %v2047_v40  ;;  %v2092_v53 = vsel %vm2053_vm0, %v2090_v48, %v2088_v44 }
  0x9f   :  { %v3013_v1 = vld [vmem:[#allocation3 + $0x186] sm:$0x8]   ;;  %v3134_v15 = vld [vmem:[#allocation3 + $0x342] sm:$0x40]   ;;  %v3063_v24 = vsel %vm2073_vm5, %v3061_v61, %v3059_v19  ;;  %v3084_v25 = vsel %vm2057_vm1, %v3082_v13, %v3080_v20  ;;  %v2094_v49 = vld [vmem:[#allocation3 + $0x27e] sm:$0x4]  }
  0xa0   :  { %v3065_v3 = vld [vmem:[#allocation3 + $0x3c2] sm:$0x80]   ;;  %v3090_v21 = vld [vmem:[#allocation3 + $0x44] sm:$0x10]   ;;  %v3088_v32 = vsel %vm2061_vm2, %v3086_v8, %v3084_v25  ;;  %v2098_v50 = vld [vmem:[#allocation3 + $0x2bd] sm:$0x8]   ;;  %v2096_v56 = vsel %vm2057_vm1, %v2094_v49, %v2092_v53 }
  0xa1   :  { %v3003_v5 = vld [vmem:[#allocation3 + $0x9] sm:$0x1]   ;;  %v3138_v22 = vld [vmem:[#allocation3 + $0x3c1] sm:$0x80]   ;;  %v3067_v31 = vsel %vm2077_vm6, %v3065_v3, %v3063_v24  ;;  %v3092_v37 = vsel %vm2065_vm3, %v3090_v21, %v3088_v32  ;;  %v2102_v54 = vld [vmem:[#allocation3 + $0x2fc] sm:$0x10]   ;;  %v2100_v59 = vsel %vm2061_vm2, %v2098_v50, %v2096_v56 }
  0xa2   :  { %v3017_v6 = vld [vmem:[#allocation3 + $0x45] sm:$0x10]   ;;  %v3007_v9 = vsel %vm2053_vm0, %v3005_v63, %v3003_v5  ;;  %v3094_v26 = vld [vmem:[#allocation3 + $0xc3] sm:$0x20]   ;;  %v2106_v57 = vld [vmem:[#allocation3 + $0x33b] sm:$0x20]   ;;  %v2104_v63 = vsel %vm2065_vm3, %v2102_v54, %v2100_v59 }
  0xa3   :  { %v3011_v16 = vsel %vm2057_vm1, %v3009_v0, %v3007_v9  ;;  %v3021_v17 = vld [vmem:[#allocation3 + $0xc4] sm:$0x20]   ;;  %v3126_v27 = vld [vmem:[#allocation3 + $0x244] sm:$0x10]   ;;  %v3096_v42 = vsel %vm2069_vm4, %v3094_v26, %v3092_v37  ;;  %s3642_s0 = smov 24   ;;  %v2108_v4 = vsel %vm2069_vm4, %v2106_v57, %v2104_v63 }
  0xa4   :  { %v3025_v18 = vld [vmem:[#allocation3 + $0x143] sm:$0x40]   ;;  %v3015_v23 = vsel %vm2061_vm2, %v3013_v1, %v3011_v16  ;;  %v3130_v28 = vld [vmem:[#allocation3 + $0x2c3] sm:$0x20]   ;;  %v3128_v34 = vsel %vm2065_vm3, %v3126_v27, %v3124_v14  ;;  %v2052_v58 = vld [vmem:[#allocation3 + $0x3f] sm:$0x2]  }
  0xa5   :  { %v3019_v29 = vsel %vm2065_vm3, %v3017_v6, %v3015_v23  ;;  %v3029_v30 = vld [vmem:[#allocation3 + $0x1c2] sm:$0x80]   ;;  %v3098_v33 = vld [vmem:[#allocation3 + $0x142] sm:$0x40]   ;;  %v3132_v39 = vsel %vm2069_vm4, %v3130_v28, %v3128_v34  ;;  %v2110_v60 = vld [vmem:[#allocation3 + $0x37a] sm:$0x40]  }
  0xa6   :  { %v3023_v36 = vsel %vm2069_vm4, %v3021_v17, %v3019_v29  ;;  %v3102_v38 = vld [vmem:[#allocation3 + $0x1c1] sm:$0x80]   ;;  %v3136_v43 = vsel %vm2073_vm5, %v3134_v15, %v3132_v39  ;;  %v3100_v46 = vsel %vm2073_vm5, %v3098_v33, %v3096_v42  ;;  %v3151_v61 = vld [vmem:[#allocation3 + $0x80] sm:$0x2]   ;;  %v2056_v62 = vld [vmem:[#allocation3 + $0x7e] sm:$0x4]   ;;  %v2112_v9 = vsel %vm2073_vm5, %v2110_v60, %v2108_v4 }
  0xa7   :  { %v3027_v41 = vsel %vm2073_vm5, %v3025_v18, %v3023_v36  ;;  %v3140_v47 = vsel %vm2077_vm6, %v3138_v22, %v3136_v43  ;;  %v3104_v52 = vsel %vm2077_vm6, %v3102_v38, %v3100_v46  ;;  %v3155_v0 = vld [vmem:[#allocation3 + $0xff] sm:$0x4]   ;;  %v2060_v3 = vld [vmem:[#allocation3 + $0xbd] sm:$0x8]  }
  0xa8   :  { %v3031_v45 = vsel %vm2077_vm6, %v3029_v30, %v3027_v41  ;;  %v3596_v55 = vpack.i.bf16 %v3140_v47, %v3104_v52  ;;  %v3185_v1 = vld [vmem:[#allocation3 + $0x201] sm:$0x1]   ;;  %v2050_v14 = vld [vmem:[#allocation3] sm:$0x1]  }
  0xa9   :  { %v3591_v51 = vpack.i.bf16 %v3067_v31, %v3031_v45  ;;  %v3187_v2 = vld [vmem:[#allocation3 + $0x280] sm:$0x2]   ;;  %v2114_v17 = vld [vmem:[#allocation3 + $0x3b9] sm:$0x80]   ;;  %v2054_v18 = vsel %vm2053_vm0, %v2052_v58, %v2050_v14 }
  0xaa   :  { %3597 = vrot.lane.b32.xlu1 %v3596_v55, %s3643_s13  ;;  %v3189_v5 = vsel %vm2053_vm0, %v3187_v2, %v3185_v1  ;;  %v3191_v6 = vld [vmem:[#allocation3 + $0x2ff] sm:$0x4]   ;;  %v2064_v19 = vld [vmem:[#allocation3 + $0xfc] sm:$0x10]   ;;  %v2116_v23 = vsel %vm2077_vm6, %v2114_v17, %v2112_v9 }
  0xab   :  { %3592 = vrot.lane.b32.xlu0 %v3591_v51, %s3642_s0  ;;  %v3195_v7 = vld [vmem:[#allocation3 + $0x37e] sm:$0x8]   ;;  %v3193_v11 = vsel %vm2057_vm1, %v3191_v6, %v3189_v5 }
  0xac   :  { %v3199_v8 = vld [vmem:[#allocation3 + $0x23d] sm:$0x10]   ;;  %v3197_v16 = vsel %vm2061_vm2, %v3195_v7, %v3193_v11 }
  0xad   :  { %v3159_v10 = vld [vmem:[#allocation3 + $0x17e] sm:$0x8]   ;;  %v3201_v22 = vsel %vm2065_vm3, %v3199_v8, %v3197_v16 }
  0xae   :  { %v3203_v12 = vld [vmem:[#allocation3 + $0x2bc] sm:$0x20]  }
  0xaf   :  { %v3207_v13 = vld [vmem:[#allocation3 + $0x33b] sm:$0x40]  }
  0xb0   :  { %v3149_v15 = vld [vmem:[#allocation3 + $0x1] sm:$0x1]  }
  0xb1   :  { %v3153_v20 = vsel %vm2053_vm0, %v3151_v61, %v3149_v15  ;;  %v3163_v21 = vld [vmem:[#allocation3 + $0x3d] sm:$0x10]  }
  0xb2   :  { %2 = vsyncpa [#allocation1], 0  ;;  %v2058_v24 = vsel %vm2057_vm1, %v2056_v62, %v2054_v18  ;;  %v2068_v25 = vld [vmem:[#allocation3 + $0x13b] sm:$0x20]   ;;  %v3157_v26 = vsel %vm2057_vm1, %v3155_v0, %v3153_v20  ;;  %v3167_v27 = vld [vmem:[#allocation3 + $0xbc] sm:$0x20]   ;;  %v3205_v28 = vsel %vm2069_vm4, %v3203_v12, %v3201_v22  ;;  %v3533_v47 = vpop.permute.xlu0 %3532  ;;  %v3543_v53 = vpop.permute.xlu1 %3542 }
  0xb3   :  { %v3211_v29 = vld [vmem:[#allocation3 + $0x3ba] sm:$0x80]   ;;  %v2062_v30 = vsel %vm2061_vm2, %v2060_v3, %v2058_v24  ;;  %v2072_v31 = vld [vmem:[#allocation3 + $0x17a] sm:$0x40]   ;;  %v3161_v32 = vsel %vm2061_vm2, %v3159_v10, %v3157_v26  ;;  %v3209_v34 = vsel %vm2073_vm5, %v3207_v13, %v3205_v28  ;;  %vm2079_vm7 = vcmask 64512   ;;  %s3644_s14 = smov 8  }
  0xb4   :  { %v3171_v33 = vld [vmem:[#allocation3 + $0x13b] sm:$0x40]   ;;  %v2066_v35 = vsel %vm2065_vm3, %v2064_v19, %v2062_v30  ;;  %v2076_v36 = vld [vmem:[#allocation3 + $0x1b9] sm:$0x80]   ;;  %v3165_v37 = vsel %vm2065_vm3, %v3163_v21, %v3161_v32  ;;  %v3213_v41 = vsel %vm2077_vm6, %v3211_v29, %v3209_v34  ;;  %vm2158_vm8 = vcmask 1048512   ;;  %s3645_s15 = smov [#allocation0]  }
  0xb5   :  { %v3175_v38 = vld [vmem:[#allocation3 + $0x1ba] sm:$0x80]   ;;  %2119 = vst.msk [vmem:[#allocation2 + $0x10] ss:$8 sm:$0x3] %vm2079_vm7, %v2116_v23   ;;  %v2070_v39 = vsel %vm2069_vm4, %v2068_v25, %v2066_v35  ;;  %v3169_v40 = vsel %vm2069_vm4, %v3167_v27, %v3165_v37  ;;  %v3535_v48 = vunpack.i.h.bf16 %v3533_v47  ;;  %v3534_v49 = vunpack.i.l.bf16 %v3533_v47  ;;  %s3253_s16 = sshll.u32 %s3645_s15, 4  ;;  %s3254_s16 = int_to_ptr.vmem [resolvable:$true] %s3253_s16 }
  0xb6   :  { %2121 = vst.msk [vmem:[#allocation2 + $0x1] ss:$8 sm:$0xc] %vm2079_vm7, %v2116_v23   ;;  %2123 = vst.msk [vmem:[#allocation2 - $0xe] ss:$8 sm:$0x30] %vm2079_vm7, %v2116_v23   ;;  %v2074_v42 = vsel %vm2073_vm5, %v2072_v31, %v2070_v39  ;;  %v3173_v43 = vsel %vm2073_vm5, %v3171_v33, %v3169_v40  ;;  %v3538_v50 = vpop.permute.xlu0 %3537  ;;  %v3545_v54 = vunpack.i.h.bf16 %v3543_v53  ;;  %v3544_v55 = vunpack.i.l.bf16 %v3543_v53  ;;  %v3548_v56 = vpop.permute.xlu1 %3547  ;;  %p3611_p1 = scmp.lt.s32.totalorder %s3254_s16, %s3254_s16 }
  0xb7   :  { %2125 = vst.msk [vmem:[#allocation2 - $0x1d] ss:$8 sm:$0xc0] %vm2079_vm7, %v2116_v23   ;;  %v2078_v44 = vsel %vm2077_vm6, %v2076_v36, %v2074_v42  ;;  %v3177_v45 = vsel %vm2077_vm6, %v3175_v38, %v3173_v43  ;;  %vm2231_vm9 = vcmask 982912   ;;  %v3540_v51 = vunpack.i.h.bf16 %v3538_v50  ;;  %s3606_s17 = scalar_lea.vmem %s3254_s16, 128 }
  0xb8   :  { %v3601_v46 = vpack.i.bf16 %v3213_v41, %v3177_v45  ;;  %2080 = vst.msk [vmem:[#allocation2] ss:$8 sm:$0x3] %vm2079_vm7, %v2078_v44   ;;  %2082 = vst.msk [vmem:[#allocation2 - $0xf] ss:$8 sm:$0xc] %vm2079_vm7, %v2078_v44   ;;  %v3539_v52 = vunpack.i.l.bf16 %v3538_v50  ;;  %v3550_v57 = vunpack.i.h.bf16 %v3548_v56  ;;  %v3549_v58 = vunpack.i.l.bf16 %v3548_v56  ;;  %p3607_p0 = scmp.ne.s32.totalorder %s3254_s16, %s3606_s17  ;;  %p3612_p2 = scmp.lt.s32.totalorder %s3606_s17, %s3606_s17 }
  0xb9   :  { %2084 = vst.msk [vmem:[#allocation2 - $0x1e] ss:$8 sm:$0x30] %vm2079_vm7, %v2078_v44   ;;  %2086 = vst.msk [vmem:[#allocation2 - $0x2d] ss:$8 sm:$0xc0] %vm2079_vm7, %v2078_v44  }
  0xba   :  { %3602 = vrot.lane.b32.xlu0 %v3601_v46, %s3644_s14  ;;  %2159 = vst.msk [vmem:[#allocation2] sm:$0xf] %vm2158_vm8, %v3534_v49   ;;  %2161 = vst.msk [vmem:[#allocation2 + $0x4] sm:$0xf0] %vm2158_vm8, %v3534_v49   ;;  %vm2304_vm10 = vcmask 917312   ;;  %vm2377_vm11 = vcmask 851712   ;;  %p3613_p3 = por %p3612_p2, %p3611_p1 }
  0xbb   :  { %2196 = vst.msk [vmem:[#allocation2 + $0x10] sm:$0xf] %vm2158_vm8, %v3535_v48   ;;  %2198 = vst.msk [vmem:[#allocation2 + $0x14] sm:$0xf0] %vm2158_vm8, %v3535_v48   ;;  %vm2450_vm12 = vcmask 786112   ;;  %vm2523_vm13 = vcmask 720512  }
  0xbc   :  { %2232 = vst.msk [vmem:[#allocation2] sm:$0xf] %vm2231_vm9, %v3539_v52   ;;  %2234 = vst.msk [vmem:[#allocation2 + $0x4] sm:$0xf0] %vm2231_vm9, %v3539_v52   ;;  %vm2596_vm14 = vcmask 654912   ;;  %vm2669_vm15 = vcmask 589312   ;;  %p3614_p4 = pnand %p3613_p3, %p3607_p0 }
  0xbd   :  { %2269 = vst.msk [vmem:[#allocation2 + $0x10] sm:$0xf] %vm2231_vm9, %v3540_v51   ;;  %2271 = vst.msk [vmem:[#allocation2 + $0x14] sm:$0xf0] %vm2231_vm9, %v3540_v51   ;;  %vm2742_vm0 = vcmask 523712   ;;  %vm2815_vm1 = vcmask 458112  }
  0xbe   :  { %2305 = vst.msk [vmem:[#allocation2] sm:$0xf] %vm2304_vm10, %v3544_v55   ;;  %2307 = vst.msk [vmem:[#allocation2 + $0x4] sm:$0xf0] %vm2304_vm10, %v3544_v55   ;;  %vm2888_vm2 = vcmask 392512   ;;  %vm2961_vm3 = vcmask 326912  }
  0xbf   :  { %2342 = vst.msk [vmem:[#allocation2 + $0x10] sm:$0xf] %vm2304_vm10, %v3545_v54   ;;  %2344 = vst.msk [vmem:[#allocation2 + $0x14] sm:$0xf0] %vm2304_vm10, %v3545_v54   ;;  %vm3034_vm4 = vcmask 261312   ;;  %vm3107_vm5 = vcmask 195712  }
  0xc0   :  { %2378 = vst.msk [vmem:[#allocation2] sm:$0xf] %vm2377_vm11, %v3549_v58   ;;  %2380 = vst.msk [vmem:[#allocation2 + $0x4] sm:$0xf0] %vm2377_vm11, %v3549_v58   ;;  %vm3180_vm6 = vcmask 130112   ;;  %v3646_v31 = vmov 0.0  }
  0xc1   :  { %2415 = vst.msk [vmem:[#allocation2 + $0x10] sm:$0xf] %vm2377_vm11, %v3550_v57   ;;  %2417 = vst.msk [vmem:[#allocation2 + $0x14] sm:$0xf0] %vm2377_vm11, %v3550_v57  }
  0xc4   :  { %v3553_v59 = vpop.permute.xlu0 %3552 }
  0xc5   :  { %v3555_v60 = vunpack.i.h.bf16 %v3553_v59  ;;  %v3554_v61 = vunpack.i.l.bf16 %v3553_v59 }
  0xc7   :  { %2451 = vst.msk [vmem:[#allocation2] sm:$0xf] %vm2450_vm12, %v3554_v61   ;;  %2453 = vst.msk [vmem:[#allocation2 + $0x4] sm:$0xf0] %vm2450_vm12, %v3554_v61   ;;  %v3558_v62 = vpop.permute.xlu1 %3557 }
  0xc8   :  { %2488 = vst.msk [vmem:[#allocation2 + $0x10] sm:$0xf] %vm2450_vm12, %v3555_v60   ;;  %2490 = vst.msk [vmem:[#allocation2 + $0x14] sm:$0xf0] %vm2450_vm12, %v3555_v60   ;;  %v3560_v63 = vunpack.i.h.bf16 %v3558_v62  ;;  %v3559_v0 = vunpack.i.l.bf16 %v3558_v62 }
  0xca   :  { %2524 = vst.msk [vmem:[#allocation2] sm:$0xf] %vm2523_vm13, %v3559_v0   ;;  %2526 = vst.msk [vmem:[#allocation2 + $0x4] sm:$0xf0] %vm2523_vm13, %v3559_v0  }
  0xcb   :  { %2561 = vst.msk [vmem:[#allocation2 + $0x10] sm:$0xf] %vm2523_vm13, %v3560_v63   ;;  %2563 = vst.msk [vmem:[#allocation2 + $0x14] sm:$0xf0] %vm2523_vm13, %v3560_v63  }
  0xd1   :  { %v3563_v1 = vpop.permute.xlu0 %3562 }
  0xd2   :  { %v3565_v3 = vunpack.i.h.bf16 %v3563_v1  ;;  %v3564_v4 = vunpack.i.l.bf16 %v3563_v1 }
  0xd4   :  { %2597 = vst.msk [vmem:[#allocation2] sm:$0xf] %vm2596_vm14, %v3564_v4   ;;  %2599 = vst.msk [vmem:[#allocation2 + $0x4] sm:$0xf0] %vm2596_vm14, %v3564_v4  }
  0xd5   :  { %2634 = vst.msk [vmem:[#allocation2 + $0x10] sm:$0xf] %vm2596_vm14, %v3565_v3   ;;  %2636 = vst.msk [vmem:[#allocation2 + $0x14] sm:$0xf0] %vm2596_vm14, %v3565_v3  }
  0xd7   :  { %v3568_v2 = vpop.permute.xlu1 %3567 }
  0xd8   :  { %v3570_v5 = vunpack.i.h.bf16 %v3568_v2  ;;  %v3569_v6 = vunpack.i.l.bf16 %v3568_v2 }
  0xda   :  { %2670 = vst.msk [vmem:[#allocation2] sm:$0xf] %vm2669_vm15, %v3569_v6   ;;  %2672 = vst.msk [vmem:[#allocation2 + $0x4] sm:$0xf0] %vm2669_vm15, %v3569_v6  }
  0xdb   :  { %2707 = vst.msk [vmem:[#allocation2 + $0x10] sm:$0xf] %vm2669_vm15, %v3570_v5   ;;  %2709 = vst.msk [vmem:[#allocation2 + $0x14] sm:$0xf0] %vm2669_vm15, %v3570_v5  }
  0xf0   :  { %v3578_v10 = vpop.permute.xlu1 %3577 }
  0xf1   :  { %v3580_v11 = vunpack.i.h.bf16 %v3578_v10  ;;  %v3579_v12 = vunpack.i.l.bf16 %v3578_v10 }
  0xf2   :  { %v3573_v7 = vpop.permute.xlu0 %3572 }
  0xf3   :  { %v3575_v8 = vunpack.i.h.bf16 %v3573_v7  ;;  %v3574_v9 = vunpack.i.l.bf16 %v3573_v7 }
  0xf5   :  { %2743 = vst.msk [vmem:[#allocation2] sm:$0xf] %vm2742_vm0, %v3574_v9   ;;  %2745 = vst.msk [vmem:[#allocation2 + $0x4] sm:$0xf0] %vm2742_vm0, %v3574_v9  }
  0xf6   :  { %2780 = vst.msk [vmem:[#allocation2 + $0x10] sm:$0xf] %vm2742_vm0, %v3575_v8   ;;  %2782 = vst.msk [vmem:[#allocation2 + $0x14] sm:$0xf0] %vm2742_vm0, %v3575_v8  }
  0xf7   :  { %2816 = vst.msk [vmem:[#allocation2] sm:$0xf] %vm2815_vm1, %v3579_v12   ;;  %2818 = vst.msk [vmem:[#allocation2 + $0x4] sm:$0xf0] %vm2815_vm1, %v3579_v12  }
  0xf8   :  { %2853 = vst.msk [vmem:[#allocation2 + $0x10] sm:$0xf] %vm2815_vm1, %v3580_v11   ;;  %2855 = vst.msk [vmem:[#allocation2 + $0x14] sm:$0xf0] %vm2815_vm1, %v3580_v11  }
  0xfb   :  { %v3583_v13 = vpop.permute.xlu0 %3582 }
  0xfc   :  { %v3585_v15 = vunpack.i.h.bf16 %v3583_v13  ;;  %v3584_v16 = vunpack.i.l.bf16 %v3583_v13 }
  0xfe   :  { %2889 = vst.msk [vmem:[#allocation2] sm:$0xf] %vm2888_vm2, %v3584_v16   ;;  %2891 = vst.msk [vmem:[#allocation2 + $0x4] sm:$0xf0] %vm2888_vm2, %v3584_v16  }
  0xff   :  { %2926 = vst.msk [vmem:[#allocation2 + $0x10] sm:$0xf] %vm2888_vm2, %v3585_v15   ;;  %2928 = vst.msk [vmem:[#allocation2 + $0x14] sm:$0xf0] %vm2888_vm2, %v3585_v15  }
 0x101   :  { %v3588_v14 = vpop.permute.xlu1 %3587 }
 0x102   :  { %v3590_v17 = vunpack.i.h.bf16 %v3588_v14  ;;  %v3589_v18 = vunpack.i.l.bf16 %v3588_v14 }
 0x104   :  { %2962 = vst.msk [vmem:[#allocation2] sm:$0xf] %vm2961_vm3, %v3589_v18   ;;  %2964 = vst.msk [vmem:[#allocation2 + $0x4] sm:$0xf0] %vm2961_vm3, %v3589_v18  }
 0x105   :  { %2999 = vst.msk [vmem:[#allocation2 + $0x10] sm:$0xf] %vm2961_vm3, %v3590_v17   ;;  %3001 = vst.msk [vmem:[#allocation2 + $0x14] sm:$0xf0] %vm2961_vm3, %v3590_v17  }
 0x11c   :  { %v3598_v22 = vpop.permute.xlu1 %3597 }
 0x11d   :  { %v3593_v19 = vpop.permute.xlu0 %3592  ;;  %v3600_v23 = vunpack.i.h.bf16 %v3598_v22  ;;  %v3599_v24 = vunpack.i.l.bf16 %v3598_v22 }
 0x11e   :  { %v3595_v20 = vunpack.i.h.bf16 %v3593_v19  ;;  %v3594_v21 = vunpack.i.l.bf16 %v3593_v19 }
 0x120   :  { %3035 = vst.msk [vmem:[#allocation2] sm:$0xf] %vm3034_vm4, %v3594_v21   ;;  %3037 = vst.msk [vmem:[#allocation2 + $0x4] sm:$0xf0] %vm3034_vm4, %v3594_v21  }
 0x121   :  { %3072 = vst.msk [vmem:[#allocation2 + $0x10] sm:$0xf] %vm3034_vm4, %v3595_v20   ;;  %3074 = vst.msk [vmem:[#allocation2 + $0x14] sm:$0xf0] %vm3034_vm4, %v3595_v20  }
 0x122   :  { %3108 = vst.msk [vmem:[#allocation2] sm:$0xf] %vm3107_vm5, %v3599_v24   ;;  %3110 = vst.msk [vmem:[#allocation2 + $0x4] sm:$0xf0] %vm3107_vm5, %v3599_v24  }
 0x123   :  { %3145 = vst.msk [vmem:[#allocation2 + $0x10] sm:$0xf] %vm3107_vm5, %v3600_v23   ;;  %3147 = vst.msk [vmem:[#allocation2 + $0x14] sm:$0xf0] %vm3107_vm5, %v3600_v23  }
 0x12c   :  { %v3603_v25 = vpop.permute.xlu0 %3602 }
 0x12d   :  { %v3605_v26 = vunpack.i.h.bf16 %v3603_v25  ;;  %v3604_v27 = vunpack.i.l.bf16 %v3603_v25 }
 0x12f   :  { %3181 = vst.msk [vmem:[#allocation2] sm:$0xf] %vm3180_vm6, %v3604_v27   ;;  %3183 = vst.msk [vmem:[#allocation2 + $0x4] sm:$0xf0] %vm3180_vm6, %v3604_v27  }
 0x130   :  { %3218 = vst.msk [vmem:[#allocation2 + $0x10] sm:$0xf] %vm3180_vm6, %v3605_v26   ;;  %3220 = vst.msk [vmem:[#allocation2 + $0x14] sm:$0xf0] %vm3180_vm6, %v3605_v26  }
 0x136   :  { %v3225_v28 = vld [vmem:[#allocation2] sm:$0xf]  ;;  %v3230_v29 = vld [vmem:[#allocation2 + $0x8] sm:$0xf] }
 0x137   :  { %v3236_v30 = vld [vmem:[#allocation2 + $0x10] sm:$0xf]  ;;  %v3226_v32 = vpack.c.bf16 %v3646_v31, %v3225_v28  ;;  %v3231_v33 = vpack.c.bf16 %v3646_v31, %v3230_v29  ;;  %v3243_v35 = vld [vmem:[#allocation2 + $0x18] sm:$0xf] }
 0x138   :  { %v3237_v34 = vpack.c.bf16 %v3646_v31, %v3236_v30  ;;  %v3244_v36 = vpack.c.bf16 %v3646_v31, %v3243_v35 }
 0x139   :  { %3228 = vst [vmem:[#allocation0] sm:$0x3] %v3226_v32  ;;  %3234 = vst [vmem:[#allocation0 + $0x2] sm:$0x3] %v3231_v33 }
 0x13a   :  { %3241 = vst [vmem:[#allocation0 + $0x4] sm:$0x3] %v3237_v34  ;;  %3248 = vst [vmem:[#allocation0 + $0x6] sm:$0x3] %v3244_v36 }
 0x13b   :  { %3617 = shalt.err (!%p3614_p4)
}
 0x13c   :  { %s3618_s20 = scalar_lea.hbm %s4292_s1, 128 }
 0x13d   :  { %p3619_p5 = scmp.ne.s32.totalorder %s4292_s1, %s3618_s20  ;;  %p3622_p6 = scmp.lt.u32.totalorder %s3618_s20, %s4292_s1 }
 0x13f   :  { %p3624_p7 = pnand %p3622_p6, %p3619_p5 }
 0x141   :  { %3627 = shalt.err (!%p3624_p7)
}
 0x142   :  { %3256 = dma.vmem_to_hbm [thread:$0]  %s3254_s16, 128, %s4292_s1, [#allocation1]  }
 0x143   :  { %3628 = dma.done.wait [#allocation1], 128  }
 0x144   :  { %3629 = vsyncadd [#allocation1], 4294967168 }
 0x145   :  { %3258 = vsyncpa [#allocation1], 1 }

// kernel: reverse.0
= control target key start
LH: loop header
LB: loop body
LE: loop exit
PB: predicated region body
PF: predicated region fallthrough
CT: control target
= control target key end

     0   :  { %v71_v3 = vlaneseq  ;;  %v64_v9 = vld [vmem:[#allocation0 + $0x7] ss:$-1 sm:$0xff]  ;;  %v78_v12 = vld [vmem:[#allocation0 + $0x17] ss:$-1 sm:$0xff]  ;;  %s329_s0 = inlined_call_operand.vmem [shape: f32[2,4,16,7], index: 0, kind: input, shape index: {}]   ;;  %s330_s1 = inlined_call_operand.vmem [shape: f32[2,4,16,7], index: 1, kind: output, shape index: {}]  }
   0x1   :  { %v44_v0 = vld [vmem:[%s329_s0] sm:$0xff]  ;;  %v46_v1 = vld [vmem:[%s329_s0 + $0x8] sm:$0xff]  ;;  %v48_v2 = vld [vmem:[%s329_s0 + $0x10] sm:$0xff]  ;;  %v65_v10 = vrot.slane %v64_v9, 1  ;;  %v79_v14 = vrot.slane %v78_v12, 1 }
   0x2   :  { %45 = vst [vmem:[#allocation0 + $0x8] sm:$0xff] %v44_v0  ;;  %47 = vst [vmem:[#allocation0 + $0x18] sm:$0xff] %v46_v1  ;;  %v50_v4 = vld [vmem:[%s329_s0 + $0x18] sm:$0xff]  ;;  %v52_v5 = vld [vmem:[%s329_s0 + $0x20] sm:$0xff]  ;;  %v72_v11 = vshrl.u32 %v71_v3, 7 }
   0x3   :  { %49 = vst [vmem:[#allocation0 + $0x28] sm:$0xff] %v48_v2  ;;  %v54_v6 = vld [vmem:[%s329_s0 + $0x28] sm:$0xff]  ;;  %51 = vst [vmem:[#allocation0 + $0x38] sm:$0xff] %v50_v4  ;;  %v56_v7 = vld [vmem:[%s329_s0 + $0x30] sm:$0xff] }
   0x4   :  { %53 = vst [vmem:[#allocation0 + $0x48] sm:$0xff] %v52_v5  ;;  %55 = vst [vmem:[#allocation0 + $0x58] sm:$0xff] %v54_v6  ;;  %v58_v8 = vld [vmem:[%s329_s0 + $0x38] sm:$0xff]  ;;  %v92_v13 = vld [vmem:[#allocation0 + $0x27] ss:$-1 sm:$0xff]  ;;  %vm73_vm0 = vcmp.lt.s32.totalorder %v72_v11, 7 }
   0x5   :  { %57 = vst [vmem:[#allocation0 + $0x68] sm:$0xff] %v56_v7  ;;  %59 = vst [vmem:[#allocation0 + $0x78] sm:$0xff] %v58_v8  ;;  %v93_v15 = vrot.slane %v92_v13, 1  ;;  %v106_v16 = vld [vmem:[#allocation0 + $0x37] ss:$-1 sm:$0xff] }
   0x6   :  { %66 = vst [vmem:[#allocation1] sm:$0xff] %v65_v10  ;;  %v107_v17 = vrot.slane %v106_v16, 1  ;;  %v120_v18 = vld [vmem:[#allocation0 + $0x47] ss:$-1 sm:$0xff]  ;;  %v134_v19 = vld [vmem:[#allocation0 + $0x57] ss:$-1 sm:$0xff] }
   0x7   :  { %80 = vst [vmem:[#allocation1 + $0x8] sm:$0xff] %v79_v14  ;;  %94 = vst [vmem:[#allocation1 + $0x10] sm:$0xff] %v93_v15  ;;  %v121_v20 = vrot.slane %v120_v18, 1  ;;  %v135_v21 = vrot.slane %v134_v19, 1  ;;  %v148_v22 = vld [vmem:[#allocation0 + $0x67] ss:$-1 sm:$0xff] }
   0x8   :  { %v162_v23 = vld [vmem:[#allocation0 + $0x77] ss:$-1 sm:$0xff]  ;;  %108 = vst [vmem:[#allocation1 + $0x18] sm:$0xff] %v107_v17  ;;  %v149_v24 = vrot.slane %v148_v22, 1 }
   0x9   :  { %v163_v25 = vrot.slane %v162_v23, 1  ;;  %v69_v26 = vld [vmem:[#allocation0 + $0xf] ss:$-1 sm:$0xff]  ;;  %v83_v27 = vld [vmem:[#allocation0 + $0x1f] ss:$-1 sm:$0xff]  ;;  %122 = vst [vmem:[#allocation1 + $0x20] sm:$0xff] %v121_v20 }
   0xa   :  { %v97_v28 = vld [vmem:[#allocation0 + $0x2f] ss:$-1 sm:$0xff]  ;;  %136 = vst [vmem:[#allocation1 + $0x28] sm:$0xff] %v135_v21  ;;  %v70_v29 = vrot.slane %v69_v26, 1  ;;  %v84_v30 = vrot.slane %v83_v27, 1  ;;  %150 = vst [vmem:[#allocation1 + $0x30] sm:$0xff] %v149_v24 }
   0xb   :  { %v98_v31 = vrot.slane %v97_v28, 1  ;;  %v111_v32 = vld [vmem:[#allocation0 + $0x3f] ss:$-1 sm:$0xff]  ;;  %164 = vst [vmem:[#allocation1 + $0x38] sm:$0xff] %v163_v25  ;;  %v125_v34 = vld [vmem:[#allocation0 + $0x4f] ss:$-1 sm:$0xff] }
   0xc   :  { %v112_v33 = vrot.slane %v111_v32, 1  ;;  %v139_v35 = vld [vmem:[#allocation0 + $0x5f] ss:$-1 sm:$0xff]  ;;  %74 = vst.msk [vmem:[#allocation1] sm:$0xff] %vm73_vm0, %v70_v29  ;;  %88 = vst.msk [vmem:[#allocation1 + $0x8] sm:$0xff] %vm73_vm0, %v84_v30  ;;  %v126_v36 = vrot.slane %v125_v34, 1 }
   0xd   :  { %102 = vst.msk [vmem:[#allocation1 + $0x10] sm:$0xff] %vm73_vm0, %v98_v31  ;;  %v140_v37 = vrot.slane %v139_v35, 1  ;;  %v153_v38 = vld [vmem:[#allocation0 + $0x6f] ss:$-1 sm:$0xff]  ;;  %v167_v39 = vld [vmem:[#allocation0 + $0x7f] ss:$-1 sm:$0xff] }
   0xe   :  { %116 = vst.msk [vmem:[#allocation1 + $0x18] sm:$0xff] %vm73_vm0, %v112_v33  ;;  %v154_v40 = vrot.slane %v153_v38, 1  ;;  %v168_v41 = vrot.slane %v167_v39, 1  ;;  %130 = vst.msk [vmem:[#allocation1 + $0x20] sm:$0xff] %vm73_vm0, %v126_v36 }
   0xf   :  { %144 = vst.msk [vmem:[#allocation1 + $0x28] sm:$0xff] %vm73_vm0, %v140_v37 }
  0x10   :  { %158 = vst.msk [vmem:[#allocation1 + $0x30] sm:$0xff] %vm73_vm0, %v154_v40  ;;  %172 = vst.msk [vmem:[#allocation1 + $0x38] sm:$0xff] %vm73_vm0, %v168_v41 }
  0x13   :  { %v214_v42 = vld [vmem:[#allocation1] sm:$0xff]  ;;  %v216_v43 = vld [vmem:[#allocation1 + $0x8] sm:$0xff] }
  0x14   :  { %v218_v44 = vld [vmem:[#allocation1 + $0x10] sm:$0xff]  ;;  %215 = vst [vmem:[%s330_s1] sm:$0xff] %v214_v42  ;;  %217 = vst [vmem:[%s330_s1 + $0x8] sm:$0xff] %v216_v43 }
  0x15   :  { %219 = vst [vmem:[%s330_s1 + $0x10] sm:$0xff] %v218_v44  ;;  %v220_v45 = vld [vmem:[#allocation1 + $0x18] sm:$0xff]  ;;  %v222_v46 = vld [vmem:[#allocation1 + $0x20] sm:$0xff] }
  0x16   :  { %221 = vst [vmem:[%s330_s1 + $0x18] sm:$0xff] %v220_v45  ;;  %v224_v47 = vld [vmem:[#allocation1 + $0x28] sm:$0xff]  ;;  %223 = vst [vmem:[%s330_s1 + $0x20] sm:$0xff] %v222_v46 }
  0x17   :  { %225 = vst [vmem:[%s330_s1 + $0x28] sm:$0xff] %v224_v47  ;;  %v226_v48 = vld [vmem:[#allocation1 + $0x30] sm:$0xff]  ;;  %v228_v49 = vld [vmem:[#allocation1 + $0x38] sm:$0xff] }
  0x18   :  { %227 = vst [vmem:[%s330_s1 + $0x30] sm:$0xff] %v226_v48  ;;  %229 = vst [vmem:[%s330_s1 + $0x38] sm:$0xff] %v228_v49 }

// kernel: fft_block.5
= control target key start
LH: loop header
LB: loop body
LE: loop exit
PB: predicated region body
PF: predicated region fallthrough
CT: control target
= control target key end

     0   :  { %9 = vsyncpa [#allocation3], 0  ;;  %s1090_s0 = inlined_call_operand.hbm [shape: bf16[2,8,256], index: 0, kind: input, shape index: {}]   ;;  %s1091_s1 = inlined_call_operand.hbm [shape: bf16[8,8], index: 1, kind: input, shape index: {}]   ;;  %s1092_s2 = inlined_call_operand.hbm [shape: f32[8,1], index: 2, kind: input, shape index: {}]   ;;  %s1093_s3 = inlined_call_operand.hbm [shape: f32[8,1], index: 3, kind: input, shape index: {}]   ;;  %s1094_s4 = inlined_call_operand.hbm [shape: bf16[2,8,256], index: 4, kind: output, shape index: {}]  }
   0x1   :  { %11 = vsyncpa [#allocation3 + $0x1], 0 }
   0x2   :  { %12 = vsyncpa [#allocation6], 0 }
   0x3   :  { %13 = vsyncpa [#allocation9], 0 }
   0x4   :  { %14 = vsyncpa [#allocation4], 0 }
   0x5   :  { %16 = vsyncpa [#allocation4 + $0x1], 0  ;;  %s835_s15 = smov 0   ;;  %s837_s16 = smov 0  }
   0x6   :  { %s839_s17 = smov 0   ;;  %s841_s18 = smov 0  }
   0x7 LB: > { %s856_s19 = sadd.s32 4294967295, %s801_s18   ;;  %s494_s20 = sadd.s32 4294967294, %s801_s18   ;;  %s801_s18 = sphi %s841_s18, %s1117_s18   ;;  %s797_s17 = sphi %s839_s17, %s1116_s17   ;;  %s793_s16 = sphi %s837_s16, %s1115_s16   ;;  %s789_s15 = sphi %s835_s15, %s1114_s15  }
   0x8   : > { %p42_p0 = scmp.ne.s32.totalorder %s793_s16, %s789_s15  ;;  %p1095_p1 = scmp.eq.s32.totalorder %s856_s19, 0 }
   0x9   : > { %p135_p3 = scmp.eq.s32.totalorder %s494_s20, 1  ;;  %p495_p5 = scmp.ge.s32.totalorder %s801_s18, 1 }
   0xa   : > { %p865_p4 = por %p1095_p1, %p42_p0  ;;  %p142_p7 = scmp.lt.s32.totalorder %s801_s18, 3 }
   0xb   : > { %p870_p6 = por %p135_p3, %p42_p0  ;;  %s803_s24 = smov [#allocation5]  }
   0xc   : > { %s1098_s21 = scalar_select %p865_p4, 1, 0 }
   0xd   : > { %s1099_s22 = scalar_select %p870_p6, 1, 0 }
   0xe   : > { %p875_p8 = pnand %p495_p5, %p142_p7  ;;  %s155_s25 = sshll.u32 %s803_s24, 4  ;;  %s156_s25 = int_to_ptr.vmem [resolvable:$true] %s155_s25 }
   0xf   : > { %s804_s26 = smov [#allocation7]   ;;  %s805_s29 = smov [#allocation8]  }
  0x10   : > { %s1100_s23 = scalar_select %p875_p8, 1, 0 }
  0x11   : > { %p544_p10 = pneg %p875_p8  ;;  %s166_s27 = sshll.u32 %s804_s26, 4  ;;  %s888_s27 = int_to_ptr.vmem [resolvable:$true] %s166_s27 }
  0x12   : > { %s177_s30 = sshll.u32 %s805_s29, 4  ;;  %s613_s7 = scalar_lea.hbm %s1091_s1, 64  ;;  %s890_s30 = int_to_ptr.vmem [resolvable:$true] %s177_s30 }
  0x13   : > { %p884_p11 = pnand %p544_p10, %p1095_p1  ;;  %p614_p12 = scmp.ne.s32.totalorder %s1091_s1, %s613_s7 }
  0x14   : > { %p620_p5 = scmp.lt.u32.totalorder %s613_s7, %s1091_s1 }
  0x15   : > { %p900_p13 = pneg %p884_p11 }
  0x17   : > { %p616_p0 = pnand %p900_p13, %p614_p12 }
  0x19   : > { %p617_p3 = pneg %p616_p0 }
  0x1b   : > { %p622_p7 = pnand %p620_p5, %p617_p3 }
  0x1d   : > { %625 = shalt.err (!%p622_p7)
}
  0x1e   : > { %s626_s13 = scalar_lea.vmem %s156_s25, 64  ;;  %p634_p2 = scmp.lt.s32.totalorder %s156_s25, %s156_s25 }
  0x1f   : > { %p627_p10 = scmp.ne.s32.totalorder %s156_s25, %s626_s13  ;;  %p635_p6 = scmp.lt.s32.totalorder %s626_s13, %s626_s13 }
  0x21   : > { %p629_p9 = pnand %p627_p10, %p900_p13  ;;  %p636_p4 = por %p635_p6, %p634_p2 }
  0x23   : > { %p630_p1 = pneg %p629_p9 }
  0x25   : > { %p637_p8 = pnand %p636_p4, %p630_p1 }
  0x27   : > { %640 = shalt.err (!%p637_p8)
}
  0x28   : > { %547 = dma.hbm_to_vmem [thread:$0]  (!%p884_p11), %s1091_s1, 64, %s156_s25, [#allocation6]  }
  0x29   : > { %s641_s29 = scalar_lea.hbm %s1092_s2, 128 }
  0x2a   : > { %p642_p9 = scmp.ne.s32.totalorder %s1092_s2, %s641_s29  ;;  %p648_p1 = scmp.lt.u32.totalorder %s641_s29, %s1092_s2 }
  0x2c   : > { %p644_p12 = pnand %p642_p9, %p900_p13 }
  0x2e   : > { %p645_p2 = pneg %p644_p12 }
  0x30   : > { %p650_p4 = pnand %p648_p1, %p645_p2 }
  0x32   : > { %653 = shalt.err (!%p650_p4)
}
  0x33   : > { %s654_s25 = scalar_lea.vmem %s888_s27, 128  ;;  %p662_p3 = scmp.lt.s32.totalorder %s888_s27, %s888_s27 }
  0x34   : > { %p655_p6 = scmp.ne.s32.totalorder %s888_s27, %s654_s25  ;;  %p663_p5 = scmp.lt.s32.totalorder %s654_s25, %s654_s25 }
  0x36   : > { %p657_p8 = pnand %p655_p6, %p900_p13  ;;  %p664_p7 = por %p663_p5, %p662_p3 }
  0x38   : > { %p658_p0 = pneg %p657_p8 }
  0x3a   : > { %p665_p10 = pnand %p664_p7, %p658_p0 }
  0x3c   : > { %668 = shalt.err (!%p665_p10)
}
  0x3d   : > { %550 = dma.hbm_to_vmem [thread:$0]  (!%p884_p11), %s1092_s2, 128, %s888_s27, [#allocation6]  }
  0x3e   : > { %s669_s14 = scalar_lea.hbm %s1093_s3, 128 }
  0x3f   : > { %p670_p9 = scmp.ne.s32.totalorder %s1093_s3, %s669_s14  ;;  %p676_p1 = scmp.lt.u32.totalorder %s669_s14, %s1093_s3 }
  0x41   : > { %p672_p12 = pnand %p670_p9, %p900_p13 }
  0x43   : > { %p673_p2 = pneg %p672_p12 }
  0x45   : > { %p678_p4 = pnand %p676_p1, %p673_p2 }
  0x47   : > { %681 = shalt.err (!%p678_p4)
}
  0x48   : > { %s682_s27 = scalar_lea.vmem %s890_s30, 128  ;;  %p690_p3 = scmp.lt.s32.totalorder %s890_s30, %s890_s30 }
  0x49   : > { %p683_p6 = scmp.ne.s32.totalorder %s890_s30, %s682_s27  ;;  %p691_p5 = scmp.lt.s32.totalorder %s682_s27, %s682_s27 }
  0x4b   : > { %p685_p8 = pnand %p683_p6, %p900_p13  ;;  %p692_p7 = por %p691_p5, %p690_p3 }
  0x4d   : > { %p686_p0 = pneg %p685_p8 }
  0x4f   : > { %p693_p10 = pnand %p692_p7, %p686_p0 }
  0x51   : > { %696 = shalt.err (!%p693_p10)
}
  0x52   : > { %553 = dma.hbm_to_vmem [thread:$0]  (!%p884_p11), %s1093_s3, 128, %s890_s30, [#allocation9]  }
  0x53   : > { %s963_s10 = sadd.s32 1, %s801_s18   ;;  %s29_s7 = sadd.s32 1, %s797_s17 }
  0x54   : > { %s26_s28 = ssub.s32 %s801_s18, %s963_s10  ;;  %p36_p9 = scmp.ne.s32.totalorder %s797_s17, %s793_s16 }
  0x55   : > { %p27_p13 = scmp.eq.s32.totalorder %s26_s28, 0  ;;  %p37_p12 = scmp.eq.s32.totalorder %s801_s18, 0 }
  0x56   : > { %p565_p2 = scmp.lt.s32.totalorder %s801_s18, 2  ;;  %p1103_p4 = scmp.eq.s32.totalorder %s856_s19, 1 }
  0x57   : > { %s973_s8 = scalar_select %p27_p13, %s797_s17, %s29_s7  }
  0x58   : > { %p38_p1 = por %p37_p12, %p36_p9  ;;  %p977_p6 = por %p1103_p4, %p36_p9 }
  0x59   : > { %s188_s9 = sand.u32 1, %s797_s17   ;;  %s519_s11 = sshll.u32 %s801_s18, 7 }
  0x5a   : > { %s500_s30 = sshll.u32 %s188_s9, 3  ;;  %s986_s14 = scalar_lea.hbm %s1090_s0, %s519_s11 }
  0x5b   : > { %s192_s20 = scalar_lea.vmem [#allocation2], %s500_s30  ;;  %p988_p11 = pnand %p565_p2, %p38_p1 }
  0x5c   : > { %s200_s24 = sshll.u32 %s192_s20, 4  ;;  %s189_s29 = scalar_lea.sflag [#allocation3], %s188_s9  ;;  %s992_s24 = int_to_ptr.vmem [resolvable:$true] %s200_s24 }
  0x5d   : > { %s697_s27 = scalar_lea.hbm %s986_s14, 128  ;;  %p699_p0 = pneg %p988_p11 }
  0x5e   : > { %p698_p8 = scmp.ne.s32.totalorder %s986_s14, %s697_s27  ;;  %s702_s28 = scalar_lea.hbm %s1090_s0, 256 }
  0x5f   : > { %p703_p7 = scmp.lt.u32.totalorder %s986_s14, %s1090_s0  ;;  %p704_p10 = scmp.lt.u32.totalorder %s702_s28, %s697_s27 }
  0x60   : > { %p700_p3 = pnand %p699_p0, %p698_p8  ;;  %p706_p9 = scmp.lt.u32.totalorder %s697_s27, %s986_s14 }
  0x61   : > { %p705_p13 = por %p704_p10, %p703_p7 }
  0x62   : > { %p701_p5 = pneg %p700_p3 }
  0x63   : > { %p707_p12 = por %p706_p9, %p705_p13 }
  0x65   : > { %p708_p2 = pnand %p707_p12, %p701_p5 }
  0x67   : > { %711 = shalt.err (!%p708_p2)
}
  0x68   : > { %s712_s9 = scalar_lea.vmem %s992_s24, 128  ;;  %s806_s30 = smov [#allocation2]  }
  0x69   : > { %p713_p1 = scmp.ne.s32.totalorder %s992_s24, %s712_s9  ;;  %s717_s12 = sshll.u32 %s806_s30, 4  ;;  %s718_s12 = int_to_ptr.vmem [resolvable:$false] %s717_s12 }
  0x6a   : > { %s719_s13 = scalar_lea.vmem %s718_s12, 256  ;;  %p720_p3 = scmp.lt.s32.totalorder %s992_s24, %s718_s12 }
  0x6b   : > { %p715_p4 = pnand %p713_p1, %p699_p0  ;;  %p721_p7 = scmp.lt.s32.totalorder %s719_s13, %s712_s9 }
  0x6d   : > { %p716_p8 = pneg %p715_p4  ;;  %p722_p10 = por %p721_p7, %p720_p3 }
  0x6f   : > { %p723_p13 = pnand %p722_p10, %p716_p8 }
  0x71   : > { %726 = shalt.err (!%p723_p13)
}
  0x72   : > { %557 = dma.hbm_to_vmem [thread:$0]  (!%p988_p11), %s986_s14, 128, %s992_s24, %s189_s29  }
  0x73   : > { %p1106_p5 = scmp.ne.s32.totalorder %s1100_s23, 0 }
  0x74   : > { %s1022_s20 = sand.u32 (!%p1106_p5), 1, %s793_s16   ;;  %p1107_p0 = scmp.ne.s32.totalorder (!%p1106_p5), %s1098_s21, 0 }
  0x75   : > { %209 = sbr.rel (%p1106_p5) target bundleno = 657 (0x291), region = 36  ;;  %s504_s27 = sshll.u32 (!%p1106_p5), %s1022_s20, 3 }
  0x76   : > { %s212_s5 = scalar_lea.sflag (!%p1106_p5), [#allocation3], %s1022_s20  ;;  %s215_s6 = scalar_lea.vmem (!%p1106_p5), [#allocation2], %s504_s27 }
  0x7c   : > { %772 = dma.done.wait (%p1107_p0), %s212_s5, 128  }
  0x7d   : > { %774 = vsyncadd (%p1107_p0), %s212_s5, 4294967168  ;;  %p1108_p11 = scmp.eq.s32.totalorder %s856_s19, 0 }
  0x7f   : > { %776 = dma.done.wait (%p1108_p11), [#allocation6], 192   ;;  %p1109_p9 = pmov %p1108_p11 }
  0x81   : > { %778 = vsyncadd (%p1109_p9), [#allocation6], 4294967104  ;;  %p1110_p12 = pmov %p1109_p9 }
  0x82   : > { %p1111_p2 = pmov %p1109_p9 }
  0x83   : > { %780 = dma.done.wait (%p1110_p12), [#allocation9], 128  }
  0x84   : > { %782 = vsyncadd (%p1111_p2), [#allocation9], 4294967168  ;;  %v807_v0 = vmov 0   ;;  %v254_v1 = vld [vmem:[%s215_s6] sm:$0xff]  ;;  %vm264_vm0 = vcmask 1043456   ;;  %vm260_vm1 = vcmask 64512  }
  0x85   : > { %303 = vmatprep.mubr.bf16.mxu0 %v807_v0  ;;  %607 = vset.pattern.permute.xlu1 %v807_v0  ;;  %v510_v2 = vcombine.high %v254_v1, %v254_v1  ;;  %v509_v3 = vcombine.low %v254_v1, %v254_v1  ;;  %v253_v5 = vld [vmem:[#allocation5] sm:$0xf]  ;;  %v312_v14 = vld [vmem:[#allocation7] sm:$0xff]  ;;  %v313_v15 = vld [vmem:[#allocation8] sm:$0xff]  ;;  %s808_s28 = smov 0.0   ;;  %s521_s30 = sshll.u32 %s856_s19, 7 }
  0x86   : > { %608 = vset.pattern.permute.xlu0 %v807_v0  ;;  %353 = vperm.xlu1 %607, %v312_v14   ;;  %s251_s12 = scalar_lea.vmem [#allocation10], %s504_s27  ;;  %s381_s19 = scalar_lea.sflag [#allocation4], %s1022_s20 }
  0x87   : > { %511 = vmatprep.subr.msk.bf16.mxu0 %vm264_vm0, %v510_v2  ;;  %v266_v4 = vsel %vm264_vm0, %v509_v3, 0  ;;  %s395_s13 = sshll.u32 %s251_s12, 4  ;;  %s1048_s13 = int_to_ptr.vmem [resolvable:$true] %s395_s13 }
  0x88   : > { %272 = vmatpush1.bf16.msra.mxu0 %v266_v4  ;;  %s727_s27 = scalar_lea.vmem %s1048_s13, 128 }
  0x89   : > { %p728_p1 = scmp.ne.s32.totalorder %s1048_s13, %s727_s27 }
  0x8a   : > { %360 = vperm.xlu1 %607, %v313_v15  }
  0x8b   : > { %512 = vmatmul.mubr.msk.bf16.vlgmr.msra.gmra.mrb[0].mxu0 %vm260_vm1, %v253_v5  ;;  %p729_p4 = pnand %p728_p1, %p977_p6 }
  0x8d   : > { %p730_p8 = pneg %p729_p4 }
 0x105   : > { %v354_v35 = vpop.permute.xlu1 %353 }
 0x109   : > { %v361_v41 = vpop.permute.xlu1 %360 }
 0x15e   : > { %v305_v6 = vpop.f32.mrb[0].mxu0 }
 0x15f   : > { %v307_v7 = vpop.f32.mrb[1].mxu0  ;;  %v324_v8 = vmul.f32 %v305_v6, %v305_v6 }
 0x160   : > { %v309_v9 = vpop.f32.mrb[2].mxu0  ;;  %v314_v10 = vadd.f32 %v307_v7, %v305_v6  ;;  %v325_v11 = vmul.f32 %v307_v7, %v307_v7 }
 0x161   : > { %v310_v12 = vpop.f32.mrb[3].mxu0 }
 0x162   : > { %315 = vadd.xlane.f32.xlu0 %v314_v10  ;;  %v326_v13 = vadd.f32 %v325_v11, %v324_v8 }
 0x166   : > { %327 = vadd.xlane.f32.xlu0 %v326_v13 }
 0x1ef   : > { %v316_v16 = vpop.xlane.xlu0 %315 }
 0x1f0   : > { %v317_v17 = vrot.slane %v316_v16, 4 }
 0x1f2   : > { %v318_v18 = vadd.f32 %v317_v17, %v316_v16 }
 0x1f3   : > { %v328_v19 = vpop.xlane.xlu0 %327 }
 0x1f4   : > { %v319_v20 = vrot.slane %v318_v18, 2  ;;  %v329_v21 = vrot.slane %v328_v19, 4 }
 0x1f6   : > { %v330_v22 = vadd.f32 %v329_v21, %v328_v19  ;;  %v320_v23 = vadd.f32 %v319_v20, %v318_v18 }
 0x1f8   : > { %v331_v24 = vrot.slane %v330_v22, 2  ;;  %v321_v25 = vrot.slane %v320_v23, 1 }
 0x1fa   : > { %v332_v26 = vadd.f32 %v331_v24, %v330_v22  ;;  %v322_v27 = vadd.f32 %v321_v25, %v320_v23 }
 0x1fc   : > { %522 = vpush %v322_v27  ;;  %v333_v28 = vrot.slane %v332_v26, 1 }
 0x1fe   : > { %v334_v29 = vadd.f32 %v333_v28, %v332_v26 }
 0x200   : > { %524 = vpush %v334_v29 }
 0x22d   : > { %s523_s21 = spop %522 }
 0x22e   : > { %s336_s23 = smul.f32 0.00086805556, %s523_s21  ;;  %s1046_s21 = scalar_lea.hbm %s1094_s4, %s521_s30 }
 0x230   : > { %v341_v30 = vstv %s336_s23  ;;  %s338_s14 = smul.f32 %s336_s23, %s336_s23  ;;  %s809_s23 = smov [#allocation10]  }
 0x231   : > { %s525_s24 = spop %524  ;;  %v342_v31 = vsub.f32 %v305_v6, %v341_v30  ;;  %v343_v32 = vsub.f32 %v307_v7, %v341_v30 }
 0x232   : > { %s337_s26 = smul.f32 0.00086805556, %s525_s24 }
 0x234   : > { %s339_s29 = ssub.f32 %s337_s26, %s338_s14  ;;  %s731_s14 = sshll.u32 %s809_s23, 4  ;;  %s732_s14 = int_to_ptr.vmem [resolvable:$false] %s731_s14 }
 0x235   : > { %s733_s24 = scalar_lea.vmem %s732_s14, 256  ;;  %p734_p3 = scmp.lt.s32.totalorder %s1048_s13, %s732_s14 }
 0x236   : > { %s340_s7 = smax.f32 %s808_s28, %s339_s29  ;;  %p735_p7 = scmp.lt.s32.totalorder %s733_s24, %s727_s27 }
 0x237   : > { %s344_s11 = sadd.f32 1e-05, %s340_s7 }
 0x238   : > { %p736_p10 = por %p735_p7, %p734_p3 }
 0x239   : > { %v345_v33 = vstv %s344_s11 }
 0x23a   : > { %611 = vrsqrt.f32 %v345_v33  ;;  %p737_p13 = pnand %p736_p10, %p730_p8 }
 0x244   : > { %v612_v34 = vpop.eup %611 }
 0x245   : > { %526 = vpush %v612_v34 }
 0x276   : > { %s527_s9 = spop %526 }
 0x277   : > { %v348_v36 = vstv %s527_s9 }
 0x278   : > { %v349_v37 = vmul.f32 %v348_v36, %v342_v31  ;;  %v350_v38 = vmul.f32 %v348_v36, %v343_v32 }
 0x27a   : > { %v356_v39 = vmul.f32 %v354_v35, %v349_v37  ;;  %v357_v40 = vmul.f32 %v354_v35, %v350_v38 }
 0x27c   : > { %v363_v42 = vadd.f32 %v361_v41, %v356_v39  ;;  %v364_v43 = vadd.f32 %v361_v41, %v357_v40 }
 0x27e   : > { %vm365_vm2 = vcmp.ge.f32.partialorder %v363_v42, 0.0  ;;  %vm366_vm3 = vcmp.ge.f32.partialorder %v364_v43, 0.0  ;;  %v367_v44 = vmul.f32 0.2, %v363_v42  ;;  %v368_v45 = vmul.f32 0.2, %v364_v43 }
 0x280   : > { %v369_v46 = vsel %vm365_vm2, %v363_v42, %v367_v44  ;;  %v370_v47 = vsel %vm366_vm3, %v364_v43, %v368_v45 }
 0x281   : > { %v520_v48 = vpack.c.bf16 %v370_v47, %v369_v46 }
 0x283   : > { %379 = vst [vmem:[%s251_s12] sm:$0xff] %v520_v48 }
 0x284   : > { %740 = shalt.err (!%p737_p13)
}
 0x285   : > { %s741_s20 = scalar_lea.hbm %s1046_s21, 128  ;;  %s745_s28 = scalar_lea.hbm %s1094_s4, 256 }
 0x286   : > { %p742_p5 = scmp.ne.s32.totalorder %s1046_s21, %s741_s20  ;;  %p746_p9 = scmp.lt.u32.totalorder %s1046_s21, %s1094_s4 }
 0x287   : > { %p747_p12 = scmp.lt.u32.totalorder %s745_s28, %s741_s20  ;;  %p749_p1 = scmp.lt.u32.totalorder %s741_s20, %s1046_s21 }
 0x288   : > { %p743_p0 = pnand %p742_p5, %p977_p6 }
 0x289   : > { %p748_p2 = por %p747_p12, %p746_p9 }
 0x28a   : > { %p744_p11 = pneg %p743_p0 }
 0x28b   : > { %p750_p4 = por %p749_p1, %p748_p2 }
 0x28d   : > { %p751_p8 = pnand %p750_p4, %p744_p11 }
 0x28f   : > { %754 = shalt.err (!%p751_p8)
}
 0x290   : > { %542 = dma.vmem_to_hbm [thread:$0]  (%p977_p6), %s1048_s13, 128, %s1046_s21, %s381_s19  }
 0x291 PF: > { %s407_s9 = sand.u32 1, %s789_s15   ;;  %p1112_p3 = scmp.ne.s32.totalorder %s1099_s22, 0 }
 0x292   : > { %p1113_p7 = scmp.ge.s32.totalorder %s801_s18, 2  ;;  %s408_s30 = scalar_lea.sflag [#allocation4], %s407_s9 }
 0x294   : > { %p559_p10 = pnand %p1113_p7, %p1112_p3 }
 0x296   : > { %784 = dma.done.wait (!%p559_p10), %s408_s30, 128  }
 0x297   : > { %786 = vsyncadd (!%p559_p10), %s408_s30, 4294967168  ;;  %p19_p13 = scmp.ge.s32.totalorder %s963_s10, 4   ;;  %s1114_s15 = smov %s793_s16 }
 0x298   : > { %s1115_s16 = smov %s797_s17  ;;  %s1116_s17 = smov %s973_s8 }
 0x299   : > { %s1117_s18 = smov %s963_s10  ;;  %21 = sbr.rel (!%p19_p13) target bundleno = 7 (0x7), region = 93 }
 0x2a0   :  { %413 = vsyncpa [#allocation3], 1 }
 0x2a1   :  { %415 = vsyncpa [#allocation3 + $0x1], 1 }
 0x2a2   :  { %416 = vsyncpa [#allocation6], 1 }
 0x2a3   :  { %417 = vsyncpa [#allocation9], 1 }
 0x2a4   :  { %418 = vsyncpa [#allocation4], 1 }
 0x2a5   :  { %420 = vsyncpa [#allocation4 + $0x1], 1 }

// kernel: fft_block.7
= control target key start
LH: loop header
LB: loop body
LE: loop exit
PB: predicated region body
PF: predicated region fallthrough
CT: control target
= control target key end

     0   :  { %s1421_s0 = inlined_call_operand.hbm [shape: bf16[2,4,256], index: 0, kind: input, shape index: {}]   ;;  %s1422_s1 = inlined_call_operand.hbm [shape: bf16[2,4,256], index: 1, kind: input, shape index: {}]   ;;  %s1423_s2 = inlined_call_operand.hbm [shape: bf16[2,4,256], index: 2, kind: input, shape index: {}]   ;;  %s1424_s3 = inlined_call_operand.hbm [shape: bf16[8,4], index: 3, kind: input, shape index: {}]   ;;  %s1425_s4 = inlined_call_operand.hbm [shape: f32[8,1], index: 4, kind: input, shape index: {}]   ;;  %s1426_s5 = inlined_call_operand.hbm [shape: f32[8,1], index: 5, kind: input, shape index: {}]   ;;  %s1427_s6 = inlined_call_operand.hbm [shape: f32[2,8,256], index: 6, kind: output, shape index: {}]  }
   0x1   :  { %1446 = sst [smem:[#allocation24_spill]] %s1422_s1 }
   0x2   :  { %1447 = sst [smem:[#allocation25_spill]] %s1424_s3 }
   0x3   :  { %11 = vsyncpa [#allocation3], 0 }
   0x4   :  { %13 = vsyncpa [#allocation3 + $0x1], 0 }
   0x5   :  { %14 = vsyncpa [#allocation6], 0 }
   0x6   :  { %16 = vsyncpa [#allocation6 + $0x1], 0 }
   0x7   :  { %17 = vsyncpa [#allocation9], 0 }
   0x8   :  { %18 = vsyncpa [#allocation12], 0 }
   0x9   :  { %19 = vsyncpa [#allocation4], 0 }
   0xa   :  { %21 = vsyncpa [#allocation4 + $0x1], 0  ;;  %s1095_s21 = smov 0   ;;  %s1097_s22 = smov 0  }
   0xb   :  { %s1099_s23 = smov 0   ;;  %s1101_s24 = smov 0  }
   0xc LB: > { %1448 = sst [smem:[#allocation19_spill]] %s1037_s21  ;;  %s1116_s25 = sadd.s32 4294967295, %s1049_s24   ;;  %s1049_s24 = sphi %s1101_s24, %s1486_s24   ;;  %s1045_s23 = sphi %s1099_s23, %s1490_s23   ;;  %s1041_s22 = sphi %s1097_s22, %s1489_s22   ;;  %s1037_s21 = sphi %s1095_s21, %s1488_s21  }
   0xd   : > { %1449 = sst [smem:[#allocation20_spill]] %s1049_s24  ;;  %s664_s26 = sadd.s32 4294967294, %s1049_s24  }
   0xe   : > { %p47_p0 = scmp.ne.s32.totalorder %s1041_s22, %s1037_s21  ;;  %p1428_p1 = scmp.eq.s32.totalorder %s1116_s25, 0 }
   0xf   : > { %p192_p3 = scmp.eq.s32.totalorder %s664_s26, 1  ;;  %p665_p5 = scmp.ge.s32.totalorder %s1049_s24, 1 }
  0x10   : > { %p1125_p4 = por %p1428_p1, %p47_p0  ;;  %p199_p7 = scmp.lt.s32.totalorder %s1049_s24, 3 }
  0x11   : > { %p1130_p6 = por %p192_p3, %p47_p0  ;;  %s1051_s30 = smov [#allocation8]  }
  0x12   : > { %s1450_s27 = scalar_select %p1125_p4, 1, 0 }
  0x13   : > { %s1451_s28 = scalar_select %p1130_p6, 1, 0 }
  0x14   : > { %p1135_p8 = pnand %p665_p5, %p199_p7  ;;  %s212_s7 = sshll.u32 %s1051_s30, 4  ;;  %s213_s7 = int_to_ptr.vmem [resolvable:$true] %s212_s7 }
  0x15   : > { %1452 = sst [smem:[#allocation21_spill]] %s1451_s28  ;;  %s1143_s8 = sadd.s32 1, %s1049_s24  }
  0x16   : > { %s1453_s29 = scalar_select %p1135_p8, 1, 0 }
  0x17   : > { %p724_p10 = pneg %p1135_p8  ;;  %1454 = sst [smem:[#allocation22_spill]] %s1143_s8 }
  0x18   : > { %s31_s10 = ssub.s32 %s1049_s24, %s1143_s8  ;;  %s34_s12 = sadd.s32 1, %s1045_s23 }
  0x19   : > { %p1147_p11 = pnand %p724_p10, %p1428_p1  ;;  %p1153_p12 = scmp.eq.s32.totalorder %s31_s10, 0 }
  0x1a   : > { %s1457_s3 = sld [smem:[#allocation25_spill]] }
  0x1b   : > { %s1455_s9 = scalar_select %p1147_p11, 1, 0 }
  0x1c   : > { %s1456_s11 = scalar_select %p1153_p12, 1, 0 }
  0x1d   : > { %p1168_p3 = pneg %p1147_p11 }
  0x1f   : > { %s1458_s18 = scalar_select %p1168_p3, 1, 0 }
  0x20   : > { %s797_s15 = scalar_lea.hbm %s1457_s3, 64 }
  0x21   : > { %p798_p0 = scmp.ne.s32.totalorder %s1457_s3, %s797_s15  ;;  %p804_p10 = scmp.lt.u32.totalorder %s797_s15, %s1457_s3 }
  0x23   : > { %p800_p5 = pnand %p1168_p3, %p798_p0 }
  0x25   : > { %p801_p7 = pneg %p800_p5 }
  0x27   : > { %p806_p9 = pnand %p804_p10, %p801_p7 }
  0x29   : > { %809 = shalt.err (!%p806_p9)
}
  0x2a   : > { %s810_s26 = scalar_lea.vmem %s213_s7, 64  ;;  %p818_p6 = scmp.lt.s32.totalorder %s213_s7, %s213_s7 }
  0x2b   : > { %p811_p1 = scmp.ne.s32.totalorder %s213_s7, %s810_s26  ;;  %p819_p4 = scmp.lt.s32.totalorder %s810_s26, %s810_s26 }
  0x2d   : > { %p813_p2 = pnand %p811_p1, %p1168_p3  ;;  %p820_p8 = por %p819_p4, %p818_p6 }
  0x2f   : > { %p814_p13 = pneg %p813_p2 }
  0x31   : > { %p821_p12 = pnand %p820_p8, %p814_p13 }
  0x33   : > { %824 = shalt.err (!%p821_p12)
}
  0x34   : > { %727 = dma.hbm_to_vmem [thread:$0]  (!%p1147_p11), %s1457_s3, 64, %s213_s7, [#allocation9]  }
  0x35   : > { %p1459_p1 = scmp.ne.s32.totalorder %s1456_s11, 0  ;;  %p42_p2 = scmp.eq.s32.totalorder %s1049_s24, 0 }
  0x36   : > { %p1461_p4 = scmp.ne.s32.totalorder %s1045_s23, %s1041_s22  ;;  %p1462_p6 = scmp.eq.s32.totalorder %s1116_s25, 1 }
  0x37   : > { %s1187_s13 = scalar_select %p1459_p1, %s1045_s23, %s34_s12  }
  0x38   : > { %p1195_p8 = por %p1462_p6, %p1461_p4  ;;  %p751_p9 = scmp.lt.s32.totalorder %s1049_s24, 2 }
  0x39   : > { %1460 = sst [smem:[#allocation23_spill]] %s1187_s13  ;;  %s1431_s15 = sand.u32 1, %s1045_s23  }
  0x3a   : > { %s1463_s14 = scalar_select %p1195_p8, 1, 0 }
  0x3b   : > { %p1464_p12 = pmov %p1461_p4  ;;  %s1206_s16 = sshll.u32 %s1431_s15, 2 }
  0x3c   : > { %s1209_s17 = sshll.u32 %s1049_s24, 6  ;;  %s264_s7 = sand.u32 1, %s1049_s24  }
  0x3d   : > { %p43_p13 = por %p42_p2, %p1464_p12  ;;  %s1466_s1 = sld [smem:[#allocation24_spill]] }
  0x3e   : > { %s268_s26 = scalar_lea.vmem [#allocation5], %s1206_s16  ;;  %s1225_s10 = scalar_lea.sflag [#allocation6], %s264_s7 }
  0x3f   : > { %p1212_p0 = pnand %p751_p9, %p43_p13  ;;  %s276_s30 = sshll.u32 %s268_s26, 4  ;;  %s1223_s30 = int_to_ptr.vmem [resolvable:$true] %s276_s30 }
  0x41   : > { %s1465_s11 = scalar_select %p1212_p0, 1, 0 }
  0x42   : > { %p1231_p7 = pneg %p1212_p0 }
  0x43   : > { %s1220_s20 = scalar_lea.hbm %s1466_s1, %s1209_s17  ;;  %s830_s13 = scalar_lea.hbm %s1466_s1, 128 }
  0x44   : > { %s825_s15 = scalar_lea.hbm %s1220_s20, 64  ;;  %p831_p2 = scmp.lt.u32.totalorder %s1220_s20, %s1466_s1 }
  0x45   : > { %p826_p5 = scmp.ne.s32.totalorder %s1220_s20, %s825_s15  ;;  %p832_p4 = scmp.lt.u32.totalorder %s830_s13, %s825_s15 }
  0x46   : > { %s1467_s3 = scalar_select %p1231_p7, 1, 0 }
  0x47   : > { %p828_p10 = pnand %p1231_p7, %p826_p5  ;;  %p833_p6 = por %p832_p4, %p831_p2 }
  0x48   : > { %p834_p9 = scmp.lt.u32.totalorder %s825_s15, %s1220_s20 }
  0x49   : > { %p829_p1 = pneg %p828_p10 }
  0x4a   : > { %p835_p12 = por %p834_p9, %p833_p6 }
  0x4c   : > { %p836_p13 = pnand %p835_p12, %p829_p1 }
  0x4e   : > { %839 = shalt.err (!%p836_p13)
}
  0x4f   : > { %s840_s7 = scalar_lea.vmem %s1223_s30, 64  ;;  %s1052_s12 = smov [#allocation5]  }
  0x50   : > { %p841_p5 = scmp.ne.s32.totalorder %s1223_s30, %s840_s7  ;;  %s845_s19 = sshll.u32 %s1052_s12, 4  ;;  %s846_s19 = int_to_ptr.vmem [resolvable:$false] %s845_s19 }
  0x51   : > { %s847_s8 = scalar_lea.vmem %s846_s19, 128  ;;  %p848_p11 = scmp.lt.s32.totalorder %s1223_s30, %s846_s19 }
  0x52   : > { %p843_p10 = pnand %p841_p5, %p1231_p7  ;;  %p849_p3 = scmp.lt.s32.totalorder %s847_s8, %s840_s7 }
  0x54   : > { %p844_p8 = pneg %p843_p10  ;;  %p850_p2 = por %p849_p3, %p848_p11 }
  0x56   : > { %p851_p4 = pnand %p850_p2, %p844_p8 }
  0x58   : > { %854 = shalt.err (!%p851_p4)
}
  0x59   : > { %740 = dma.hbm_to_vmem [thread:$0]  (!%p1212_p0), %s1220_s20, 64, %s1223_s30, %s1225_s10  }
  0x5a   : > { %s1053_s13 = smov [#allocation10]   ;;  %s1054_s26 = smov [#allocation11]  }
  0x5b   : > { %s223_s15 = sshll.u32 %s1053_s13, 4  ;;  %s234_s1 = sshll.u32 %s1054_s26, 4  ;;  %s224_s15 = int_to_ptr.vmem [resolvable:$true] %s223_s15  ;;  %s235_s1 = int_to_ptr.vmem [resolvable:$true] %s234_s1 }
  0x5c   : > { %s855_s19 = scalar_lea.hbm %s1425_s4, 128  ;;  %p1468_p3 = scmp.ne.s32.totalorder %s1458_s18, 0 }
  0x5d   : > { %p856_p11 = scmp.ne.s32.totalorder %s1425_s4, %s855_s19  ;;  %p862_p6 = scmp.lt.u32.totalorder %s855_s19, %s1425_s4 }
  0x5f   : > { %p858_p8 = pnand %p856_p11, %p1468_p3 }
  0x61   : > { %p859_p1 = pneg %p858_p8 }
  0x63   : > { %p864_p9 = pnand %p862_p6, %p859_p1 }
  0x65   : > { %867 = shalt.err (!%p864_p9)
}
  0x66   : > { %s868_s20 = scalar_lea.vmem %s224_s15, 128  ;;  %p876_p10 = scmp.lt.s32.totalorder %s224_s15, %s224_s15 }
  0x67   : > { %p869_p12 = scmp.ne.s32.totalorder %s224_s15, %s868_s20  ;;  %p877_p2 = scmp.lt.s32.totalorder %s868_s20, %s868_s20 }
  0x69   : > { %p871_p13 = pnand %p869_p12, %p1468_p3  ;;  %p878_p4 = por %p877_p2, %p876_p10 }
  0x6b   : > { %p872_p5 = pneg %p871_p13 }
  0x6d   : > { %p879_p0 = pnand %p878_p4, %p872_p5 }
  0x6f   : > { %882 = shalt.err (!%p879_p0)
}
  0x70   : > { %p1469_p11 = scmp.ne.s32.totalorder %s1455_s9, 0  ;;  %s883_s13 = scalar_lea.hbm %s1426_s5, 128 }
  0x71   : > { %p884_p8 = scmp.ne.s32.totalorder %s1426_s5, %s883_s13  ;;  %p890_p0 = scmp.lt.u32.totalorder %s883_s13, %s1426_s5 }
  0x72   : > { %730 = dma.hbm_to_vmem [thread:$0]  (!%p1469_p11), %s1425_s4, 128, %s224_s15, [#allocation9]  }
  0x73   : > { %p886_p1 = pnand %p884_p8, %p1468_p3 }
  0x75   : > { %p887_p6 = pneg %p886_p1 }
  0x77   : > { %p892_p9 = pnand %p890_p0, %p887_p6 }
  0x79   : > { %895 = shalt.err (!%p892_p9)
}
  0x7a   : > { %s896_s8 = scalar_lea.vmem %s235_s1, 128  ;;  %p904_p10 = scmp.lt.s32.totalorder %s235_s1, %s235_s1 }
  0x7b   : > { %p897_p12 = scmp.ne.s32.totalorder %s235_s1, %s896_s8  ;;  %p905_p2 = scmp.lt.s32.totalorder %s896_s8, %s896_s8 }
  0x7d   : > { %p899_p13 = pnand %p897_p12, %p1468_p3  ;;  %p906_p4 = por %p905_p2, %p904_p10 }
  0x7f   : > { %p900_p5 = pneg %p899_p13 }
  0x81   : > { %p907_p7 = pnand %p906_p4, %p900_p5 }
  0x83   : > { %910 = shalt.err (!%p907_p7)
}
  0x84   : > { %733 = dma.hbm_to_vmem [thread:$0]  (!%p1469_p11), %s1426_s5, 128, %s235_s1, [#allocation12]  }
  0x85   : > { %s1295_s30 = scalar_lea.hbm %s1421_s0, %s1209_s17  ;;  %s249_s21 = scalar_lea.vmem [#allocation2], %s1206_s16 }
  0x86   : > { %s257_s9 = sshll.u32 %s249_s21, 4  ;;  %s1304_s26 = scalar_lea.hbm %s1423_s2, %s1209_s17  ;;  %s1298_s9 = int_to_ptr.vmem [resolvable:$true] %s257_s9 }
  0x87   : > { %s1470_s12 = sand.u32 1, %s1045_s23   ;;  %s911_s19 = scalar_lea.hbm %s1295_s30, 64 }
  0x88   : > { %s246_s1 = scalar_lea.sflag [#allocation3], %s1470_s12  ;;  %p912_p7 = scmp.ne.s32.totalorder %s1295_s30, %s911_s19 }
  0x89   : > { %p1471_p3 = scmp.ne.s32.totalorder %s1467_s3, 0  ;;  %s916_s15 = scalar_lea.hbm %s1421_s0, 128 }
  0x8a   : > { %p917_p1 = scmp.lt.u32.totalorder %s1295_s30, %s1421_s0  ;;  %p918_p6 = scmp.lt.u32.totalorder %s916_s15, %s911_s19 }
  0x8b   : > { %p914_p11 = pnand %p912_p7, %p1471_p3  ;;  %p920_p9 = scmp.lt.u32.totalorder %s911_s19, %s1295_s30 }
  0x8c   : > { %p919_p0 = por %p918_p6, %p917_p1 }
  0x8d   : > { %p915_p8 = pneg %p914_p11 }
  0x8e   : > { %p921_p12 = por %p920_p9, %p919_p0 }
  0x90   : > { %p922_p13 = pnand %p921_p12, %p915_p8 }
  0x92   : > { %925 = shalt.err (!%p922_p13)
}
  0x93   : > { %s926_s17 = scalar_lea.vmem %s1298_s9, 64  ;;  %s1055_s18 = smov [#allocation2]  }
  0x94   : > { %p927_p5 = scmp.ne.s32.totalorder %s1298_s9, %s926_s17  ;;  %s931_s21 = sshll.u32 %s1055_s18, 4  ;;  %s932_s21 = int_to_ptr.vmem [resolvable:$false] %s931_s21 }
  0x95   : > { %s933_s28 = scalar_lea.vmem %s932_s21, 128  ;;  %p934_p4 = scmp.lt.s32.totalorder %s1298_s9, %s932_s21 }
  0x96   : > { %p929_p10 = pnand %p927_p5, %p1471_p3  ;;  %p935_p7 = scmp.lt.s32.totalorder %s933_s28, %s926_s17 }
  0x98   : > { %p930_p2 = pneg %p929_p10  ;;  %p936_p11 = por %p935_p7, %p934_p4 }
  0x9a   : > { %p937_p1 = pnand %p936_p11, %p930_p2 }
  0x9c   : > { %940 = shalt.err (!%p937_p1)
}
  0x9d   : > { %p1472_p8 = scmp.ne.s32.totalorder %s1465_s11, 0  ;;  %s287_s13 = scalar_lea.vmem [#allocation7], %s1206_s16 }
  0x9e   : > { %s295_s12 = sshll.u32 %s287_s13, 4  ;;  %s941_s19 = scalar_lea.hbm %s1304_s26, 64  ;;  %s296_s12 = int_to_ptr.vmem [resolvable:$true] %s295_s12 }
  0x9f   : > { %737 = dma.hbm_to_vmem [thread:$0]  (!%p1472_p8), %s1295_s30, 64, %s1298_s9, %s246_s1  }
  0xa0   : > { %p942_p6 = scmp.ne.s32.totalorder %s1304_s26, %s941_s19  ;;  %s946_s15 = scalar_lea.hbm %s1423_s2, 128 }
  0xa1   : > { %p947_p12 = scmp.lt.u32.totalorder %s1304_s26, %s1423_s2  ;;  %p948_p13 = scmp.lt.u32.totalorder %s946_s15, %s941_s19 }
  0xa2   : > { %p944_p0 = pnand %p942_p6, %p1471_p3  ;;  %p950_p10 = scmp.lt.u32.totalorder %s941_s19, %s1304_s26 }
  0xa3   : > { %p949_p5 = por %p948_p13, %p947_p12 }
  0xa4   : > { %p945_p9 = pneg %p944_p0 }
  0xa5   : > { %p951_p2 = por %p950_p10, %p949_p5 }
  0xa7   : > { %p952_p4 = pnand %p951_p2, %p945_p9 }
  0xa9   : > { %955 = shalt.err (!%p952_p4)
}
  0xaa   : > { %s956_s16 = scalar_lea.vmem %s296_s12, 64  ;;  %s1056_s30 = smov [#allocation7]  }
  0xab   : > { %p957_p7 = scmp.ne.s32.totalorder %s296_s12, %s956_s16  ;;  %s961_s9 = sshll.u32 %s1056_s30, 4  ;;  %s962_s9 = int_to_ptr.vmem [resolvable:$false] %s961_s9 }
  0xac   : > { %s963_s1 = scalar_lea.vmem %s962_s9, 128  ;;  %p964_p6 = scmp.lt.s32.totalorder %s296_s12, %s962_s9 }
  0xad   : > { %p959_p11 = pnand %p957_p7, %p1471_p3  ;;  %p965_p0 = scmp.lt.s32.totalorder %s963_s1, %s956_s16 }
  0xaf   : > { %p960_p1 = pneg %p959_p11  ;;  %p966_p8 = por %p965_p0, %p964_p6 }
  0xb1   : > { %p967_p12 = pnand %p966_p8, %p960_p1 }
  0xb3   : > { %970 = shalt.err (!%p967_p12)
}
  0xb4   : > { %p1473_p13 = scmp.ne.s32.totalorder %s1465_s11, 0  ;;  %p1474_p9 = scmp.ne.s32.totalorder %s1453_s29, 0 }
  0xb5   : > { %s1351_s3 = sand.u32 (!%p1474_p9), 1, %s1041_s22   ;;  %p1475_p3 = scmp.ne.s32.totalorder (!%p1474_p9), %s1450_s27, 0 }
  0xb6   : > { %743 = dma.hbm_to_vmem [thread:$0]  (!%p1473_p13), %s1304_s26, 64, %s296_s12, %s1225_s10  }
  0xb7   : > { %304 = sbr.rel (%p1474_p9) target bundleno = 733 (0x2dd), region = 44  ;;  %s680_s17 = sshll.u32 (!%p1474_p9), %s1351_s3, 2 }
  0xb8   : > { %s307_s18 = scalar_lea.sflag (!%p1474_p9), [#allocation3], %s1351_s3  ;;  %s310_s21 = scalar_lea.vmem (!%p1474_p9), [#allocation2], %s680_s17 }
  0xbe   : > { %1016 = dma.done.wait (%p1475_p3), %s307_s18, 64  }
  0xbf   : > { %1018 = vsyncadd (%p1475_p3), %s307_s18, 4294967232  ;;  %s315_s11 = sand.u32 1, %s1116_s25   ;;  %s319_s29 = scalar_lea.vmem [#allocation5], %s680_s17 }
  0xc0   : > { %s316_s10 = scalar_lea.sflag [#allocation6], %s315_s11 }
  0xc1   : > { %1020 = dma.done.wait (%p1475_p3), %s316_s10, 128  }
  0xc2   : > { %1022 = vsyncadd (%p1475_p3), %s316_s10, 4294967168  ;;  %s328_s26 = scalar_lea.vmem [#allocation7], %s680_s17  ;;  %p1476_p8 = scmp.eq.s32.totalorder %s1116_s25, 0 }
  0xc4   : > { %1024 = dma.done.wait (%p1476_p8), [#allocation9], 192   ;;  %p1477_p5 = pmov %p1476_p8 }
  0xc6   : > { %1026 = vsyncadd (%p1477_p5), [#allocation9], 4294967104  ;;  %p1478_p10 = pmov %p1477_p5 }
  0xc7   : > { %p1479_p2 = pmov %p1477_p5 }
  0xc8   : > { %1028 = dma.done.wait (%p1478_p10), [#allocation12], 128  }
  0xc9   : > { %1030 = vsyncadd (%p1479_p2), [#allocation12], 4294967168  ;;  %v1057_v0 = vmov 0   ;;  %v380_v1 = vld [vmem:[%s310_s21] sm:$0xf]  ;;  %vm398_vm0 = vcmask 1041408  }
  0xca   : > { %437 = vmatprep.mubr.bf16.mxu0 %v1057_v0  ;;  %793 = vset.pattern.permute.xlu1 %v1057_v0  ;;  %v382_v2 = vld [vmem:[%s319_s29] sm:$0xf]  ;;  %v385_v3 = vld [vmem:[%s328_s26] sm:$0xf]  ;;  %v381_v4 = vunpack.c.l.bf16 %v380_v1  ;;  %v388_v13 = vld [vmem:[#allocation8] sm:$0xf] }
  0xcb   : > { %794 = vset.pattern.permute.xlu0 %v1057_v0  ;;  %v383_v5 = vunpack.c.l.bf16 %v382_v2  ;;  %v386_v6 = vunpack.c.l.bf16 %v385_v3  ;;  %vm394_vm1 = vcmask 31744   ;;  %v446_v22 = vld [vmem:[#allocation10] sm:$0xff]  ;;  %v447_v23 = vld [vmem:[#allocation11] sm:$0xff]  ;;  %s1058_s8 = smov 0.0   ;;  %s686_s16 = sshll.u32 %s1351_s3, 4 }
  0xcc   : > { %487 = vperm.xlu1 %793, %v446_v22   ;;  %s697_s30 = sshll.u32 %s1116_s25, 8  ;;  %s378_s9 = scalar_lea.vmem [#allocation13], %s686_s16 }
  0xcd   : > { %v384_v7 = vadd.f32 %v383_v5, %v381_v4  ;;  %s522_s1 = sshll.u32 %s378_s9, 4  ;;  %s1377_s21 = scalar_lea.hbm %s1427_s6, %s697_s30  ;;  %s1379_s1 = int_to_ptr.vmem [resolvable:$true] %s522_s1 }
  0xce   : > { %s508_s25 = scalar_lea.sflag [#allocation4], %s1351_s3  ;;  %s971_s11 = scalar_lea.vmem %s1379_s1, 256 }
  0xcf   : > { %v387_v8 = vadd.f32 %v386_v6, %v384_v7  ;;  %p972_p4 = scmp.ne.s32.totalorder %s1379_s1, %s971_s11  ;;  %p1480_p7 = scmp.ne.s32.totalorder %s1463_s14, 0 }
  0xd0   : > { %494 = vperm.xlu1 %793, %v447_v23   ;;  %s1059_s10 = smov [#allocation13]  }
  0xd1   : > { %v390_v9 = vcombine.high %v387_v8, %v387_v8  ;;  %v392_v10 = vpack.c.bf16 %v387_v8, %v387_v8  ;;  %p973_p11 = pnand %p972_p4, %p1480_p7  ;;  %s975_s29 = sshll.u32 %s1059_s10, 4  ;;  %s976_s29 = int_to_ptr.vmem [resolvable:$false] %s975_s29 }
  0xd2   : > { %s977_s26 = scalar_lea.vmem %s976_s29, 512  ;;  %p978_p6 = scmp.lt.s32.totalorder %s1379_s1, %s976_s29 }
  0xd3   : > { %v393_v11 = vpack.c.bf16 %v390_v9, %v390_v9  ;;  %v400_v12 = vsel %vm398_vm0, %v392_v10, 0  ;;  %p974_p1 = pneg %p973_p11  ;;  %p979_p0 = scmp.lt.s32.totalorder %s977_s26, %s971_s11 }
  0xd5   : > { %687 = vmatprep.subr.msk.bf16.mxu0 %vm398_vm0, %v393_v11  ;;  %p980_p12 = por %p979_p0, %p978_p6 }
  0xd6   : > { %406 = vmatpush1.bf16.msra.mxu0 %v400_v12 }
  0xd7   : > { %p981_p13 = pnand %p980_p12, %p974_p1 }
  0xd9   : > { %688 = vmatmul.mubr.msk.bf16.vlgmr.msra.gmra.mrb[0].mxu0 %vm394_vm1, %v388_v13 }
 0x14b   : > { %v488_v43 = vpop.permute.xlu1 %487 }
 0x14f   : > { %v495_v49 = vpop.permute.xlu1 %494 }
 0x1ac   : > { %v439_v14 = vpop.f32.mrb[0].mxu0 }
 0x1ad   : > { %v441_v15 = vpop.f32.mrb[1].mxu0  ;;  %v458_v16 = vmul.f32 %v439_v14, %v439_v14 }
 0x1ae   : > { %v443_v17 = vpop.f32.mrb[2].mxu0  ;;  %v448_v18 = vadd.f32 %v441_v15, %v439_v14  ;;  %v459_v19 = vmul.f32 %v441_v15, %v441_v15 }
 0x1af   : > { %v444_v20 = vpop.f32.mrb[3].mxu0 }
 0x1b0   : > { %449 = vadd.xlane.f32.xlu0 %v448_v18  ;;  %v460_v21 = vadd.f32 %v459_v19, %v458_v16 }
 0x1b4   : > { %461 = vadd.xlane.f32.xlu0 %v460_v21 }
 0x23d   : > { %v450_v24 = vpop.xlane.xlu0 %449 }
 0x23e   : > { %v451_v25 = vrot.slane %v450_v24, 4 }
 0x240   : > { %v452_v26 = vadd.f32 %v451_v25, %v450_v24 }
 0x241   : > { %v462_v27 = vpop.xlane.xlu0 %461 }
 0x242   : > { %v453_v28 = vrot.slane %v452_v26, 2  ;;  %v463_v29 = vrot.slane %v462_v27, 4 }
 0x244   : > { %v464_v30 = vadd.f32 %v463_v29, %v462_v27  ;;  %v454_v31 = vadd.f32 %v453_v28, %v452_v26 }
 0x246   : > { %v465_v32 = vrot.slane %v464_v30, 2  ;;  %v455_v33 = vrot.slane %v454_v31, 1 }
 0x248   : > { %v466_v34 = vadd.f32 %v465_v32, %v464_v30  ;;  %v456_v35 = vadd.f32 %v455_v33, %v454_v31 }
 0x24a   : > { %698 = vpush %v456_v35  ;;  %v467_v36 = vrot.slane %v466_v34, 1 }
 0x24c   : > { %v468_v37 = vadd.f32 %v467_v36, %v466_v34 }
 0x24e   : > { %700 = vpush %v468_v37 }
 0x27b   : > { %s699_s27 = spop %698 }
 0x27c   : > { %s470_s28 = smul.f32 0.00048828125, %s699_s27 }
 0x27e   : > { %v475_v38 = vstv %s470_s28  ;;  %s472_s13 = smul.f32 %s470_s28, %s470_s28 }
 0x27f   : > { %s701_s12 = spop %700  ;;  %v476_v39 = vsub.f32 %v439_v14, %v475_v38  ;;  %v477_v40 = vsub.f32 %v441_v15, %v475_v38 }
 0x280   : > { %s471_s19 = smul.f32 0.00048828125, %s701_s12 }
 0x282   : > { %s473_s7 = ssub.f32 %s471_s19, %s472_s13 }
 0x284   : > { %s474_s15 = smax.f32 %s1058_s8, %s473_s7 }
 0x285   : > { %s478_s20 = sadd.f32 1e-05, %s474_s15 }
 0x287   : > { %v479_v41 = vstv %s478_s20 }
 0x288   : > { %795 = vrsqrt.f32 %v479_v41 }
 0x292   : > { %v796_v42 = vpop.eup %795 }
 0x293   : > { %702 = vpush %v796_v42 }
 0x2c4   : > { %s703_s24 = spop %702 }
 0x2c5   : > { %v482_v44 = vstv %s703_s24 }
 0x2c6   : > { %v483_v45 = vmul.f32 %v482_v44, %v476_v39  ;;  %v484_v46 = vmul.f32 %v482_v44, %v477_v40 }
 0x2c8   : > { %v490_v47 = vmul.f32 %v488_v43, %v483_v45  ;;  %v491_v48 = vmul.f32 %v488_v43, %v484_v46 }
 0x2ca   : > { %v497_v50 = vadd.f32 %v495_v49, %v490_v47  ;;  %v498_v51 = vadd.f32 %v495_v49, %v491_v48 }
 0x2cc   : > { %vm499_vm2 = vcmp.ge.f32.partialorder %v497_v50, 0.0  ;;  %vm500_vm3 = vcmp.ge.f32.partialorder %v498_v51, 0.0  ;;  %v501_v52 = vmul.f32 0.2, %v497_v50  ;;  %v502_v53 = vmul.f32 0.2, %v498_v51 }
 0x2ce   : > { %v503_v54 = vsel %vm499_vm2, %v497_v50, %v501_v52  ;;  %v504_v55 = vsel %vm500_vm3, %v498_v51, %v502_v53 }
 0x2cf   : > { %505 = vst [vmem:[%s378_s9] sm:$0xff] %v503_v54  ;;  %506 = vst [vmem:[%s378_s9 + $0x8] sm:$0xff] %v504_v55 }
 0x2d0   : > { %984 = shalt.err (!%p981_p13)
}
 0x2d1   : > { %s985_s3 = scalar_lea.hbm %s1377_s21, 256  ;;  %s989_s13 = scalar_lea.hbm %s1427_s6, 512 }
 0x2d2   : > { %p986_p9 = scmp.ne.s32.totalorder %s1377_s21, %s985_s3  ;;  %p990_p5 = scmp.lt.u32.totalorder %s1377_s21, %s1427_s6 }
 0x2d3   : > { %p991_p10 = scmp.lt.u32.totalorder %s989_s13, %s985_s3  ;;  %p993_p4 = scmp.lt.u32.totalorder %s985_s3, %s1377_s21 }
 0x2d4   : > { %p987_p3 = pnand %p986_p9, %p1480_p7 }
 0x2d5   : > { %p992_p2 = por %p991_p10, %p990_p5 }
 0x2d6   : > { %p988_p8 = pneg %p987_p3 }
 0x2d7   : > { %p994_p11 = por %p993_p4, %p992_p2 }
 0x2d9   : > { %p995_p1 = pnand %p994_p11, %p988_p8 }
 0x2db   : > { %998 = shalt.err (!%p995_p1)
}
 0x2dc   : > { %722 = dma.vmem_to_hbm [thread:$0]  (%p1480_p7), %s1379_s1, 256, %s1377_s21, %s508_s25  }
 0x2dd PF: > { %s1481_s7 = sld [smem:[#allocation19_spill]]  ;;  %s1482_s8 = sld [smem:[#allocation21_spill]] }
 0x2de   : > { %s1483_s15 = sld [smem:[#allocation20_spill]] }
 0x2e3   : > { %s534_s20 = sand.u32 1, %s1481_s7   ;;  %p1484_p6 = scmp.ne.s32.totalorder %s1482_s8, 0 }
 0x2e4   : > { %p1485_p0 = scmp.ge.s32.totalorder %s1483_s15, 2  ;;  %s535_s24 = scalar_lea.sflag [#allocation4], %s534_s20 }
 0x2e6   : > { %p745_p12 = pnand %p1485_p0, %p1484_p6 }
 0x2e8   : > { %1032 = dma.done.wait (!%p745_p12), %s535_s24, 256  }
 0x2e9   : > { %1034 = vsyncadd (!%p745_p12), %s535_s24, 4294967040  ;;  %s1486_s24 = sld [smem:[#allocation22_spill]]  ;;  %s1487_s16 = sld [smem:[#allocation23_spill]] }
 0x2ea   : > { %s1488_s21 = smov %s1041_s22  ;;  %s1489_s22 = smov %s1045_s23 }
 0x2ef   : > { %p24_p13 = scmp.ge.s32.totalorder %s1486_s24, 4   ;;  %s1490_s23 = smov %s1487_s16 }
 0x2f1   :  { %26 = sbr.rel (!%p24_p13) target bundleno = 12 (0xc), region = 125 }
 0x2f8   :  { %540 = vsyncpa [#allocation3], 1 }
 0x2f9   :  { %542 = vsyncpa [#allocation3 + $0x1], 1 }
 0x2fa   :  { %543 = vsyncpa [#allocation6], 1 }
 0x2fb   :  { %545 = vsyncpa [#allocation6 + $0x1], 1 }
 0x2fc   :  { %546 = vsyncpa [#allocation9], 1 }
 0x2fd   :  { %547 = vsyncpa [#allocation12], 1 }
 0x2fe   :  { %548 = vsyncpa [#allocation4], 1 }
 0x2ff   :  { %550 = vsyncpa [#allocation4 + $0x1], 1 }

</bundles_post_ra>
